<compile_context>
chip_gen: v5e
topology: v5e:2x2
jax: 0.10.0
libtpu: 0.0.40
codegen_flags: <defaults>
</compile_context>

<pallas_src>
import numpy as np
import jax
import jax.numpy as jnp
from jax import lax
from jax.experimental import pallas as pl
from jax.experimental.pallas import tpu as pltpu


# -----------------------------------------------------------------------------
# Generation-aware gate layout (v6e/v7x: 128-lane slot per gate; v5e: compact).
# -----------------------------------------------------------------------------
def pick_gate_stride(hidden):
    try:
        kind = jax.devices()[0].device_kind.lower()
    except Exception:
        kind = ""
    # v5 generation: 128-wide MXU -> keep all gates inside one 128-lane tile so
    # the per-step recurrent matmul is a single MXU pass.
    if "v5" in kind and 4 * hidden <= 128:
        return hidden
    # v6e / v7x (256-wide MXU): per-gate 128-lane tiles; every gate slice starts
    # at a vreg boundary, removing per-step cross-lane relayouts from the chain.
    return 128


# -----------------------------------------------------------------------------
# Pallas kernel: wavefront multi-layer GRU recurrence + readout, all in VMEM.
# -----------------------------------------------------------------------------
def make_gru_kernel(num_layers, seq_len, batch_p, hidden, gate_stride):
    L, T, Bp, H, GS = num_layers, seq_len, batch_p, hidden, gate_stride

    def kernel(x_ref, mask_ref, wi0_ref, bx0_ref, wh0_ref, wc_ref, bc_ref,
               wro_ref, bro_ref, out_ref, xproj_ref):
        # x_ref     : (T*Bp, H)       bf16  layer-0 one-hot input (features padded to H)
        # mask_ref  : (T, Bp, H)      f32   1.0 where t < length[b] else 0.0 (hoisted)
        # wi0_ref   : (H, W4)         bf16  layer-0 input weights, slots [r|z|n_x|0]
        # bx0_ref   : (1, W4)         f32   layer-0 biases, slots [br|bz|b_in|b_hn]
        # wh0_ref   : (H, W4)         bf16  layer-0 recurrent weights [Whr|Whz|0|Whn]
        # wc_ref    : (L-1, 2H, W4)   bf16  layers>=1 fused [x|h] weights
        # bc_ref    : (L-1, 1, W4)    f32   layers>=1 folded biases
        # wro_ref   : (H, E)          bf16
        # bro_ref   : (1, E)          f32
        # out_ref   : (Bp, E)         f32
        # xproj_ref : (T*Bp, W4)      f32   scratch: hoisted layer-0 projections

        # ---- Hoisted layer-0 input projection: ONE matmul for the whole
        #      sequence, with all layer-0 biases (incl. b_hn in slot 3) folded in.
        xproj_ref[...] = (
            jnp.dot(x_ref[...], wi0_ref[...], preferred_element_type=jnp.float32)
            + bx0_ref[...])

        def gate_step(g, h, m):
            # g : (Bp, W4) pre-activations in slots [r | z | n_x | n_h]
            rz = jax.nn.sigmoid(g[:, 0:2 * GS])          # fused r/z: one EUP region
            r = rz[:, 0:H]
            z = rz[:, GS:GS + H]
            n = jnp.tanh(g[:, 2 * GS:2 * GS + H] + r * g[:, 3 * GS:3 * GS + H])
            h_cand = n + z * (h - n)                     # == (1-z)*n + z*h
            return h + m * (h_cand - h)                  # freeze beyond each length

        # ---- Wavefront over (layer, time): wave w runs layer l at t = w - l.
        #      Serial chain = T + L - 1 waves instead of L*T steps; within a wave
        #      the layer-steps are independent and can overlap on the MXU/EUP.
        h = [jnp.zeros((Bp, H), jnp.float32) for _ in range(L)]
        for w in range(T + L - 1):
            h_new = list(h)
            for l in range(L):
                t = w - l
                if not (0 <= t < T):
                    continue
                m_t = mask_ref[t]                                       # (Bp, H)
                if l == 0:
                    g = (xproj_ref[pl.ds(t * Bp, Bp), :]
                         + jnp.dot(h[0].astype(jnp.bfloat16), wh0_ref[...],
                                   preferred_element_type=jnp.float32))
                else:
                    # h[l-1] is layer l-1's output at this same timestep t
                    # (computed in the previous wave): one fused matmul per step.
                    xh = jnp.concatenate([h[l - 1], h[l]],
                                         axis=1).astype(jnp.bfloat16)   # (Bp, 2H)
                    g = (jnp.dot(xh, wc_ref[l - 1],
                                 preferred_element_type=jnp.float32)
                         + bc_ref[l - 1])
                h_new[l] = gate_step(g, h[l], m_t)
            h = h_new

        # readout Linear(hidden -> embedding) on the last layer's final hidden
        out_ref[...] = (jnp.dot(h[L - 1].astype(jnp.bfloat16), wro_ref[...],
                                preferred_element_type=jnp.float32)
                        + bro_ref[...])

    return kernel


# -----------------------------------------------------------------------------
# Wrapper: preprocessing (one-hot, batch padding, hoisted length mask) + pallas_call.
# -----------------------------------------------------------------------------
def gru_forward(padded_idx, lengths, packed, *, alphabet_size, hidden_size,
                num_layers, gate_stride):
    """padded_idx: (B, T) int32 in [-1, A-1], lengths: (B,) int32 -> (B, E) f32."""
    assert alphabet_size <= hidden_size, "layer-0 input padded into H columns"
    B, T = padded_idx.shape
    H = hidden_size
    W4 = packed["wi0"].shape[1]
    E = packed["wro"].shape[1]
    Bp = ((B + 7) // 8) * 8                       # pad batch to sublane multiple

    idx_p = jnp.pad(padded_idx, ((0, Bp - B), (0, 0)), constant_values=-1)
    len_p = jnp.pad(lengths.astype(jnp.int32), (0, Bp - B), constant_values=0)

    # index_to_one_hot: [eye(A); zeros(1,A)] indexed at x+1  ==  one_hot(x+1, A)
    one_hot = jax.nn.one_hot(idx_p + 1, alphabet_size, dtype=jnp.float32)  # (Bp,T,A)
    x_tm = jnp.transpose(one_hot, (1, 0, 2))                               # (T,Bp,A)
    x_tm = jnp.pad(x_tm, ((0, 0), (0, 0), (0, H - alphabet_size)))         # (T,Bp,H)
    x2d = x_tm.reshape(T * Bp, H).astype(jnp.bfloat16)

    # Hoisted pack_padded_sequence freeze mask: 1.0 where t < length[b], else 0.0.
    t_iota = jnp.arange(T, dtype=jnp.int32).reshape(T, 1, 1)
    mask = (t_iota < len_p.reshape(1, Bp, 1)).astype(jnp.float32)
    mask = jnp.broadcast_to(mask, (T, Bp, H))

    inputs = [x2d, mask, packed["wi0"], packed["bx0"], packed["wh0"],
              packed["wc"], packed["bc"], packed["wro"], packed["bro"]]

    out = pl.pallas_call(
        make_gru_kernel(num_layers, T, Bp, H, gate_stride),
        out_shape=jax.ShapeDtypeStruct((Bp, E), jnp.float32),
        in_specs=[pl.BlockSpec(memory_space=pltpu.MemorySpace.VMEM)] * len(inputs),
        out_specs=pl.BlockSpec(memory_space=pltpu.MemorySpace.VMEM),
        scratch_shapes=[pltpu.VMEM((T * Bp, W4), jnp.float32)],
    )(*inputs)
    return out[:B]


# -----------------------------------------------------------------------------
# Deterministic parameter init (matches nn.GRU / nn.Linear shapes & init range),
# kept in raw PyTorch layout for the reference; packed separately for the kernel.
# -----------------------------------------------------------------------------
def init_params(key, alphabet_size, hidden_size, embedding_size, num_layers):
    k = 1.0 / np.sqrt(hidden_size)
    layers = []
    for l in range(num_layers):
        in_size = alphabet_size if l == 0 else hidden_size
        key, k1, k2, k3, k4 = jax.random.split(key, 5)
        w_ih = jax.random.uniform(k1, (3 * hidden_size, in_size), jnp.float32, -k, k)
        w_hh = jax.random.uniform(k2, (3 * hidden_size, hidden_size), jnp.float32, -k, k)
        b_ih = jax.random.uniform(k3, (3 * hidden_size,), jnp.float32, -k, k)
        b_hh = jax.random.uniform(k4, (3 * hidden_size,), jnp.float32, -k, k)
        layers.append((w_ih, w_hh, b_ih, b_hh))
    key, k5, k6 = jax.random.split(key, 3)
    w_ro = jax.random.uniform(k5, (embedding_size, hidden_size), jnp.float32, -k, k)
    b_ro = jax.random.uniform(k6, (embedding_size,), jnp.float32, -k, k)
    return {"layers": layers, "w_ro": w_ro, "b_ro": b_ro}


def pack_params(raw, alphabet_size, hidden_size, num_layers, gate_stride):
    """Pack weights into the 4-slot [r | z | n_x | n_h] lane layout for the kernel."""
    H, GS, A = hidden_size, gate_stride, alphabet_size
    assert GS >= H, "each gate slot must hold H columns"
    W4 = ((4 * GS + 127) // 128) * 128            # lane-dense packed width

    def slot(i):
        return slice(i * GS, i * GS + H)

    # ---- layer 0: hoisted input weights + folded biases, per-step recurrent weights.
    w_ih0, w_hh0, b_ih0, b_hh0 = raw["layers"][0]
    W_ir, W_iz, W_in = jnp.split(w_ih0, 3, axis=0)
    W_hr, W_hz, W_hn = jnp.split(w_hh0, 3, axis=0)
    b_ir, b_iz, b_in = jnp.split(b_ih0, 3)
    b_hr, b_hz, b_hn = jnp.split(b_hh0, 3)

    wi0 = jnp.zeros((H, W4), jnp.float32)
    wi0 = wi0.at[:A, slot(0)].set(W_ir.T)
    wi0 = wi0.at[:A, slot(1)].set(W_iz.T)
    wi0 = wi0.at[:A, slot(2)].set(W_in.T)
    bx0 = jnp.zeros((1, W4), jnp.float32)
    bx0 = bx0.at[0, slot(0)].set(b_ir + b_hr)
    bx0 = bx0.at[0, slot(1)].set(b_iz + b_hz)
    bx0 = bx0.at[0, slot(2)].set(b_in)
    bx0 = bx0.at[0, slot(3)].set(b_hn)            # b_hn parked in the n_h slot
    wh0 = jnp.zeros((H, W4), jnp.float32)
    wh0 = wh0.at[:, slot(0)].set(W_hr.T)
    wh0 = wh0.at[:, slot(1)].set(W_hz.T)
    wh0 = wh0.at[:, slot(3)].set(W_hn.T)

    # ---- layers >= 1: fused [x | h] weights (2H, W4) + folded bias rows.
    wc_l, bc_l = [], []
    for l in range(1, num_layers):
        w_ih, w_hh, b_ih, b_hh = raw["layers"][l]
        Wir, Wiz, Win = jnp.split(w_ih, 3, axis=0)
        Whr, Whz, Whn = jnp.split(w_hh, 3, axis=0)
        bir, biz, bin_ = jnp.split(b_ih, 3)
        bhr, bhz, bhn = jnp.split(b_hh, 3)
        wc = jnp.zeros((2 * H, W4), jnp.float32)
        wc = wc.at[:H, slot(0)].set(Wir.T)
        wc = wc.at[:H, slot(1)].set(Wiz.T)
        wc = wc.at[:H, slot(2)].set(Win.T)
        wc = wc.at[H:, slot(0)].set(Whr.T)
        wc = wc.at[H:, slot(1)].set(Whz.T)
        wc = wc.at[H:, slot(3)].set(Whn.T)
        bc = jnp.zeros((1, W4), jnp.float32)
        bc = bc.at[0, slot(0)].set(bir + bhr)
        bc = bc.at[0, slot(1)].set(biz + bhz)
        bc = bc.at[0, slot(2)].set(bin_)
        bc = bc.at[0, slot(3)].set(bhn)
        wc_l.append(wc)
        bc_l.append(bc)
    if not wc_l:                                  # num_layers == 1: dummy, never read
        wc_l = [jnp.zeros((2 * H, W4), jnp.float32)]
        bc_l = [jnp.zeros((1, W4), jnp.float32)]

    return {
        "wi0": wi0.astype(jnp.bfloat16),          # (H, W4)
        "bx0": bx0,                               # (1, W4) f32
        "wh0": wh0.astype(jnp.bfloat16),          # (H, W4)
        "wc": jnp.stack(wc_l).astype(jnp.bfloat16),  # (L-1, 2H, W4)
        "bc": jnp.stack(bc_l),                    # (L-1, 1, W4) f32
        "wro": raw["w_ro"].T.astype(jnp.bfloat16),   # (H, E)
        "bro": raw["b_ro"].reshape(1, -1),        # (1, E) f32
    }


# -----------------------------------------------------------------------------
# Pure-JAX f32 reference (mirrors PyTorch GRU + packed-sequence gather + Linear).
# -----------------------------------------------------------------------------
def ref_forward(padded_idx, lengths, raw, alphabet_size):
    B, T = padded_idx.shape
    hp = lax.Precision.HIGHEST
    one_hot = jax.nn.one_hot(padded_idx + 1, alphabet_size, dtype=jnp.float32)
    layer_in = jnp.transpose(one_hot, (1, 0, 2))          # (T, B, A)
    H = raw["layers"][0][1].shape[1]
    len_col = lengths.reshape(B, 1)
    h_final = None
    for (w_ih, w_hh, b_ih, b_hh) in raw["layers"]:
        W_ir, W_iz, W_in = [w.T for w in jnp.split(w_ih, 3, axis=0)]
        W_hr, W_hz, W_hn = [w.T for w in jnp.split(w_hh, 3, axis=0)]
        b_ir, b_iz, b_in = jnp.split(b_ih, 3)
        b_hr, b_hz, b_hn = jnp.split(b_hh, 3)
        h = jnp.zeros((B, H), jnp.float32)
        outs = []
        for t in range(T):
            x_t = layer_in[t]
            r = jax.nn.sigmoid(jnp.dot(x_t, W_ir, precision=hp) + b_ir
                               + jnp.dot(h, W_hr, precision=hp) + b_hr)
            z = jax.nn.sigmoid(jnp.dot(x_t, W_iz, precision=hp) + b_iz
                               + jnp.dot(h, W_hz, precision=hp) + b_hz)
            n = jnp.tanh(jnp.dot(x_t, W_in, precision=hp) + b_in
                         + r * (jnp.dot(h, W_hn, precision=hp) + b_hn))
            h_cand = (1.0 - z) * n + z * h
            h = jnp.where(t < len_col, h_cand, h)
            outs.append(h)
        layer_in = jnp.stack(outs)
        h_final = h
    return jnp.dot(h_final, raw["w_ro"].T, precision=hp) + raw["b_ro"]


if __name__ == "__main__":
    # Small shapes consistent with the module's forward.
    alphabet_size = 4      # one-hot feature dim (GRU input_size)
    hidden_size = 32
    embedding_size = 16
    recurrent_layers = 2
    max_length = 8         # T
    batch = 4              # B (padded to 8 sublanes inside the wrapper)

    key = jax.random.PRNGKey(0)
    key, pkey, skey = jax.random.split(key, 3)
    raw = init_params(pkey, alphabet_size, hidden_size, embedding_size,
                      recurrent_layers)

    gate_stride = pick_gate_stride(hidden_size)   # 128 on v6e/v7x, H on v5e
    packed = pack_params(raw, alphabet_size, hidden_size, recurrent_layers,
                         gate_stride)

    # Variable-length index sequences, padded with 0 (as pad_sequence does).
    lengths_np = np.array([8, 5, 3, 6], dtype=np.int32)
    idx = jax.random.randint(skey, (batch, max_length), 0, alphabet_size,
                             dtype=jnp.int32)
    t_iota = jnp.arange(max_length, dtype=jnp.int32)[None, :]
    padded_idx = jnp.where(t_iota < lengths_np[:, None], idx, 0)
    lengths = jnp.asarray(lengths_np)

    out = gru_forward(padded_idx, lengths, packed,
                      alphabet_size=alphabet_size, hidden_size=hidden_size,
                      num_layers=recurrent_layers, gate_stride=gate_stride)
    out = jax.block_until_ready(out)

    ref = ref_forward(padded_idx, lengths, raw, alphabet_size)
    # Kernel uses bf16 MXU operands with f32 accumulation -> looser tolerance
    # than a pure-f32 comparison.
    np.testing.assert_allclose(np.asarray(out), np.asarray(ref),
                               atol=2e-2, rtol=2e-2)

    assert out.shape == (batch, embedding_size)
    print("KERNEL_OK")
</pallas_src>

<mosaic_0001>
module attributes {stable_mosaic.version = 11 : i64} {
  func.func @kernel(%arg0: memref<64x32xbf16, #tpu.memory_space<vmem>>, %arg1: memref<8x8x32xf32, #tpu.memory_space<vmem>>, %arg2: memref<32x512xbf16, #tpu.memory_space<vmem>>, %arg3: memref<1x512xf32, #tpu.memory_space<vmem>>, %arg4: memref<32x512xbf16, #tpu.memory_space<vmem>>, %arg5: memref<1x64x512xbf16, #tpu.memory_space<vmem>>, %arg6: memref<1x1x512xf32, #tpu.memory_space<vmem>>, %arg7: memref<32x16xbf16, #tpu.memory_space<vmem>>, %arg8: memref<1x16xf32, #tpu.memory_space<vmem>>, %arg9: memref<8x16xf32, #tpu.memory_space<vmem>>, %arg10: memref<64x512xf32, #tpu.memory_space<vmem>>) attributes {dimension_semantics = [], scalar_prefetch = 0 : i64, scratch_operands = 1 : i64, tpu.core_type = #tpu.core_type<tc>} {
    %c0 = arith.constant 0 : index
    %c0_0 = arith.constant 0 : index
    %0 = vector.load %arg0[%c0, %c0_0] : memref<64x32xbf16, #tpu.memory_space<vmem>>, vector<64x32xbf16>
    %c0_1 = arith.constant 0 : index
    %c0_2 = arith.constant 0 : index
    %1 = vector.load %arg2[%c0_1, %c0_2] : memref<32x512xbf16, #tpu.memory_space<vmem>>, vector<32x512xbf16>
    %cst = arith.constant dense<0.000000e+00> : vector<64x512xf32>
    %2 = tpu.matmul %0, %1, %cst {dimension_numbers = #tpu.dot_dimension_numbers<[1], [0], [0], [1], [0, 0, 1, 1], [], []>} : vector<64x32xbf16>, vector<32x512xbf16>, vector<64x512xf32> -> vector<64x512xf32>
    %c0_3 = arith.constant 0 : index
    %c0_4 = arith.constant 0 : index
    %3 = vector.load %arg3[%c0_3, %c0_4] : memref<1x512xf32, #tpu.memory_space<vmem>>, vector<1x512xf32>
    %4 = vector.broadcast %3 : vector<1x512xf32> to vector<64x512xf32>
    %5 = arith.addf %2, %4 : vector<64x512xf32>
    %c0_5 = arith.constant 0 : index
    %c0_6 = arith.constant 0 : index
    %6 = vector.load %arg10[%c0_5, %c0_6] : memref<64x512xf32, #tpu.memory_space<vmem>>, vector<64x512xf32>
    tpu.vector_store %arg10[%c0_5, %c0_6], %5 {strides = array<i32>} : memref<64x512xf32, #tpu.memory_space<vmem>>, vector<64x512xf32>,
    %cst_7 = arith.constant 0.000000e+00 : f32
    %7 = vector.broadcast %cst_7 : f32 to vector<8x32xf32>
    %cst_8 = arith.constant 0.000000e+00 : f32
    %8 = vector.broadcast %cst_8 : f32 to vector<8x32xf32>
    %c0_9 = arith.constant 0 : index
    %c0_10 = arith.constant 0 : index
    %c0_11 = arith.constant 0 : index
    %9 = vector.load %arg1[%c0_9, %c0_10, %c0_11] : memref<8x8x32xf32, #tpu.memory_space<vmem>>, vector<1x8x32xf32>
    %10 = vector.shape_cast %9 : vector<1x8x32xf32> to vector<8x32xf32>
    %c0_12 = arith.constant 0 : index
    %c0_13 = arith.constant 0 : index
    %11 = vector.load %arg10[%c0_12, %c0_13] : memref<64x512xf32, #tpu.memory_space<vmem>>, vector<8x512xf32>
    %12 = arith.truncf %7 : vector<8x32xf32> to vector<8x32xbf16>
    %c0_14 = arith.constant 0 : index
    %c0_15 = arith.constant 0 : index
    %13 = vector.load %arg4[%c0_14, %c0_15] : memref<32x512xbf16, #tpu.memory_space<vmem>>, vector<32x512xbf16>
    %cst_16 = arith.constant dense<0.000000e+00> : vector<8x512xf32>
    %14 = tpu.matmul %12, %13, %cst_16 {dimension_numbers = #tpu.dot_dimension_numbers<[1], [0], [0], [1], [0, 0, 1, 1], [], []>} : vector<8x32xbf16>, vector<32x512xbf16>, vector<8x512xf32> -> vector<8x512xf32>
    %15 = arith.addf %11, %14 : vector<8x512xf32>
    %16 = vector.extract_strided_slice %15 {offsets = [0, 0], sizes = [8, 256], strides = [1, 1]} : vector<8x512xf32> to vector<8x256xf32>
    %17 = arith.negf %16 : vector<8x256xf32>
    %18 = math.exp %17 : vector<8x256xf32>
    %cst_17 = arith.constant 1.000000e+00 : f32
    %19 = vector.broadcast %cst_17 : f32 to vector<8x256xf32>
    %20 = arith.addf %19, %18 : vector<8x256xf32>
    %21 = arith.divf %19, %20 : vector<8x256xf32>
    %22 = vector.extract_strided_slice %21 {offsets = [0, 0], sizes = [8, 32], strides = [1, 1]} : vector<8x256xf32> to vector<8x32xf32>
    %23 = vector.extract_strided_slice %21 {offsets = [0, 128], sizes = [8, 32], strides = [1, 1]} : vector<8x256xf32> to vector<8x32xf32>
    %24 = vector.extract_strided_slice %15 {offsets = [0, 256], sizes = [8, 32], strides = [1, 1]} : vector<8x512xf32> to vector<8x32xf32>
    %25 = vector.extract_strided_slice %15 {offsets = [0, 384], sizes = [8, 32], strides = [1, 1]} : vector<8x512xf32> to vector<8x32xf32>
    %26 = arith.mulf %22, %25 : vector<8x32xf32>
    %27 = arith.addf %24, %26 : vector<8x32xf32>
    %28 = math.tanh %27 : vector<8x32xf32>
    %29 = arith.subf %7, %28 : vector<8x32xf32>
    %30 = arith.mulf %23, %29 : vector<8x32xf32>
    %31 = arith.addf %28, %30 : vector<8x32xf32>
    %32 = arith.subf %31, %7 : vector<8x32xf32>
    %33 = arith.mulf %10, %32 : vector<8x32xf32>
    %34 = arith.addf %7, %33 : vector<8x32xf32>
    %c1 = arith.constant 1 : index
    %c0_18 = arith.constant 0 : index
    %c0_19 = arith.constant 0 : index
    %35 = vector.load %arg1[%c1, %c0_18, %c0_19] : memref<8x8x32xf32, #tpu.memory_space<vmem>>, vector<1x8x32xf32>
    %36 = vector.shape_cast %35 : vector<1x8x32xf32> to vector<8x32xf32>
    %c8 = arith.constant 8 : index
    %c0_20 = arith.constant 0 : index
    %37 = vector.load %arg10[%c8, %c0_20] : memref<64x512xf32, #tpu.memory_space<vmem>>, vector<8x512xf32>
    %38 = arith.truncf %34 : vector<8x32xf32> to vector<8x32xbf16>
    %c0_21 = arith.constant 0 : index
    %c0_22 = arith.constant 0 : index
    %39 = vector.load %arg4[%c0_21, %c0_22] : memref<32x512xbf16, #tpu.memory_space<vmem>>, vector<32x512xbf16>
    %cst_23 = arith.constant dense<0.000000e+00> : vector<8x512xf32>
    %40 = tpu.matmul %38, %39, %cst_23 {dimension_numbers = #tpu.dot_dimension_numbers<[1], [0], [0], [1], [0, 0, 1, 1], [], []>} : vector<8x32xbf16>, vector<32x512xbf16>, vector<8x512xf32> -> vector<8x512xf32>
    %41 = arith.addf %37, %40 : vector<8x512xf32>
    %42 = vector.extract_strided_slice %41 {offsets = [0, 0], sizes = [8, 256], strides = [1, 1]} : vector<8x512xf32> to vector<8x256xf32>
    %43 = arith.negf %42 : vector<8x256xf32>
    %44 = math.exp %43 : vector<8x256xf32>
    %cst_24 = arith.constant 1.000000e+00 : f32
    %45 = vector.broadcast %cst_24 : f32 to vector<8x256xf32>
    %46 = arith.addf %45, %44 : vector<8x256xf32>
    %47 = arith.divf %45, %46 : vector<8x256xf32>
    %48 = vector.extract_strided_slice %47 {offsets = [0, 0], sizes = [8, 32], strides = [1, 1]} : vector<8x256xf32> to vector<8x32xf32>
    %49 = vector.extract_strided_slice %47 {offsets = [0, 128], sizes = [8, 32], strides = [1, 1]} : vector<8x256xf32> to vector<8x32xf32>
    %50 = vector.extract_strided_slice %41 {offsets = [0, 256], sizes = [8, 32], strides = [1, 1]} : vector<8x512xf32> to vector<8x32xf32>
    %51 = vector.extract_strided_slice %41 {offsets = [0, 384], sizes = [8, 32], strides = [1, 1]} : vector<8x512xf32> to vector<8x32xf32>
    %52 = arith.mulf %48, %51 : vector<8x32xf32>
    %53 = arith.addf %50, %52 : vector<8x32xf32>
    %54 = math.tanh %53 : vector<8x32xf32>
    %55 = arith.subf %34, %54 : vector<8x32xf32>
    %56 = arith.mulf %49, %55 : vector<8x32xf32>
    %57 = arith.addf %54, %56 : vector<8x32xf32>
    %58 = arith.subf %57, %34 : vector<8x32xf32>
    %59 = arith.mulf %36, %58 : vector<8x32xf32>
    %60 = arith.addf %34, %59 : vector<8x32xf32>
    %c0_25 = arith.constant 0 : index
    %c0_26 = arith.constant 0 : index
    %c0_27 = arith.constant 0 : index
    %61 = vector.load %arg1[%c0_25, %c0_26, %c0_27] : memref<8x8x32xf32, #tpu.memory_space<vmem>>, vector<1x8x32xf32>
    %62 = vector.shape_cast %61 : vector<1x8x32xf32> to vector<8x32xf32>
    %63 = tpu.concatenate %34, %8 in 1 : vector<8x32xf32>, vector<8x32xf32> -> vector<8x64xf32>
    %64 = arith.truncf %63 : vector<8x64xf32> to vector<8x64xbf16>
    %c0_28 = arith.constant 0 : index
    %c0_29 = arith.constant 0 : index
    %c0_30 = arith.constant 0 : index
    %65 = vector.load %arg5[%c0_28, %c0_29, %c0_30] : memref<1x64x512xbf16, #tpu.memory_space<vmem>>, vector<1x64x512xbf16>
    %66 = vector.shape_cast %65 : vector<1x64x512xbf16> to vector<64x512xbf16>
    %cst_31 = arith.constant dense<0.000000e+00> : vector<8x512xf32>
    %67 = tpu.matmul %64, %66, %cst_31 {dimension_numbers = #tpu.dot_dimension_numbers<[1], [0], [0], [1], [0, 0, 1, 1], [], []>} : vector<8x64xbf16>, vector<64x512xbf16>, vector<8x512xf32> -> vector<8x512xf32>
    %c0_32 = arith.constant 0 : index
    %c0_33 = arith.constant 0 : index
    %c0_34 = arith.constant 0 : index
    %68 = vector.load %arg6[%c0_32, %c0_33, %c0_34] : memref<1x1x512xf32, #tpu.memory_space<vmem>>, vector<1x1x512xf32>
    %69 = vector.shape_cast %68 : vector<1x1x512xf32> to vector<1x512xf32>
    %70 = vector.broadcast %69 : vector<1x512xf32> to vector<8x512xf32>
    %71 = arith.addf %67, %70 : vector<8x512xf32>
    %72 = vector.extract_strided_slice %71 {offsets = [0, 0], sizes = [8, 256], strides = [1, 1]} : vector<8x512xf32> to vector<8x256xf32>
    %73 = arith.negf %72 : vector<8x256xf32>
    %74 = math.exp %73 : vector<8x256xf32>
    %cst_35 = arith.constant 1.000000e+00 : f32
    %75 = vector.broadcast %cst_35 : f32 to vector<8x256xf32>
    %76 = arith.addf %75, %74 : vector<8x256xf32>
    %77 = arith.divf %75, %76 : vector<8x256xf32>
    %78 = vector.extract_strided_slice %77 {offsets = [0, 0], sizes = [8, 32], strides = [1, 1]} : vector<8x256xf32> to vector<8x32xf32>
    %79 = vector.extract_strided_slice %77 {offsets = [0, 128], sizes = [8, 32], strides = [1, 1]} : vector<8x256xf32> to vector<8x32xf32>
    %80 = vector.extract_strided_slice %71 {offsets = [0, 256], sizes = [8, 32], strides = [1, 1]} : vector<8x512xf32> to vector<8x32xf32>
    %81 = vector.extract_strided_slice %71 {offsets = [0, 384], sizes = [8, 32], strides = [1, 1]} : vector<8x512xf32> to vector<8x32xf32>
    %82 = arith.mulf %78, %81 : vector<8x32xf32>
    %83 = arith.addf %80, %82 : vector<8x32xf32>
    %84 = math.tanh %83 : vector<8x32xf32>
    %85 = arith.subf %8, %84 : vector<8x32xf32>
    %86 = arith.mulf %79, %85 : vector<8x32xf32>
    %87 = arith.addf %84, %86 : vector<8x32xf32>
    %88 = arith.subf %87, %8 : vector<8x32xf32>
    %89 = arith.mulf %62, %88 : vector<8x32xf32>
    %90 = arith.addf %8, %89 : vector<8x32xf32>
    %c2 = arith.constant 2 : index
    %c0_36 = arith.constant 0 : index
    %c0_37 = arith.constant 0 : index
    %91 = vector.load %arg1[%c2, %c0_36, %c0_37] : memref<8x8x32xf32, #tpu.memory_space<vmem>>, vector<1x8x32xf32>
    %92 = vector.shape_cast %91 : vector<1x8x32xf32> to vector<8x32xf32>
    %c16 = arith.constant 16 : index
    %c0_38 = arith.constant 0 : index
    %93 = vector.load %arg10[%c16, %c0_38] : memref<64x512xf32, #tpu.memory_space<vmem>>, vector<8x512xf32>
    %94 = arith.truncf %60 : vector<8x32xf32> to vector<8x32xbf16>
    %c0_39 = arith.constant 0 : index
    %c0_40 = arith.constant 0 : index
    %95 = vector.load %arg4[%c0_39, %c0_40] : memref<32x512xbf16, #tpu.memory_space<vmem>>, vector<32x512xbf16>
    %cst_41 = arith.constant dense<0.000000e+00> : vector<8x512xf32>
    %96 = tpu.matmul %94, %95, %cst_41 {dimension_numbers = #tpu.dot_dimension_numbers<[1], [0], [0], [1], [0, 0, 1, 1], [], []>} : vector<8x32xbf16>, vector<32x512xbf16>, vector<8x512xf32> -> vector<8x512xf32>
    %97 = arith.addf %93, %96 : vector<8x512xf32>
    %98 = vector.extract_strided_slice %97 {offsets = [0, 0], sizes = [8, 256], strides = [1, 1]} : vector<8x512xf32> to vector<8x256xf32>
    %99 = arith.negf %98 : vector<8x256xf32>
    %100 = math.exp %99 : vector<8x256xf32>
    %cst_42 = arith.constant 1.000000e+00 : f32
    %101 = vector.broadcast %cst_42 : f32 to vector<8x256xf32>
    %102 = arith.addf %101, %100 : vector<8x256xf32>
    %103 = arith.divf %101, %102 : vector<8x256xf32>
    %104 = vector.extract_strided_slice %103 {offsets = [0, 0], sizes = [8, 32], strides = [1, 1]} : vector<8x256xf32> to vector<8x32xf32>
    %105 = vector.extract_strided_slice %103 {offsets = [0, 128], sizes = [8, 32], strides = [1, 1]} : vector<8x256xf32> to vector<8x32xf32>
    %106 = vector.extract_strided_slice %97 {offsets = [0, 256], sizes = [8, 32], strides = [1, 1]} : vector<8x512xf32> to vector<8x32xf32>
    %107 = vector.extract_strided_slice %97 {offsets = [0, 384], sizes = [8, 32], strides = [1, 1]} : vector<8x512xf32> to vector<8x32xf32>
    %108 = arith.mulf %104, %107 : vector<8x32xf32>
    %109 = arith.addf %106, %108 : vector<8x32xf32>
    %110 = math.tanh %109 : vector<8x32xf32>
    %111 = arith.subf %60, %110 : vector<8x32xf32>
    %112 = arith.mulf %105, %111 : vector<8x32xf32>
    %113 = arith.addf %110, %112 : vector<8x32xf32>
    %114 = arith.subf %113, %60 : vector<8x32xf32>
    %115 = arith.mulf %92, %114 : vector<8x32xf32>
    %116 = arith.addf %60, %115 : vector<8x32xf32>
    %c1_43 = arith.constant 1 : index
    %c0_44 = arith.constant 0 : index
    %c0_45 = arith.constant 0 : index
    %117 = vector.load %arg1[%c1_43, %c0_44, %c0_45] : memref<8x8x32xf32, #tpu.memory_space<vmem>>, vector<1x8x32xf32>
    %118 = vector.shape_cast %117 : vector<1x8x32xf32> to vector<8x32xf32>
    %119 = tpu.concatenate %60, %90 in 1 : vector<8x32xf32>, vector<8x32xf32> -> vector<8x64xf32>
    %120 = arith.truncf %119 : vector<8x64xf32> to vector<8x64xbf16>
    %c0_46 = arith.constant 0 : index
    %c0_47 = arith.constant 0 : index
    %c0_48 = arith.constant 0 : index
    %121 = vector.load %arg5[%c0_46, %c0_47, %c0_48] : memref<1x64x512xbf16, #tpu.memory_space<vmem>>, vector<1x64x512xbf16>
    %122 = vector.shape_cast %121 : vector<1x64x512xbf16> to vector<64x512xbf16>
    %cst_49 = arith.constant dense<0.000000e+00> : vector<8x512xf32>
    %123 = tpu.matmul %120, %122, %cst_49 {dimension_numbers = #tpu.dot_dimension_numbers<[1], [0], [0], [1], [0, 0, 1, 1], [], []>} : vector<8x64xbf16>, vector<64x512xbf16>, vector<8x512xf32> -> vector<8x512xf32>
    %c0_50 = arith.constant 0 : index
    %c0_51 = arith.constant 0 : index
    %c0_52 = arith.constant 0 : index
    %124 = vector.load %arg6[%c0_50, %c0_51, %c0_52] : memref<1x1x512xf32, #tpu.memory_space<vmem>>, vector<1x1x512xf32>
    %125 = vector.shape_cast %124 : vector<1x1x512xf32> to vector<1x512xf32>
    %126 = vector.broadcast %125 : vector<1x512xf32> to vector<8x512xf32>
    %127 = arith.addf %123, %126 : vector<8x512xf32>
    %128 = vector.extract_strided_slice %127 {offsets = [0, 0], sizes = [8, 256], strides = [1, 1]} : vector<8x512xf32> to vector<8x256xf32>
    %129 = arith.negf %128 : vector<8x256xf32>
    %130 = math.exp %129 : vector<8x256xf32>
    %cst_53 = arith.constant 1.000000e+00 : f32
    %131 = vector.broadcast %cst_53 : f32 to vector<8x256xf32>
    %132 = arith.addf %131, %130 : vector<8x256xf32>
    %133 = arith.divf %131, %132 : vector<8x256xf32>
    %134 = vector.extract_strided_slice %133 {offsets = [0, 0], sizes = [8, 32], strides = [1, 1]} : vector<8x256xf32> to vector<8x32xf32>
    %135 = vector.extract_strided_slice %133 {offsets = [0, 128], sizes = [8, 32], strides = [1, 1]} : vector<8x256xf32> to vector<8x32xf32>
    %136 = vector.extract_strided_slice %127 {offsets = [0, 256], sizes = [8, 32], strides = [1, 1]} : vector<8x512xf32> to vector<8x32xf32>
    %137 = vector.extract_strided_slice %127 {offsets = [0, 384], sizes = [8, 32], strides = [1, 1]} : vector<8x512xf32> to vector<8x32xf32>
    %138 = arith.mulf %134, %137 : vector<8x32xf32>
    %139 = arith.addf %136, %138 : vector<8x32xf32>
    %140 = math.tanh %139 : vector<8x32xf32>
    %141 = arith.subf %90, %140 : vector<8x32xf32>
    %142 = arith.mulf %135, %141 : vector<8x32xf32>
    %143 = arith.addf %140, %142 : vector<8x32xf32>
    %144 = arith.subf %143, %90 : vector<8x32xf32>
    %145 = arith.mulf %118, %144 : vector<8x32xf32>
    %146 = arith.addf %90, %145 : vector<8x32xf32>
    %c3 = arith.constant 3 : index
    %c0_54 = arith.constant 0 : index
    %c0_55 = arith.constant 0 : index
    %147 = vector.load %arg1[%c3, %c0_54, %c0_55] : memref<8x8x32xf32, #tpu.memory_space<vmem>>, vector<1x8x32xf32>
    %148 = vector.shape_cast %147 : vector<1x8x32xf32> to vector<8x32xf32>
    %c24 = arith.constant 24 : index
    %c0_56 = arith.constant 0 : index
    %149 = vector.load %arg10[%c24, %c0_56] : memref<64x512xf32, #tpu.memory_space<vmem>>, vector<8x512xf32>
    %150 = arith.truncf %116 : vector<8x32xf32> to vector<8x32xbf16>
    %c0_57 = arith.constant 0 : index
    %c0_58 = arith.constant 0 : index
    %151 = vector.load %arg4[%c0_57, %c0_58] : memref<32x512xbf16, #tpu.memory_space<vmem>>, vector<32x512xbf16>
    %cst_59 = arith.constant dense<0.000000e+00> : vector<8x512xf32>
    %152 = tpu.matmul %150, %151, %cst_59 {dimension_numbers = #tpu.dot_dimension_numbers<[1], [0], [0], [1], [0, 0, 1, 1], [], []>} : vector<8x32xbf16>, vector<32x512xbf16>, vector<8x512xf32> -> vector<8x512xf32>
    %153 = arith.addf %149, %152 : vector<8x512xf32>
    %154 = vector.extract_strided_slice %153 {offsets = [0, 0], sizes = [8, 256], strides = [1, 1]} : vector<8x512xf32> to vector<8x256xf32>
    %155 = arith.negf %154 : vector<8x256xf32>
    %156 = math.exp %155 : vector<8x256xf32>
    %cst_60 = arith.constant 1.000000e+00 : f32
    %157 = vector.broadcast %cst_60 : f32 to vector<8x256xf32>
    %158 = arith.addf %157, %156 : vector<8x256xf32>
    %159 = arith.divf %157, %158 : vector<8x256xf32>
    %160 = vector.extract_strided_slice %159 {offsets = [0, 0], sizes = [8, 32], strides = [1, 1]} : vector<8x256xf32> to vector<8x32xf32>
    %161 = vector.extract_strided_slice %159 {offsets = [0, 128], sizes = [8, 32], strides = [1, 1]} : vector<8x256xf32> to vector<8x32xf32>
    %162 = vector.extract_strided_slice %153 {offsets = [0, 256], sizes = [8, 32], strides = [1, 1]} : vector<8x512xf32> to vector<8x32xf32>
    %163 = vector.extract_strided_slice %153 {offsets = [0, 384], sizes = [8, 32], strides = [1, 1]} : vector<8x512xf32> to vector<8x32xf32>
    %164 = arith.mulf %160, %163 : vector<8x32xf32>
    %165 = arith.addf %162, %164 : vector<8x32xf32>
    %166 = math.tanh %165 : vector<8x32xf32>
    %167 = arith.subf %116, %166 : vector<8x32xf32>
    %168 = arith.mulf %161, %167 : vector<8x32xf32>
    %169 = arith.addf %166, %168 : vector<8x32xf32>
    %170 = arith.subf %169, %116 : vector<8x32xf32>
    %171 = arith.mulf %148, %170 : vector<8x32xf32>
    %172 = arith.addf %116, %171 : vector<8x32xf32>
    %c2_61 = arith.constant 2 : index
    %c0_62 = arith.constant 0 : index
    %c0_63 = arith.constant 0 : index
    %173 = vector.load %arg1[%c2_61, %c0_62, %c0_63] : memref<8x8x32xf32, #tpu.memory_space<vmem>>, vector<1x8x32xf32>
    %174 = vector.shape_cast %173 : vector<1x8x32xf32> to vector<8x32xf32>
    %175 = tpu.concatenate %116, %146 in 1 : vector<8x32xf32>, vector<8x32xf32> -> vector<8x64xf32>
    %176 = arith.truncf %175 : vector<8x64xf32> to vector<8x64xbf16>
    %c0_64 = arith.constant 0 : index
    %c0_65 = arith.constant 0 : index
    %c0_66 = arith.constant 0 : index
    %177 = vector.load %arg5[%c0_64, %c0_65, %c0_66] : memref<1x64x512xbf16, #tpu.memory_space<vmem>>, vector<1x64x512xbf16>
    %178 = vector.shape_cast %177 : vector<1x64x512xbf16> to vector<64x512xbf16>
    %cst_67 = arith.constant dense<0.000000e+00> : vector<8x512xf32>
    %179 = tpu.matmul %176, %178, %cst_67 {dimension_numbers = #tpu.dot_dimension_numbers<[1], [0], [0], [1], [0, 0, 1, 1], [], []>} : vector<8x64xbf16>, vector<64x512xbf16>, vector<8x512xf32> -> vector<8x512xf32>
    %c0_68 = arith.constant 0 : index
    %c0_69 = arith.constant 0 : index
    %c0_70 = arith.constant 0 : index
    %180 = vector.load %arg6[%c0_68, %c0_69, %c0_70] : memref<1x1x512xf32, #tpu.memory_space<vmem>>, vector<1x1x512xf32>
    %181 = vector.shape_cast %180 : vector<1x1x512xf32> to vector<1x512xf32>
    %182 = vector.broadcast %181 : vector<1x512xf32> to vector<8x512xf32>
    %183 = arith.addf %179, %182 : vector<8x512xf32>
    %184 = vector.extract_strided_slice %183 {offsets = [0, 0], sizes = [8, 256], strides = [1, 1]} : vector<8x512xf32> to vector<8x256xf32>
    %185 = arith.negf %184 : vector<8x256xf32>
    %186 = math.exp %185 : vector<8x256xf32>
    %cst_71 = arith.constant 1.000000e+00 : f32
    %187 = vector.broadcast %cst_71 : f32 to vector<8x256xf32>
    %188 = arith.addf %187, %186 : vector<8x256xf32>
    %189 = arith.divf %187, %188 : vector<8x256xf32>
    %190 = vector.extract_strided_slice %189 {offsets = [0, 0], sizes = [8, 32], strides = [1, 1]} : vector<8x256xf32> to vector<8x32xf32>
    %191 = vector.extract_strided_slice %189 {offsets = [0, 128], sizes = [8, 32], strides = [1, 1]} : vector<8x256xf32> to vector<8x32xf32>
    %192 = vector.extract_strided_slice %183 {offsets = [0, 256], sizes = [8, 32], strides = [1, 1]} : vector<8x512xf32> to vector<8x32xf32>
    %193 = vector.extract_strided_slice %183 {offsets = [0, 384], sizes = [8, 32], strides = [1, 1]} : vector<8x512xf32> to vector<8x32xf32>
    %194 = arith.mulf %190, %193 : vector<8x32xf32>
    %195 = arith.addf %192, %194 : vector<8x32xf32>
    %196 = math.tanh %195 : vector<8x32xf32>
    %197 = arith.subf %146, %196 : vector<8x32xf32>
    %198 = arith.mulf %191, %197 : vector<8x32xf32>
    %199 = arith.addf %196, %198 : vector<8x32xf32>
    %200 = arith.subf %199, %146 : vector<8x32xf32>
    %201 = arith.mulf %174, %200 : vector<8x32xf32>
    %202 = arith.addf %146, %201 : vector<8x32xf32>
    %c4 = arith.constant 4 : index
    %c0_72 = arith.constant 0 : index
    %c0_73 = arith.constant 0 : index
    %203 = vector.load %arg1[%c4, %c0_72, %c0_73] : memref<8x8x32xf32, #tpu.memory_space<vmem>>, vector<1x8x32xf32>
    %204 = vector.shape_cast %203 : vector<1x8x32xf32> to vector<8x32xf32>
    %c32 = arith.constant 32 : index
    %c0_74 = arith.constant 0 : index
    %205 = vector.load %arg10[%c32, %c0_74] : memref<64x512xf32, #tpu.memory_space<vmem>>, vector<8x512xf32>
    %206 = arith.truncf %172 : vector<8x32xf32> to vector<8x32xbf16>
    %c0_75 = arith.constant 0 : index
    %c0_76 = arith.constant 0 : index
    %207 = vector.load %arg4[%c0_75, %c0_76] : memref<32x512xbf16, #tpu.memory_space<vmem>>, vector<32x512xbf16>
    %cst_77 = arith.constant dense<0.000000e+00> : vector<8x512xf32>
    %208 = tpu.matmul %206, %207, %cst_77 {dimension_numbers = #tpu.dot_dimension_numbers<[1], [0], [0], [1], [0, 0, 1, 1], [], []>} : vector<8x32xbf16>, vector<32x512xbf16>, vector<8x512xf32> -> vector<8x512xf32>
    %209 = arith.addf %205, %208 : vector<8x512xf32>
    %210 = vector.extract_strided_slice %209 {offsets = [0, 0], sizes = [8, 256], strides = [1, 1]} : vector<8x512xf32> to vector<8x256xf32>
    %211 = arith.negf %210 : vector<8x256xf32>
    %212 = math.exp %211 : vector<8x256xf32>
    %cst_78 = arith.constant 1.000000e+00 : f32
    %213 = vector.broadcast %cst_78 : f32 to vector<8x256xf32>
    %214 = arith.addf %213, %212 : vector<8x256xf32>
    %215 = arith.divf %213, %214 : vector<8x256xf32>
    %216 = vector.extract_strided_slice %215 {offsets = [0, 0], sizes = [8, 32], strides = [1, 1]} : vector<8x256xf32> to vector<8x32xf32>
    %217 = vector.extract_strided_slice %215 {offsets = [0, 128], sizes = [8, 32], strides = [1, 1]} : vector<8x256xf32> to vector<8x32xf32>
    %218 = vector.extract_strided_slice %209 {offsets = [0, 256], sizes = [8, 32], strides = [1, 1]} : vector<8x512xf32> to vector<8x32xf32>
    %219 = vector.extract_strided_slice %209 {offsets = [0, 384], sizes = [8, 32], strides = [1, 1]} : vector<8x512xf32> to vector<8x32xf32>
    %220 = arith.mulf %216, %219 : vector<8x32xf32>
    %221 = arith.addf %218, %220 : vector<8x32xf32>
    %222 = math.tanh %221 : vector<8x32xf32>
    %223 = arith.subf %172, %222 : vector<8x32xf32>
    %224 = arith.mulf %217, %223 : vector<8x32xf32>
    %225 = arith.addf %222, %224 : vector<8x32xf32>
    %226 = arith.subf %225, %172 : vector<8x32xf32>
    %227 = arith.mulf %204, %226 : vector<8x32xf32>
    %228 = arith.addf %172, %227 : vector<8x32xf32>
    %c3_79 = arith.constant 3 : index
    %c0_80 = arith.constant 0 : index
    %c0_81 = arith.constant 0 : index
    %229 = vector.load %arg1[%c3_79, %c0_80, %c0_81] : memref<8x8x32xf32, #tpu.memory_space<vmem>>, vector<1x8x32xf32>
    %230 = vector.shape_cast %229 : vector<1x8x32xf32> to vector<8x32xf32>
    %231 = tpu.concatenate %172, %202 in 1 : vector<8x32xf32>, vector<8x32xf32> -> vector<8x64xf32>
    %232 = arith.truncf %231 : vector<8x64xf32> to vector<8x64xbf16>
    %c0_82 = arith.constant 0 : index
    %c0_83 = arith.constant 0 : index
    %c0_84 = arith.constant 0 : index
    %233 = vector.load %arg5[%c0_82, %c0_83, %c0_84] : memref<1x64x512xbf16, #tpu.memory_space<vmem>>, vector<1x64x512xbf16>
    %234 = vector.shape_cast %233 : vector<1x64x512xbf16> to vector<64x512xbf16>
    %cst_85 = arith.constant dense<0.000000e+00> : vector<8x512xf32>
    %235 = tpu.matmul %232, %234, %cst_85 {dimension_numbers = #tpu.dot_dimension_numbers<[1], [0], [0], [1], [0, 0, 1, 1], [], []>} : vector<8x64xbf16>, vector<64x512xbf16>, vector<8x512xf32> -> vector<8x512xf32>
    %c0_86 = arith.constant 0 : index
    %c0_87 = arith.constant 0 : index
    %c0_88 = arith.constant 0 : index
    %236 = vector.load %arg6[%c0_86, %c0_87, %c0_88] : memref<1x1x512xf32, #tpu.memory_space<vmem>>, vector<1x1x512xf32>
    %237 = vector.shape_cast %236 : vector<1x1x512xf32> to vector<1x512xf32>
    %238 = vector.broadcast %237 : vector<1x512xf32> to vector<8x512xf32>
    %239 = arith.addf %235, %238 : vector<8x512xf32>
    %240 = vector.extract_strided_slice %239 {offsets = [0, 0], sizes = [8, 256], strides = [1, 1]} : vector<8x512xf32> to vector<8x256xf32>
    %241 = arith.negf %240 : vector<8x256xf32>
    %242 = math.exp %241 : vector<8x256xf32>
    %cst_89 = arith.constant 1.000000e+00 : f32
    %243 = vector.broadcast %cst_89 : f32 to vector<8x256xf32>
    %244 = arith.addf %243, %242 : vector<8x256xf32>
    %245 = arith.divf %243, %244 : vector<8x256xf32>
    %246 = vector.extract_strided_slice %245 {offsets = [0, 0], sizes = [8, 32], strides = [1, 1]} : vector<8x256xf32> to vector<8x32xf32>
    %247 = vector.extract_strided_slice %245 {offsets = [0, 128], sizes = [8, 32], strides = [1, 1]} : vector<8x256xf32> to vector<8x32xf32>
    %248 = vector.extract_strided_slice %239 {offsets = [0, 256], sizes = [8, 32], strides = [1, 1]} : vector<8x512xf32> to vector<8x32xf32>
    %249 = vector.extract_strided_slice %239 {offsets = [0, 384], sizes = [8, 32], strides = [1, 1]} : vector<8x512xf32> to vector<8x32xf32>
    %250 = arith.mulf %246, %249 : vector<8x32xf32>
    %251 = arith.addf %248, %250 : vector<8x32xf32>
    %252 = math.tanh %251 : vector<8x32xf32>
    %253 = arith.subf %202, %252 : vector<8x32xf32>
    %254 = arith.mulf %247, %253 : vector<8x32xf32>
    %255 = arith.addf %252, %254 : vector<8x32xf32>
    %256 = arith.subf %255, %202 : vector<8x32xf32>
    %257 = arith.mulf %230, %256 : vector<8x32xf32>
    %258 = arith.addf %202, %257 : vector<8x32xf32>
    %c5 = arith.constant 5 : index
    %c0_90 = arith.constant 0 : index
    %c0_91 = arith.constant 0 : index
    %259 = vector.load %arg1[%c5, %c0_90, %c0_91] : memref<8x8x32xf32, #tpu.memory_space<vmem>>, vector<1x8x32xf32>
    %260 = vector.shape_cast %259 : vector<1x8x32xf32> to vector<8x32xf32>
    %c40 = arith.constant 40 : index
    %c0_92 = arith.constant 0 : index
    %261 = vector.load %arg10[%c40, %c0_92] : memref<64x512xf32, #tpu.memory_space<vmem>>, vector<8x512xf32>
    %262 = arith.truncf %228 : vector<8x32xf32> to vector<8x32xbf16>
    %c0_93 = arith.constant 0 : index
    %c0_94 = arith.constant 0 : index
    %263 = vector.load %arg4[%c0_93, %c0_94] : memref<32x512xbf16, #tpu.memory_space<vmem>>, vector<32x512xbf16>
    %cst_95 = arith.constant dense<0.000000e+00> : vector<8x512xf32>
    %264 = tpu.matmul %262, %263, %cst_95 {dimension_numbers = #tpu.dot_dimension_numbers<[1], [0], [0], [1], [0, 0, 1, 1], [], []>} : vector<8x32xbf16>, vector<32x512xbf16>, vector<8x512xf32> -> vector<8x512xf32>
    %265 = arith.addf %261, %264 : vector<8x512xf32>
    %266 = vector.extract_strided_slice %265 {offsets = [0, 0], sizes = [8, 256], strides = [1, 1]} : vector<8x512xf32> to vector<8x256xf32>
    %267 = arith.negf %266 : vector<8x256xf32>
    %268 = math.exp %267 : vector<8x256xf32>
    %cst_96 = arith.constant 1.000000e+00 : f32
    %269 = vector.broadcast %cst_96 : f32 to vector<8x256xf32>
    %270 = arith.addf %269, %268 : vector<8x256xf32>
    %271 = arith.divf %269, %270 : vector<8x256xf32>
    %272 = vector.extract_strided_slice %271 {offsets = [0, 0], sizes = [8, 32], strides = [1, 1]} : vector<8x256xf32> to vector<8x32xf32>
    %273 = vector.extract_strided_slice %271 {offsets = [0, 128], sizes = [8, 32], strides = [1, 1]} : vector<8x256xf32> to vector<8x32xf32>
    %274 = vector.extract_strided_slice %265 {offsets = [0, 256], sizes = [8, 32], strides = [1, 1]} : vector<8x512xf32> to vector<8x32xf32>
    %275 = vector.extract_strided_slice %265 {offsets = [0, 384], sizes = [8, 32], strides = [1, 1]} : vector<8x512xf32> to vector<8x32xf32>
    %276 = arith.mulf %272, %275 : vector<8x32xf32>
    %277 = arith.addf %274, %276 : vector<8x32xf32>
    %278 = math.tanh %277 : vector<8x32xf32>
    %279 = arith.subf %228, %278 : vector<8x32xf32>
    %280 = arith.mulf %273, %279 : vector<8x32xf32>
    %281 = arith.addf %278, %280 : vector<8x32xf32>
    %282 = arith.subf %281, %228 : vector<8x32xf32>
    %283 = arith.mulf %260, %282 : vector<8x32xf32>
    %284 = arith.addf %228, %283 : vector<8x32xf32>
    %c4_97 = arith.constant 4 : index
    %c0_98 = arith.constant 0 : index
    %c0_99 = arith.constant 0 : index
    %285 = vector.load %arg1[%c4_97, %c0_98, %c0_99] : memref<8x8x32xf32, #tpu.memory_space<vmem>>, vector<1x8x32xf32>
    %286 = vector.shape_cast %285 : vector<1x8x32xf32> to vector<8x32xf32>
    %287 = tpu.concatenate %228, %258 in 1 : vector<8x32xf32>, vector<8x32xf32> -> vector<8x64xf32>
    %288 = arith.truncf %287 : vector<8x64xf32> to vector<8x64xbf16>
    %c0_100 = arith.constant 0 : index
    %c0_101 = arith.constant 0 : index
    %c0_102 = arith.constant 0 : index
    %289 = vector.load %arg5[%c0_100, %c0_101, %c0_102] : memref<1x64x512xbf16, #tpu.memory_space<vmem>>, vector<1x64x512xbf16>
    %290 = vector.shape_cast %289 : vector<1x64x512xbf16> to vector<64x512xbf16>
    %cst_103 = arith.constant dense<0.000000e+00> : vector<8x512xf32>
    %291 = tpu.matmul %288, %290, %cst_103 {dimension_numbers = #tpu.dot_dimension_numbers<[1], [0], [0], [1], [0, 0, 1, 1], [], []>} : vector<8x64xbf16>, vector<64x512xbf16>, vector<8x512xf32> -> vector<8x512xf32>
    %c0_104 = arith.constant 0 : index
    %c0_105 = arith.constant 0 : index
    %c0_106 = arith.constant 0 : index
    %292 = vector.load %arg6[%c0_104, %c0_105, %c0_106] : memref<1x1x512xf32, #tpu.memory_space<vmem>>, vector<1x1x512xf32>
    %293 = vector.shape_cast %292 : vector<1x1x512xf32> to vector<1x512xf32>
    %294 = vector.broadcast %293 : vector<1x512xf32> to vector<8x512xf32>
    %295 = arith.addf %291, %294 : vector<8x512xf32>
    %296 = vector.extract_strided_slice %295 {offsets = [0, 0], sizes = [8, 256], strides = [1, 1]} : vector<8x512xf32> to vector<8x256xf32>
    %297 = arith.negf %296 : vector<8x256xf32>
    %298 = math.exp %297 : vector<8x256xf32>
    %cst_107 = arith.constant 1.000000e+00 : f32
    %299 = vector.broadcast %cst_107 : f32 to vector<8x256xf32>
    %300 = arith.addf %299, %298 : vector<8x256xf32>
    %301 = arith.divf %299, %300 : vector<8x256xf32>
    %302 = vector.extract_strided_slice %301 {offsets = [0, 0], sizes = [8, 32], strides = [1, 1]} : vector<8x256xf32> to vector<8x32xf32>
    %303 = vector.extract_strided_slice %301 {offsets = [0, 128], sizes = [8, 32], strides = [1, 1]} : vector<8x256xf32> to vector<8x32xf32>
    %304 = vector.extract_strided_slice %295 {offsets = [0, 256], sizes = [8, 32], strides = [1, 1]} : vector<8x512xf32> to vector<8x32xf32>
    %305 = vector.extract_strided_slice %295 {offsets = [0, 384], sizes = [8, 32], strides = [1, 1]} : vector<8x512xf32> to vector<8x32xf32>
    %306 = arith.mulf %302, %305 : vector<8x32xf32>
    %307 = arith.addf %304, %306 : vector<8x32xf32>
    %308 = math.tanh %307 : vector<8x32xf32>
    %309 = arith.subf %258, %308 : vector<8x32xf32>
    %310 = arith.mulf %303, %309 : vector<8x32xf32>
    %311 = arith.addf %308, %310 : vector<8x32xf32>
    %312 = arith.subf %311, %258 : vector<8x32xf32>
    %313 = arith.mulf %286, %312 : vector<8x32xf32>
    %314 = arith.addf %258, %313 : vector<8x32xf32>
    %c6 = arith.constant 6 : index
    %c0_108 = arith.constant 0 : index
    %c0_109 = arith.constant 0 : index
    %315 = vector.load %arg1[%c6, %c0_108, %c0_109] : memref<8x8x32xf32, #tpu.memory_space<vmem>>, vector<1x8x32xf32>
    %316 = vector.shape_cast %315 : vector<1x8x32xf32> to vector<8x32xf32>
    %c48 = arith.constant 48 : index
    %c0_110 = arith.constant 0 : index
    %317 = vector.load %arg10[%c48, %c0_110] : memref<64x512xf32, #tpu.memory_space<vmem>>, vector<8x512xf32>
    %318 = arith.truncf %284 : vector<8x32xf32> to vector<8x32xbf16>
    %c0_111 = arith.constant 0 : index
    %c0_112 = arith.constant 0 : index
    %319 = vector.load %arg4[%c0_111, %c0_112] : memref<32x512xbf16, #tpu.memory_space<vmem>>, vector<32x512xbf16>
    %cst_113 = arith.constant dense<0.000000e+00> : vector<8x512xf32>
    %320 = tpu.matmul %318, %319, %cst_113 {dimension_numbers = #tpu.dot_dimension_numbers<[1], [0], [0], [1], [0, 0, 1, 1], [], []>} : vector<8x32xbf16>, vector<32x512xbf16>, vector<8x512xf32> -> vector<8x512xf32>
    %321 = arith.addf %317, %320 : vector<8x512xf32>
    %322 = vector.extract_strided_slice %321 {offsets = [0, 0], sizes = [8, 256], strides = [1, 1]} : vector<8x512xf32> to vector<8x256xf32>
    %323 = arith.negf %322 : vector<8x256xf32>
    %324 = math.exp %323 : vector<8x256xf32>
    %cst_114 = arith.constant 1.000000e+00 : f32
    %325 = vector.broadcast %cst_114 : f32 to vector<8x256xf32>
    %326 = arith.addf %325, %324 : vector<8x256xf32>
    %327 = arith.divf %325, %326 : vector<8x256xf32>
    %328 = vector.extract_strided_slice %327 {offsets = [0, 0], sizes = [8, 32], strides = [1, 1]} : vector<8x256xf32> to vector<8x32xf32>
    %329 = vector.extract_strided_slice %327 {offsets = [0, 128], sizes = [8, 32], strides = [1, 1]} : vector<8x256xf32> to vector<8x32xf32>
    %330 = vector.extract_strided_slice %321 {offsets = [0, 256], sizes = [8, 32], strides = [1, 1]} : vector<8x512xf32> to vector<8x32xf32>
    %331 = vector.extract_strided_slice %321 {offsets = [0, 384], sizes = [8, 32], strides = [1, 1]} : vector<8x512xf32> to vector<8x32xf32>
    %332 = arith.mulf %328, %331 : vector<8x32xf32>
    %333 = arith.addf %330, %332 : vector<8x32xf32>
    %334 = math.tanh %333 : vector<8x32xf32>
    %335 = arith.subf %284, %334 : vector<8x32xf32>
    %336 = arith.mulf %329, %335 : vector<8x32xf32>
    %337 = arith.addf %334, %336 : vector<8x32xf32>
    %338 = arith.subf %337, %284 : vector<8x32xf32>
    %339 = arith.mulf %316, %338 : vector<8x32xf32>
    %340 = arith.addf %284, %339 : vector<8x32xf32>
    %c5_115 = arith.constant 5 : index
    %c0_116 = arith.constant 0 : index
    %c0_117 = arith.constant 0 : index
    %341 = vector.load %arg1[%c5_115, %c0_116, %c0_117] : memref<8x8x32xf32, #tpu.memory_space<vmem>>, vector<1x8x32xf32>
    %342 = vector.shape_cast %341 : vector<1x8x32xf32> to vector<8x32xf32>
    %343 = tpu.concatenate %284, %314 in 1 : vector<8x32xf32>, vector<8x32xf32> -> vector<8x64xf32>
    %344 = arith.truncf %343 : vector<8x64xf32> to vector<8x64xbf16>
    %c0_118 = arith.constant 0 : index
    %c0_119 = arith.constant 0 : index
    %c0_120 = arith.constant 0 : index
    %345 = vector.load %arg5[%c0_118, %c0_119, %c0_120] : memref<1x64x512xbf16, #tpu.memory_space<vmem>>, vector<1x64x512xbf16>
    %346 = vector.shape_cast %345 : vector<1x64x512xbf16> to vector<64x512xbf16>
    %cst_121 = arith.constant dense<0.000000e+00> : vector<8x512xf32>
    %347 = tpu.matmul %344, %346, %cst_121 {dimension_numbers = #tpu.dot_dimension_numbers<[1], [0], [0], [1], [0, 0, 1, 1], [], []>} : vector<8x64xbf16>, vector<64x512xbf16>, vector<8x512xf32> -> vector<8x512xf32>
    %c0_122 = arith.constant 0 : index
    %c0_123 = arith.constant 0 : index
    %c0_124 = arith.constant 0 : index
    %348 = vector.load %arg6[%c0_122, %c0_123, %c0_124] : memref<1x1x512xf32, #tpu.memory_space<vmem>>, vector<1x1x512xf32>
    %349 = vector.shape_cast %348 : vector<1x1x512xf32> to vector<1x512xf32>
    %350 = vector.broadcast %349 : vector<1x512xf32> to vector<8x512xf32>
    %351 = arith.addf %347, %350 : vector<8x512xf32>
    %352 = vector.extract_strided_slice %351 {offsets = [0, 0], sizes = [8, 256], strides = [1, 1]} : vector<8x512xf32> to vector<8x256xf32>
    %353 = arith.negf %352 : vector<8x256xf32>
    %354 = math.exp %353 : vector<8x256xf32>
    %cst_125 = arith.constant 1.000000e+00 : f32
    %355 = vector.broadcast %cst_125 : f32 to vector<8x256xf32>
    %356 = arith.addf %355, %354 : vector<8x256xf32>
    %357 = arith.divf %355, %356 : vector<8x256xf32>
    %358 = vector.extract_strided_slice %357 {offsets = [0, 0], sizes = [8, 32], strides = [1, 1]} : vector<8x256xf32> to vector<8x32xf32>
    %359 = vector.extract_strided_slice %357 {offsets = [0, 128], sizes = [8, 32], strides = [1, 1]} : vector<8x256xf32> to vector<8x32xf32>
    %360 = vector.extract_strided_slice %351 {offsets = [0, 256], sizes = [8, 32], strides = [1, 1]} : vector<8x512xf32> to vector<8x32xf32>
    %361 = vector.extract_strided_slice %351 {offsets = [0, 384], sizes = [8, 32], strides = [1, 1]} : vector<8x512xf32> to vector<8x32xf32>
    %362 = arith.mulf %358, %361 : vector<8x32xf32>
    %363 = arith.addf %360, %362 : vector<8x32xf32>
    %364 = math.tanh %363 : vector<8x32xf32>
    %365 = arith.subf %314, %364 : vector<8x32xf32>
    %366 = arith.mulf %359, %365 : vector<8x32xf32>
    %367 = arith.addf %364, %366 : vector<8x32xf32>
    %368 = arith.subf %367, %314 : vector<8x32xf32>
    %369 = arith.mulf %342, %368 : vector<8x32xf32>
    %370 = arith.addf %314, %369 : vector<8x32xf32>
    %c7 = arith.constant 7 : index
    %c0_126 = arith.constant 0 : index
    %c0_127 = arith.constant 0 : index
    %371 = vector.load %arg1[%c7, %c0_126, %c0_127] : memref<8x8x32xf32, #tpu.memory_space<vmem>>, vector<1x8x32xf32>
    %372 = vector.shape_cast %371 : vector<1x8x32xf32> to vector<8x32xf32>
    %c56 = arith.constant 56 : index
    %c0_128 = arith.constant 0 : index
    %373 = vector.load %arg10[%c56, %c0_128] : memref<64x512xf32, #tpu.memory_space<vmem>>, vector<8x512xf32>
    %374 = arith.truncf %340 : vector<8x32xf32> to vector<8x32xbf16>
    %c0_129 = arith.constant 0 : index
    %c0_130 = arith.constant 0 : index
    %375 = vector.load %arg4[%c0_129, %c0_130] : memref<32x512xbf16, #tpu.memory_space<vmem>>, vector<32x512xbf16>
    %cst_131 = arith.constant dense<0.000000e+00> : vector<8x512xf32>
    %376 = tpu.matmul %374, %375, %cst_131 {dimension_numbers = #tpu.dot_dimension_numbers<[1], [0], [0], [1], [0, 0, 1, 1], [], []>} : vector<8x32xbf16>, vector<32x512xbf16>, vector<8x512xf32> -> vector<8x512xf32>
    %377 = arith.addf %373, %376 : vector<8x512xf32>
    %378 = vector.extract_strided_slice %377 {offsets = [0, 0], sizes = [8, 256], strides = [1, 1]} : vector<8x512xf32> to vector<8x256xf32>
    %379 = arith.negf %378 : vector<8x256xf32>
    %380 = math.exp %379 : vector<8x256xf32>
    %cst_132 = arith.constant 1.000000e+00 : f32
    %381 = vector.broadcast %cst_132 : f32 to vector<8x256xf32>
    %382 = arith.addf %381, %380 : vector<8x256xf32>
    %383 = arith.divf %381, %382 : vector<8x256xf32>
    %384 = vector.extract_strided_slice %383 {offsets = [0, 0], sizes = [8, 32], strides = [1, 1]} : vector<8x256xf32> to vector<8x32xf32>
    %385 = vector.extract_strided_slice %383 {offsets = [0, 128], sizes = [8, 32], strides = [1, 1]} : vector<8x256xf32> to vector<8x32xf32>
    %386 = vector.extract_strided_slice %377 {offsets = [0, 256], sizes = [8, 32], strides = [1, 1]} : vector<8x512xf32> to vector<8x32xf32>
    %387 = vector.extract_strided_slice %377 {offsets = [0, 384], sizes = [8, 32], strides = [1, 1]} : vector<8x512xf32> to vector<8x32xf32>
    %388 = arith.mulf %384, %387 : vector<8x32xf32>
    %389 = arith.addf %386, %388 : vector<8x32xf32>
    %390 = math.tanh %389 : vector<8x32xf32>
    %391 = arith.subf %340, %390 : vector<8x32xf32>
    %392 = arith.mulf %385, %391 : vector<8x32xf32>
    %393 = arith.addf %390, %392 : vector<8x32xf32>
    %394 = arith.subf %393, %340 : vector<8x32xf32>
    %395 = arith.mulf %372, %394 : vector<8x32xf32>
    %396 = arith.addf %340, %395 : vector<8x32xf32>
    %c6_133 = arith.constant 6 : index
    %c0_134 = arith.constant 0 : index
    %c0_135 = arith.constant 0 : index
    %397 = vector.load %arg1[%c6_133, %c0_134, %c0_135] : memref<8x8x32xf32, #tpu.memory_space<vmem>>, vector<1x8x32xf32>
    %398 = vector.shape_cast %397 : vector<1x8x32xf32> to vector<8x32xf32>
    %399 = tpu.concatenate %340, %370 in 1 : vector<8x32xf32>, vector<8x32xf32> -> vector<8x64xf32>
    %400 = arith.truncf %399 : vector<8x64xf32> to vector<8x64xbf16>
    %c0_136 = arith.constant 0 : index
    %c0_137 = arith.constant 0 : index
    %c0_138 = arith.constant 0 : index
    %401 = vector.load %arg5[%c0_136, %c0_137, %c0_138] : memref<1x64x512xbf16, #tpu.memory_space<vmem>>, vector<1x64x512xbf16>
    %402 = vector.shape_cast %401 : vector<1x64x512xbf16> to vector<64x512xbf16>
    %cst_139 = arith.constant dense<0.000000e+00> : vector<8x512xf32>
    %403 = tpu.matmul %400, %402, %cst_139 {dimension_numbers = #tpu.dot_dimension_numbers<[1], [0], [0], [1], [0, 0, 1, 1], [], []>} : vector<8x64xbf16>, vector<64x512xbf16>, vector<8x512xf32> -> vector<8x512xf32>
    %c0_140 = arith.constant 0 : index
    %c0_141 = arith.constant 0 : index
    %c0_142 = arith.constant 0 : index
    %404 = vector.load %arg6[%c0_140, %c0_141, %c0_142] : memref<1x1x512xf32, #tpu.memory_space<vmem>>, vector<1x1x512xf32>
    %405 = vector.shape_cast %404 : vector<1x1x512xf32> to vector<1x512xf32>
    %406 = vector.broadcast %405 : vector<1x512xf32> to vector<8x512xf32>
    %407 = arith.addf %403, %406 : vector<8x512xf32>
    %408 = vector.extract_strided_slice %407 {offsets = [0, 0], sizes = [8, 256], strides = [1, 1]} : vector<8x512xf32> to vector<8x256xf32>
    %409 = arith.negf %408 : vector<8x256xf32>
    %410 = math.exp %409 : vector<8x256xf32>
    %cst_143 = arith.constant 1.000000e+00 : f32
    %411 = vector.broadcast %cst_143 : f32 to vector<8x256xf32>
    %412 = arith.addf %411, %410 : vector<8x256xf32>
    %413 = arith.divf %411, %412 : vector<8x256xf32>
    %414 = vector.extract_strided_slice %413 {offsets = [0, 0], sizes = [8, 32], strides = [1, 1]} : vector<8x256xf32> to vector<8x32xf32>
    %415 = vector.extract_strided_slice %413 {offsets = [0, 128], sizes = [8, 32], strides = [1, 1]} : vector<8x256xf32> to vector<8x32xf32>
    %416 = vector.extract_strided_slice %407 {offsets = [0, 256], sizes = [8, 32], strides = [1, 1]} : vector<8x512xf32> to vector<8x32xf32>
    %417 = vector.extract_strided_slice %407 {offsets = [0, 384], sizes = [8, 32], strides = [1, 1]} : vector<8x512xf32> to vector<8x32xf32>
    %418 = arith.mulf %414, %417 : vector<8x32xf32>
    %419 = arith.addf %416, %418 : vector<8x32xf32>
    %420 = math.tanh %419 : vector<8x32xf32>
    %421 = arith.subf %370, %420 : vector<8x32xf32>
    %422 = arith.mulf %415, %421 : vector<8x32xf32>
    %423 = arith.addf %420, %422 : vector<8x32xf32>
    %424 = arith.subf %423, %370 : vector<8x32xf32>
    %425 = arith.mulf %398, %424 : vector<8x32xf32>
    %426 = arith.addf %370, %425 : vector<8x32xf32>
    %c7_144 = arith.constant 7 : index
    %c0_145 = arith.constant 0 : index
    %c0_146 = arith.constant 0 : index
    %427 = vector.load %arg1[%c7_144, %c0_145, %c0_146] : memref<8x8x32xf32, #tpu.memory_space<vmem>>, vector<1x8x32xf32>
    %428 = vector.shape_cast %427 : vector<1x8x32xf32> to vector<8x32xf32>
    %429 = tpu.concatenate %396, %426 in 1 : vector<8x32xf32>, vector<8x32xf32> -> vector<8x64xf32>
    %430 = arith.truncf %429 : vector<8x64xf32> to vector<8x64xbf16>
    %c0_147 = arith.constant 0 : index
    %c0_148 = arith.constant 0 : index
    %c0_149 = arith.constant 0 : index
    %431 = vector.load %arg5[%c0_147, %c0_148, %c0_149] : memref<1x64x512xbf16, #tpu.memory_space<vmem>>, vector<1x64x512xbf16>
    %432 = vector.shape_cast %431 : vector<1x64x512xbf16> to vector<64x512xbf16>
    %cst_150 = arith.constant dense<0.000000e+00> : vector<8x512xf32>
    %433 = tpu.matmul %430, %432, %cst_150 {dimension_numbers = #tpu.dot_dimension_numbers<[1], [0], [0], [1], [0, 0, 1, 1], [], []>} : vector<8x64xbf16>, vector<64x512xbf16>, vector<8x512xf32> -> vector<8x512xf32>
    %c0_151 = arith.constant 0 : index
    %c0_152 = arith.constant 0 : index
    %c0_153 = arith.constant 0 : index
    %434 = vector.load %arg6[%c0_151, %c0_152, %c0_153] : memref<1x1x512xf32, #tpu.memory_space<vmem>>, vector<1x1x512xf32>
    %435 = vector.shape_cast %434 : vector<1x1x512xf32> to vector<1x512xf32>
    %436 = vector.broadcast %435 : vector<1x512xf32> to vector<8x512xf32>
    %437 = arith.addf %433, %436 : vector<8x512xf32>
    %438 = vector.extract_strided_slice %437 {offsets = [0, 0], sizes = [8, 256], strides = [1, 1]} : vector<8x512xf32> to vector<8x256xf32>
    %439 = arith.negf %438 : vector<8x256xf32>
    %440 = math.exp %439 : vector<8x256xf32>
    %cst_154 = arith.constant 1.000000e+00 : f32
    %441 = vector.broadcast %cst_154 : f32 to vector<8x256xf32>
    %442 = arith.addf %441, %440 : vector<8x256xf32>
    %443 = arith.divf %441, %442 : vector<8x256xf32>
    %444 = vector.extract_strided_slice %443 {offsets = [0, 0], sizes = [8, 32], strides = [1, 1]} : vector<8x256xf32> to vector<8x32xf32>
    %445 = vector.extract_strided_slice %443 {offsets = [0, 128], sizes = [8, 32], strides = [1, 1]} : vector<8x256xf32> to vector<8x32xf32>
    %446 = vector.extract_strided_slice %437 {offsets = [0, 256], sizes = [8, 32], strides = [1, 1]} : vector<8x512xf32> to vector<8x32xf32>
    %447 = vector.extract_strided_slice %437 {offsets = [0, 384], sizes = [8, 32], strides = [1, 1]} : vector<8x512xf32> to vector<8x32xf32>
    %448 = arith.mulf %444, %447 : vector<8x32xf32>
    %449 = arith.addf %446, %448 : vector<8x32xf32>
    %450 = math.tanh %449 : vector<8x32xf32>
    %451 = arith.subf %426, %450 : vector<8x32xf32>
    %452 = arith.mulf %445, %451 : vector<8x32xf32>
    %453 = arith.addf %450, %452 : vector<8x32xf32>
    %454 = arith.subf %453, %426 : vector<8x32xf32>
    %455 = arith.mulf %428, %454 : vector<8x32xf32>
    %456 = arith.addf %426, %455 : vector<8x32xf32>
    %457 = arith.truncf %456 : vector<8x32xf32> to vector<8x32xbf16>
    %c0_155 = arith.constant 0 : index
    %c0_156 = arith.constant 0 : index
    %458 = vector.load %arg7[%c0_155, %c0_156] : memref<32x16xbf16, #tpu.memory_space<vmem>>, vector<32x16xbf16>
    %cst_157 = arith.constant dense<0.000000e+00> : vector<8x16xf32>
    %459 = tpu.matmul %457, %458, %cst_157 {dimension_numbers = #tpu.dot_dimension_numbers<[1], [0], [0], [1], [0, 0, 1, 1], [], []>} : vector<8x32xbf16>, vector<32x16xbf16>, vector<8x16xf32> -> vector<8x16xf32>
    %c0_158 = arith.constant 0 : index
    %c0_159 = arith.constant 0 : index
    %460 = vector.load %arg8[%c0_158, %c0_159] : memref<1x16xf32, #tpu.memory_space<vmem>>, vector<1x16xf32>
    %461 = vector.broadcast %460 : vector<1x16xf32> to vector<8x16xf32>
    %462 = arith.addf %459, %461 : vector<8x16xf32>
    %c0_160 = arith.constant 0 : index
    %c0_161 = arith.constant 0 : index
    %463 = vector.load %arg9[%c0_160, %c0_161] : memref<8x16xf32, #tpu.memory_space<vmem>>, vector<8x16xf32>
    tpu.vector_store %arg9[%c0_160, %c0_161], %462 {strides = array<i32>} : memref<8x16xf32, #tpu.memory_space<vmem>>, vector<8x16xf32>,
    return
  }
}

</mosaic_0001>

<bundles_post_ra>
// kernel: tpu_custom_call.1
= control target key start
LH: loop header
LB: loop body
LE: loop exit
PB: predicated region body
PF: predicated region fallthrough
CT: control target
= control target key end

     0   :  { %14 = vsyncpa [#allocation4], 0  ;;  %s3761_s0 = inlined_call_operand.vmem [shape: bf16[64,32], index: 0, kind: input, shape index: {}]   ;;  %s3762_s1 = inlined_call_operand.hbm [shape: f32[8,8,32], index: 1, kind: input, shape index: {}]   ;;  %s3763_s2 = inlined_call_operand.hbm [shape: bf16[32,512], index: 2, kind: input, shape index: {}]   ;;  %s3764_s3 = inlined_call_operand.vmem [shape: f32[1,512], index: 3, kind: input, shape index: {}]   ;;  %s3765_s4 = inlined_call_operand.hbm [shape: bf16[32,512], index: 4, kind: input, shape index: {}]   ;;  %s3766_s5 = inlined_call_operand.hbm [shape: bf16[1,64,512], index: 5, kind: input, shape index: {}]   ;;  %s3767_s6 = inlined_call_operand.vmem [shape: f32[1,1,512], index: 6, kind: input, shape index: {}]   ;;  %s3768_s7 = inlined_call_operand.vmem [shape: bf16[32,16], index: 7, kind: input, shape index: {}]   ;;  %s3769_s8 = inlined_call_operand.vmem [shape: f32[1,16], index: 8, kind: input, shape index: {}]   ;;  %s3770_s9 = inlined_call_operand.hbm [shape: f32[8,16], index: 9, kind: output, shape index: {}]  }
   0x1   :  { %15 = vsyncpa [#allocation7], 0 }
   0x2   :  { %16 = vsyncpa [#allocation10], 0  ;;  %s37_s11 = sshll.u32 %s3763_s2, 4  ;;  %s38_s11 = int_to_ptr.hbm [resolvable:$true] %s37_s11 }
   0x3   :  { %17 = vsyncpa [#allocation5], 0  ;;  %s2916_s12 = smov [#allocation6]   ;;  %s24_s16 = sshll.u32 %s3762_s1, 4  ;;  %s25_s16 = int_to_ptr.hbm [resolvable:$true] %s24_s16 }
   0x4   :  { %s39_s13 = sshll.u32 %s2916_s12, 4  ;;  %s2917_s17 = smov 256   ;;  %s40_s13 = int_to_ptr.vmem [resolvable:$true] %s39_s13 }
   0x5   :  { %s2918_s18 = smov 16   ;;  %s2919_s19 = smov [#allocation3]  }
   0x6   :  { %45 = dma.hbm_to_vmem [thread:$0]  %s38_s11, 1024, %s40_s13, [#allocation7], %s2917_s17, %s2917_s17, %s2918_s18  }
   0x7   :  { %s26_s20 = sshll.u32 %s2919_s19, 4  ;;  %s2920_s21 = smov 128   ;;  %s27_s20 = int_to_ptr.vmem [resolvable:$true] %s26_s20 }
   0x8   :  { %s2921_s22 = smov 8   ;;  %s52_s24 = sshll.u32 %s3765_s4, 4  ;;  %s53_s24 = int_to_ptr.hbm [resolvable:$true] %s52_s24 }
   0x9   :  { %32 = dma.hbm_to_vmem [thread:$0]  %s25_s16, 1024, %s27_s20, [#allocation4], %s2920_s21, %s2920_s21, %s2921_s22  }
   0xa   :  { %s2922_s25 = smov [#allocation8]   ;;  %s65_s28 = sshll.u32 %s3766_s5, 4  ;;  %s66_s28 = int_to_ptr.hbm [resolvable:$true] %s65_s28 }
   0xb   :  { %s54_s26 = sshll.u32 %s2922_s25, 4  ;;  %s2923_s29 = smov [#allocation9]   ;;  %s55_s26 = int_to_ptr.vmem [resolvable:$true] %s54_s26 }
   0xc   :  { %60 = dma.hbm_to_vmem [thread:$0]  %s53_s24, 1024, %s55_s26, [#allocation7], %s2917_s17, %s2917_s17, %s2918_s18  }
   0xd   :  { %s67_s30 = sshll.u32 %s2923_s29, 4  ;;  %s68_s30 = int_to_ptr.vmem [resolvable:$true] %s67_s30 }
   0xe   :  { %73 = dma.hbm_to_vmem [thread:$0]  %s66_s28, 2048, %s68_s30, [#allocation10], %s2917_s17, %s2917_s17, %s2918_s18  }
   0xf   :  { %2908 = dma.done.wait [#allocation4], 1024  }
  0x10   :  { %2909 = vsyncadd [#allocation4], 4294966272 }
  0x11   :  { %2910 = dma.done.wait [#allocation7], 2048  }
  0x12   :  { %2911 = vsyncadd [#allocation7], 4294965248 }
  0x13   :  { %2912 = dma.done.wait [#allocation10], 2048  }
  0x14   :  { %2913 = vsyncadd [#allocation10], 4294965248  ;;  %v2351_v0 = vld [vmem:[#allocation6 + $0x20] sm:$0xf]  ;;  %v2588_v1 = vld [vmem:[#allocation6 + $0x2c] sm:$0xf0] }
  0x15   :  { %v2586_v2 = vld [vmem:[#allocation6 + $0x24] sm:$0xf]  ;;  %v2352_v3 = vor.u32 %v2588_v1, %v2351_v0  ;;  %v2353_v4 = vld [vmem:[#allocation6 + $0x30] sm:$0xf0]  ;;  %v2359_v5 = vld [vmem:[#allocation6 + $0x28] sm:$0xf] }
  0x16   :  { %v2589_v6 = vld [vmem:[#allocation6 + $0x34] sm:$0xf0]  ;;  %v2356_v7 = vor.u32 %v2586_v2, %v2353_v4  ;;  %v2587_v9 = vld [vmem:[#allocation6 + $0x2c] sm:$0xf]  ;;  %v2361_v10 = vld [vmem:[#allocation6 + $0x38] sm:$0xf0] }
  0x17   :  { %v2360_v8 = vor.u32 %v2589_v6, %v2359_v5  ;;  %v2335_v11 = vld [vmem:[#allocation6] sm:$0xf]  ;;  %202 = vmatpush.bf16.msra.mxu0 %v2352_v3  ;;  %v2364_v12 = vor.u32 %v2587_v9, %v2361_v10  ;;  %v2584_v13 = vld [vmem:[#allocation6 + $0xc] sm:$0xf0]  ;;  %v2582_v14 = vld [vmem:[#allocation6 + $0x4] sm:$0xf] }
  0x18   :  { %v2337_v15 = vld [vmem:[#allocation6 + $0x10] sm:$0xf0]  ;;  %231 = vmatpush.bf16.msra.mxu1 %v2356_v7  ;;  %v2336_v16 = vor.u32 %v2584_v13, %v2335_v11  ;;  %v2343_v18 = vld [vmem:[#allocation6 + $0x8] sm:$0xf]  ;;  %v2585_v19 = vld [vmem:[#allocation6 + $0x14] sm:$0xf0] }
  0x19   :  { %260 = vmatpush.bf16.msra.mxu2 %v2360_v8  ;;  %v2340_v17 = vor.u32 %v2582_v14, %v2337_v15  ;;  %v2583_v20 = vld [vmem:[#allocation6 + $0xc] sm:$0xf]  ;;  %289 = vmatpush.bf16.msra.mxu3 %v2364_v12  ;;  %v2344_v21 = vor.u32 %v2585_v19, %v2343_v18  ;;  %v2345_v22 = vld [vmem:[#allocation6 + $0x18] sm:$0xf0]  ;;  %v2578_v23 = vld [vmem:[%s3761_s0] sm:$0xff]  ;;  %vm183_vm0 = vcmask 261120  }
  0x1a   :  { %v2399_v24 = vld [vmem:[#allocation8 + $0x20] sm:$0xf]  ;;  %v2348_v25 = vor.u32 %v2583_v20, %v2345_v22  ;;  %v2596_v26 = vld [vmem:[#allocation8 + $0x2c] sm:$0xf0]  ;;  %v2594_v27 = vld [vmem:[#allocation8 + $0x24] sm:$0xf] }
  0x1b   :  { %v2401_v28 = vld [vmem:[#allocation8 + $0x30] sm:$0xf0]  ;;  %203 = vmatpush.bf16.msra.mxu0 %v2336_v16  ;;  %v2992_v29 = vor.u32 %v2596_v26, %v2399_v24  ;;  %v2595_v31 = vld [vmem:[#allocation8 + $0x2c] sm:$0xf]  ;;  %v2409_v32 = vld [vmem:[#allocation8 + $0x38] sm:$0xf0] }
  0x1c   :  { %v2994_v30 = vor.u32 %v2594_v27, %v2401_v28  ;;  %232 = vmatpush.bf16.msra.mxu1 %v2340_v17  ;;  %v2407_v33 = vld [vmem:[#allocation8 + $0x28] sm:$0xf]  ;;  %v2597_v34 = vld [vmem:[#allocation8 + $0x34] sm:$0xf0]  ;;  %v2997_v35 = vor.u32 %v2595_v31, %v2409_v32  ;;  %v2383_v37 = vld [vmem:[#allocation8] sm:$0xf] }
  0x1d   :  { %261 = vmatpush.bf16.msra.mxu2 %v2344_v21  ;;  %290 = vmatpush.bf16.msra.mxu3 %v2348_v25  ;;  %v2999_v36 = vor.u32 %v2597_v34, %v2407_v33  ;;  %v2592_v38 = vld [vmem:[#allocation8 + $0xc] sm:$0xf0]  ;;  %v2590_v39 = vld [vmem:[#allocation8 + $0x4] sm:$0xf]  ;;  %v2385_v41 = vld [vmem:[#allocation8 + $0x10] sm:$0xf0] }
  0x1e   :  { %2365 = vmatmul.msk.bf16.vlgmr.msra.gmra.mxu0 %vm183_vm0, %v2578_v23  ;;  %v3008_v40 = vor.u32 %v2592_v38, %v2383_v37  ;;  %v3010_v42 = vor.u32 %v2590_v39, %v2385_v41  ;;  %v2579_v43 = vld [vmem:[%s3761_s0 + $0x8] sm:$0xff]  ;;  %v2393_v45 = vld [vmem:[#allocation8 + $0x18] sm:$0xf0]  ;;  %v2593_v48 = vld [vmem:[#allocation8 + $0x14] sm:$0xf0]  ;;  %v2924_v52 = vmov 0  }
  0x1f   :  { %406 = vmatpush.bf16.msrb.mxu0 %v2992_v29  ;;  %2369 = vmatmul.msk.bf16.vlgmr.msra.gmra.mxu1 %vm183_vm0, %v2578_v23  ;;  %v2591_v44 = vld [vmem:[#allocation8 + $0xc] sm:$0xf]  ;;  %v2391_v46 = vld [vmem:[#allocation8 + $0x8] sm:$0xf]  ;;  %v2580_v50 = vld [vmem:[%s3761_s0 + $0x10] sm:$0xff]  ;;  %vm723_vm9 = vcmask 523264  }
  0x20   :  { %419 = vmatpush.bf16.msrb.mxu1 %v2994_v30  ;;  %2373 = vmatmul.msk.bf16.vlgmr.msra.gmra.mxu2 %vm183_vm0, %v2578_v23  ;;  %v3025_v47 = vor.u32 %v2591_v44, %v2393_v45  ;;  %v3027_v49 = vor.u32 %v2593_v48, %v2391_v46  ;;  %v2581_v51 = vld [vmem:[%s3761_s0 + $0x18] sm:$0xff]  ;;  %v113_v59 = vld [vmem:[%s3764_s3] sm:$0xf]  ;;  %s2926_s2 = smov [#allocation11]   ;;  %s2305_s26 = sshll.u32 %s3770_s9, 4  ;;  %s2306_s26 = int_to_ptr.hbm [resolvable:$true] %s2305_s26 }
  0x21   :  { %2377 = vmatmul.msk.bf16.vlgmr.msra.gmra.mxu3 %vm183_vm0, %v2578_v23  ;;  %432 = vmatpush.bf16.msrb.mxu2 %v2999_v36  ;;  %v3060_v60 = vperm.slane %v113_v59, 0  ;;  %v3064_v62 = vperm.slane %v113_v59, 1  ;;  %v3074_v4 = vperm.slane %v113_v59, 2  ;;  %v3076_v5 = vperm.slane %v113_v59, 3  ;;  %s2303_s23 = sshll.u32 %s2926_s2, 4  ;;  %s2304_s23 = int_to_ptr.vmem [resolvable:$true] %s2303_s23 }
  0x22   :  { %445 = vmatpush.bf16.msrb.mxu3 %v2997_v35 }
  0x23   :  { %407 = vmatpush.bf16.msrb.mxu0 %v3008_v40  ;;  %3775 = vst [vmem:[#allocation16_spill] sm:$0xff] %v3064_v62 }
  0x24   :  { %420 = vmatpush.bf16.msrb.mxu1 %v3010_v42  ;;  %3776 = vst [vmem:[#allocation17_spill] sm:$0xff] %v3076_v5 }
  0x25   :  { %433 = vmatpush.bf16.msrb.mxu2 %v3027_v49 }
  0x26   :  { %446 = vmatpush.bf16.msrb.mxu3 %v3025_v47 }
  0x27   :  { %518 = vmatpush.bf16.msra.mxu0 %v2992_v29 }
  0x28   :  { %531 = vmatpush.bf16.msra.mxu1 %v2994_v30 }
  0x29   :  { %544 = vmatpush.bf16.msra.mxu2 %v2999_v36 }
  0x2a   :  { %557 = vmatpush.bf16.msra.mxu3 %v2997_v35 }
  0x2b   :  { %519 = vmatpush.bf16.msra.mxu0 %v3008_v40 }
  0x2c   :  { %532 = vmatpush.bf16.msra.mxu1 %v3010_v42 }
  0x2d   :  { %545 = vmatpush.bf16.msra.mxu2 %v3027_v49 }
  0x2e   :  { %2366 = vmatmul.msk.bf16.gmra.mxu0 %vm183_vm0, %v2579_v43  ;;  %558 = vmatpush.bf16.msra.mxu3 %v3025_v47 }
  0x2f   :  { %2370 = vmatmul.msk.bf16.gmra.mxu1 %vm183_vm0, %v2579_v43 }
  0x30   :  { %2374 = vmatmul.msk.bf16.gmra.mxu2 %vm183_vm0, %v2579_v43 }
  0x31   :  { %2378 = vmatmul.msk.bf16.gmra.mxu3 %vm183_vm0, %v2579_v43 }
  0x3e   :  { %2367 = vmatmul.msk.bf16.gmra.mxu0 %vm183_vm0, %v2580_v50 }
  0x3f   :  { %2371 = vmatmul.msk.bf16.gmra.mxu1 %vm183_vm0, %v2580_v50 }
  0x40   :  { %2375 = vmatmul.msk.bf16.gmra.mxu2 %vm183_vm0, %v2580_v50 }
  0x41   :  { %2379 = vmatmul.msk.bf16.gmra.mxu3 %vm183_vm0, %v2580_v50 }
  0x4e   :  { %2368 = vmatmul.msk.bf16.gmra.mxu0 %vm183_vm0, %v2581_v51 }
  0x4f   :  { %2372 = vmatmul.msk.bf16.gmra.mxu1 %vm183_vm0, %v2581_v51 }
  0x50   :  { %2376 = vmatmul.msk.bf16.gmra.mxu2 %vm183_vm0, %v2581_v51 }
  0x51   :  { %2380 = vmatmul.msk.bf16.gmra.mxu3 %vm183_vm0, %v2581_v51 }
  0x5e   :  { %408 = vmatmul.bf16.vlgmr.msrb.gmra.mxu0 %v2924_v52 }
  0x5f   :  { %421 = vmatmul.bf16.vlgmr.msrb.gmra.mxu1 %v2924_v52 }
  0x60   :  { %434 = vmatmul.bf16.vlgmr.msrb.gmra.mxu2 %v2924_v52 }
  0x61   :  { %447 = vmatmul.bf16.vlgmr.msrb.gmra.mxu3 %v2924_v52 }
  0x9b   :  { %v205_v53 = vpop.f32.mrf.mxu0 }
  0x9c   :  { %v234_v54 = vpop.f32.mrf.mxu1  ;;  %v206_v41 = vadd.f32 %v205_v53, %v3060_v60 }
  0x9d   :  { %v235_v44 = vadd.f32 %v234_v54, %v3064_v62 }
  0xa3   :  { %v3049_v55 = vpop.f32.mrf.mxu2  ;;  %v3053_v57 = vpop.f32.mrf.mxu0 }
  0xa4   :  { %v3051_v56 = vpop.f32.mrf.mxu3  ;;  %v3055_v58 = vpop.f32.mrf.mxu1 }
  0xab   :  { %v3062_v61 = vpop.f32.mrf.mxu2  ;;  %v210_v0 = vpop.f32.mrf.mxu0 }
  0xac   :  { %v3066_v63 = vpop.f32.mrf.mxu3  ;;  %v3069_v1 = vadd.f32 %v210_v0, %v3060_v60  ;;  %v239_v2 = vpop.f32.mrf.mxu1 }
  0xad   :  { %v3072_v3 = vadd.f32 %v239_v2, %v3064_v62 }
  0xb3   :  { %v268_v6 = vpop.f32.mrf.mxu2  ;;  %v3081_v9 = vpop.f32.mrf.mxu0 }
  0xb4   :  { %v3079_v7 = vadd.f32 %v268_v6, %v3074_v4  ;;  %v297_v8 = vpop.f32.mrf.mxu3  ;;  %3777 = vst [vmem:[#allocation18_spill] sm:$0xff] %v3081_v9  ;;  %v3086_v11 = vpop.f32.mrf.mxu1 }
  0xb5   :  { %v3084_v10 = vadd.f32 %v297_v8, %v3076_v5  ;;  %3778 = vst [vmem:[#allocation19_spill] sm:$0xff] %v3086_v11 }
  0xbb   :  { %v3088_v12 = vpop.f32.mrf.mxu2  ;;  %v215_v14 = vpop.f32.mrf.mxu0 }
  0xbc   :  { %3779 = vst [vmem:[#allocation20_spill] sm:$0xff] %v3088_v12  ;;  %v3090_v13 = vpop.f32.mrf.mxu3  ;;  %v3093_v15 = vadd.f32 %v215_v14, %v3060_v60  ;;  %v244_v16 = vpop.f32.mrf.mxu1 }
  0xbd   :  { %3780 = vst [vmem:[#allocation21_spill] sm:$0xff] %v3090_v13  ;;  %v3096_v17 = vadd.f32 %v244_v16, %v3064_v62 }
  0xbe   :  { %3781 = vst [vmem:[#allocation22_spill] sm:$0xff] %v3093_v15 }
  0xbf   :  { %3782 = vst [vmem:[#allocation23_spill] sm:$0xff] %v3096_v17 }
  0xc3   :  { %v273_v18 = vpop.f32.mrf.mxu2  ;;  %v3101_v21 = vpop.f32.mrf.mxu0 }
  0xc4   :  { %v3099_v19 = vadd.f32 %v273_v18, %v3074_v4  ;;  %v302_v20 = vpop.f32.mrf.mxu3  ;;  %3784 = vst [vmem:[#allocation25_spill] sm:$0xff] %v3101_v21  ;;  %v3106_v23 = vpop.f32.mrf.mxu1  ;;  %v2431_v21 = vld [vmem:[#allocation9 + $0x8] sm:$0xf] }
  0xc5   :  { %v3104_v22 = vadd.f32 %v302_v20, %v3076_v5  ;;  %3786 = vst [vmem:[#allocation27_spill] sm:$0xff] %v3106_v23  ;;  %v2598_v23 = vld [vmem:[#allocation9 + $0x4] sm:$0xf] }
  0xc6   :  { %3783 = vst [vmem:[#allocation24_spill] sm:$0xff] %v3099_v19 }
  0xc7   :  { %3785 = vst [vmem:[#allocation26_spill] sm:$0xff] %v3104_v22  ;;  %v2601_v22 = vld [vmem:[#allocation9 + $0x14] sm:$0xf0] }
  0xcb   :  { %v3108_v24 = vpop.f32.mrf.mxu2  ;;  %v220_v26 = vpop.f32.mrf.mxu0 }
  0xcc   :  { %3787 = vst [vmem:[#allocation28_spill] sm:$0xff] %v3108_v24  ;;  %v3110_v25 = vpop.f32.mrf.mxu3  ;;  %v3113_v27 = vadd.f32 %v220_v26, %v3060_v60  ;;  %v249_v28 = vpop.f32.mrf.mxu1  ;;  %v2600_v24 = vld [vmem:[#allocation9 + $0xc] sm:$0xf0] }
  0xcd   :  { %3788 = vst [vmem:[#allocation29_spill] sm:$0xff] %v3110_v25  ;;  %v3116_v31 = vadd.f32 %v249_v28, %v3064_v62  ;;  %v2449_v25 = vld [vmem:[#allocation9 + $0x38] sm:$0xf0] }
  0xce   :  { %3789 = vst [vmem:[#allocation30_spill] sm:$0xff] %v3113_v27  ;;  %v2447_v27 = vld [vmem:[#allocation9 + $0x28] sm:$0xf] }
  0xcf   :  { %3790 = vst [vmem:[#allocation31_spill] sm:$0xff] %v3116_v31 }
  0xd3   :  { %v278_v32 = vpop.f32.mrf.mxu2  ;;  %v3121_v37 = vpop.f32.mrf.mxu0 }
  0xd4   :  { %v3119_v33 = vadd.f32 %v278_v32, %v3074_v4  ;;  %v307_v34 = vpop.f32.mrf.mxu3  ;;  %3792 = vst [vmem:[#allocation33_spill] sm:$0xff] %v3121_v37  ;;  %v3126_v39 = vpop.f32.mrf.mxu1 }
  0xd5   :  { %v3124_v38 = vadd.f32 %v307_v34, %v3076_v5  ;;  %3794 = vst [vmem:[#allocation35_spill] sm:$0xff] %v3126_v39  ;;  %v2471_v34 = vld [vmem:[#allocation9 + $0x60] sm:$0xf] }
  0xd6   :  { %3791 = vst [vmem:[#allocation32_spill] sm:$0xff] %v3119_v33  ;;  %v2604_v33 = vld [vmem:[#allocation9 + $0x2c] sm:$0xf0] }
  0xd7   :  { %3793 = vst [vmem:[#allocation34_spill] sm:$0xff] %v3124_v38  ;;  %v2439_v38 = vld [vmem:[#allocation9 + $0x20] sm:$0xf] }
  0xd8   :  { %v3187_v31 = vor.u32 %v2604_v33, %v2439_v38 }
  0xdb   :  { %v3129_v43 = vpop.f32.mrf.mxu2  ;;  %v409_v46 = vpop.f32.mrf.mxu0 }
  0xdc   :  { %3795 = vst [vmem:[#allocation36_spill] sm:$0xff] %v3129_v43  ;;  %v3132_v45 = vpop.f32.mrf.mxu3  ;;  %v452_v48 = vadd.f32 %v409_v46, %v206_v41  ;;  %v422_v50 = vpop.f32.mrf.mxu1  ;;  %v2612_v41 = vld [vmem:[#allocation9 + $0x6c] sm:$0xf0] }
  0xdd   :  { %3796 = vst [vmem:[#allocation37_spill] sm:$0xff] %v3132_v45  ;;  %v453_v51 = vadd.f32 %v422_v50, %v235_v44  ;;  %v2610_v44 = vld [vmem:[#allocation9 + $0x64] sm:$0xf]  ;;  %v3147_v50 = vor.u32 %v2612_v41, %v2471_v34  ;;  %v2455_v41 = vld [vmem:[#allocation9 + $0x40] sm:$0xf] }
  0xde   :  { %v2413_v52 = vmul.f32 -1.442695, %v452_v48  ;;  %v2608_v43 = vld [vmem:[#allocation9 + $0x4c] sm:$0xf0] }
  0xdf   :  { %v2414_v59 = vmul.f32 -1.442695, %v453_v51  ;;  %v2473_v51 = vld [vmem:[#allocation9 + $0x70] sm:$0xf0]  ;;  %731 = vmatpush.bf16.msrb.mxu0 %v3147_v50 }
  0xe0   :  { %2628 = vpow2.f32 %v2413_v52  ;;  %v2479_v52 = vld [vmem:[#allocation9 + $0x68] sm:$0xf] }
  0xe1   :  { %2630 = vpow2.f32 %v2414_v59  ;;  %v2613_v59 = vld [vmem:[#allocation9 + $0x74] sm:$0xf0] }
  0xe3   :  { %v3134_v0 = vpop.f32.mrf.mxu2  ;;  %v411_v6 = vpop.f32.mrf.mxu0 }
  0xe4   :  { %v3136_v2 = vpop.f32.mrf.mxu3  ;;  %v424_v53 = vpop.f32.mrf.mxu1 }
  0xe5   :  { %v3153_v53 = vor.u32 %v2610_v44, %v2473_v51  ;;  %v2457_v51 = vld [vmem:[#allocation9 + $0x50] sm:$0xf0]  ;;  %v2433_v44 = vld [vmem:[#allocation9 + $0x18] sm:$0xf0] }
  0xe6   :  { %v2629_v8 = vpop.eup %2628 }
  0xe7   :  { %v2631_v14 = vpop.eup %2630  ;;  %v462_v16 = vadd.f32 1.0, %v2629_v8  ;;  %v3155_v8 = vor.u32 %v2613_v59, %v2479_v52  ;;  %744 = vmatpush.bf16.msrb.mxu1 %v3153_v53 }
  0xe8   :  { %v3138_v54 = vadd.f32 1.0, %v2631_v14  ;;  %v2611_v14 = vld [vmem:[#allocation9 + $0x6c] sm:$0xf] }
  0xe9   :  { %2632 = vrcp.f32 %v462_v16  ;;  %v473_v26 = vand.u32 2147483647, %v462_v16  ;;  %v475_v28 = vand.u32 2147483648, %v462_v16  ;;  %vm469_vm2 = vweird.f32 %v462_v16  ;;  %757 = vmatpush.bf16.msrb.mxu2 %v3155_v8 }
  0xea   :  { %2634 = vrcp.f32 %v3138_v54  ;;  %vm484_vm6 = vweird.f32 %v3138_v54 }
  0xeb   :  { %v437_v18 = vpop.f32.mrf.mxu2  ;;  %vm3157_vm3 = vcmp.eq.f32.partialorder %v473_v26, 8.507059e+37  ;;  %v2606_v26 = vld [vmem:[#allocation9 + $0x44] sm:$0xf] }
  0xec   :  { %v450_v20 = vpop.f32.mrf.mxu3  ;;  %v2481_v18 = vld [vmem:[#allocation9 + $0x78] sm:$0xf0]  ;;  %v3177_v59 = vor.u32 %v2606_v26, %v2457_v51  ;;  %v2602_v26 = vld [vmem:[#allocation9 + $0x24] sm:$0xf]  ;;  %v2441_v51 = vld [vmem:[#allocation9 + $0x30] sm:$0xf0] }
  0xed   :  { %v3162_v34 = vor.u32 %v2611_v14, %v2481_v18  ;;  %v2609_v14 = vld [vmem:[#allocation9 + $0x54] sm:$0xf0]  ;;  %v2607_v18 = vld [vmem:[#allocation9 + $0x4c] sm:$0xf] }
  0xee   :  { %745 = vmatpush.bf16.msrb.mxu1 %v3177_v59 }
  0xef   :  { %v3141_v32 = vpop.eup %2632  ;;  %770 = vmatpush.bf16.msrb.mxu3 %v3162_v34 }
  0xf0   :  { %v3143_v46 = vpop.eup %2634  ;;  %v465_v48 = vmul.f32 %v3141_v32, %v462_v16  ;;  %vm470_vm1 = vweird.f32 %v3141_v32  ;;  %v3173_v16 = vor.u32 %v2608_v43, %v2455_v41  ;;  %v293_v43 = vadd.f32 %v3051_v56, %v3076_v5  ;;  %v2605_v56 = vld [vmem:[#allocation9 + $0x34] sm:$0xf0] }
  0xf1   :  { %v3151_v6 = vmul.f32 %v3143_v46, %v3138_v54  ;;  %vm3167_vm4 = vmor %vm469_vm2, %vm470_vm1  ;;  %v3200_v38 = vor.u32 %v2605_v56, %v2447_v27  ;;  %v2599_v27 = vld [vmem:[#allocation9 + $0xc] sm:$0xf]  ;;  %vm485_vm5 = vweird.f32 %v3143_v46 }
  0xf2   :  { %v466_v20 = vsub.f32 1.0, %v465_v48  ;;  %v476_v48 = vor.u32 1.1754944e-38, %v475_v28  ;;  %v2465_v28 = vld [vmem:[#allocation9 + $0x58] sm:$0xf0]  ;;  %732 = vmatpush.bf16.msrb.mxu0 %v3173_v16  ;;  %vm486_vm7 = vmor %vm484_vm6, %vm485_vm5 }
  0xf3   :  { %v481_v39 = vsub.f32 1.0, %v3151_v6  ;;  %v2463_v6 = vld [vmem:[#allocation9 + $0x48] sm:$0xf] }
  0xf4   :  { %v467_v52 = vmul.f32 %v3141_v32, %v466_v20  ;;  %v3179_v37 = vor.u32 %v2609_v14, %v2463_v6  ;;  %v3185_v20 = vor.u32 %v2607_v18, %v2465_v28  ;;  %v264_v6 = vadd.f32 %v3049_v55, %v3074_v4  ;;  %v2423_v28 = vld [vmem:[#allocation9] sm:$0xf] }
  0xf5   :  { %v3193_v14 = vor.u32 %v2602_v26, %v2441_v51  ;;  %v455_v18 = vadd.f32 %v3136_v2, %v293_v43  ;;  %v2425_v51 = vld [vmem:[#allocation9 + $0x10] sm:$0xf0] }
  0xf6   :  { %v468_v41 = vadd.f32 %v3141_v32, %v467_v52  ;;  %758 = vmatpush.bf16.msrb.mxu2 %v3179_v37  ;;  %v2603_v52 = vld [vmem:[#allocation9 + $0x2c] sm:$0xf]  ;;  %771 = vmatpush.bf16.msrb.mxu3 %v3185_v20  ;;  %v454_v2 = vadd.f32 %v3134_v0, %v264_v6  ;;  %v3213_v45 = vor.u32 %v2598_v23, %v2425_v51  ;;  %v490_v23 = vand.u32 2147483648, %v3138_v54 }
  0xf7   :  { %v3202_v55 = vor.u32 %v2603_v52, %v2449_v25  ;;  %733 = vmatpush.bf16.msrb.mxu0 %v3187_v31  ;;  %v482_v25 = vmul.f32 %v3143_v46, %v481_v39  ;;  %746 = vmatpush.bf16.msrb.mxu1 %v3193_v14  ;;  %v3218_v0 = vor.u32 %v2599_v27, %v2433_v44 }
  0xf8   :  { %v472_v33 = vsel %vm3167_vm4, %v3141_v32, %v468_v41  ;;  %v3208_v32 = vor.u32 %v2600_v24, %v2423_v28  ;;  %v491_v6 = vor.u32 1.1754944e-38, %v490_v23 }
  0xf9   :  { %v477_v26 = vsel %vm3157_vm3, %v476_v48, %v472_v33  ;;  %v3215_v48 = vor.u32 %v2601_v22, %v2431_v21  ;;  %v483_v24 = vadd.f32 %v3143_v46, %v482_v25  ;;  %v488_v21 = vand.u32 2147483647, %v3138_v54  ;;  %v3230_v33 = vld [vmem:[#allocation3] sm:$0xff] }
  0xfa   :  { %v494_v43 = vmul.f32 %v477_v26, %v455_v18  ;;  %759 = vmatpush.bf16.msrb.mxu2 %v3200_v38  ;;  %772 = vmatpush.bf16.msrb.mxu3 %v3202_v55 }
  0xfb   :  { %734 = vmatpush.bf16.msrb.mxu0 %v3208_v32  ;;  %747 = vmatpush.bf16.msrb.mxu1 %v3213_v45  ;;  %v487_v22 = vsel %vm486_vm7, %v3143_v46, %v483_v24  ;;  %vm489_vm8 = vcmp.eq.f32.partialorder %v488_v21, 8.507059e+37 }
  0xfc   :  { %v495_v41 = vadd.f32 %v494_v43, %v454_v2  ;;  %v492_v52 = vsel %vm489_vm8, %v491_v6, %v487_v22  ;;  %v208_v2 = vadd.f32 %v3053_v57, %v3060_v60  ;;  %v237_v43 = vadd.f32 %v3055_v58, %v3064_v62 }
  0xfe   :  { %2636 = vtanh.f32 %v495_v41  ;;  %760 = vmatpush.bf16.msrb.mxu2 %v3215_v48  ;;  %773 = vmatpush.bf16.msrb.mxu3 %v3218_v0 }
 0x104   :  { %v2637_v39 = vpop.eup %2636 }
 0x105   :  { %v497_v56 = vsub.f32 0.0, %v2637_v39 }
 0x107   :  { %v498_v18 = vmul.f32 %v497_v56, %v492_v52  ;;  %v3278_v56 = vld [vmem:[%s3767_s6] sm:$0xf]  ;;  %s2925_s6 = smov 32  }
 0x109   :  { %v499_v28 = vadd.f32 %v2637_v39, %v498_v18 }
 0x10b   :  { %v3233_v26 = vmul.f32 %v499_v28, %v3230_v33  ;;  %v3283_v28 = vperm.slane %v3278_v56, 0 }
 0x10d   :  { %v508_v51 = vpack.c.bf16 %v3233_v26, %v3233_v26  ;;  %v615_v54 = vsel %vm183_vm0, %v3233_v26, 0.0 }
 0x10e   :  { %v616_v46 = vpack.c.bf16 %v615_v54, %v615_v54 }
 0x10f   :  { %2415 = vmatmul.msk.bf16.vlgmr.msra.gmra.mxu0 %vm183_vm0, %v508_v51  ;;  %2416 = vmatmul.msk.bf16.vlgmr.msra.gmra.mxu1 %vm183_vm0, %v508_v51 }
 0x110   :  { %2417 = vmatmul.msk.bf16.vlgmr.msra.gmra.mxu2 %vm183_vm0, %v508_v51  ;;  %2418 = vmatmul.msk.bf16.vlgmr.msra.gmra.mxu3 %vm183_vm0, %v508_v51  ;;  %v3286_v51 = vperm.slane %v3278_v56, 1 }
 0x111   :  { %841 = vmatpush.bf16.msra.mxu0 %v2992_v29  ;;  %854 = vmatpush.bf16.msra.mxu1 %v2994_v30 }
 0x112   :  { %867 = vmatpush.bf16.msra.mxu2 %v2999_v36  ;;  %880 = vmatpush.bf16.msra.mxu3 %v2997_v35 }
 0x115   :  { %842 = vmatpush.bf16.msra.mxu0 %v3008_v40  ;;  %855 = vmatpush.bf16.msra.mxu1 %v3010_v42 }
 0x116   :  { %868 = vmatpush.bf16.msra.mxu2 %v3027_v49  ;;  %881 = vmatpush.bf16.msra.mxu3 %v3025_v47 }
 0x11f   :  { %2485 = vmatmul.msk.bf16.vlgmr.msrb.gmra.mxu0 %vm723_vm9, %v616_v46  ;;  %2486 = vmatmul.msk.bf16.vlgmr.msrb.gmra.mxu1 %vm723_vm9, %v616_v46 }
 0x120   :  { %2487 = vmatmul.msk.bf16.vlgmr.msrb.gmra.mxu2 %vm723_vm9, %v616_v46  ;;  %2488 = vmatmul.msk.bf16.vlgmr.msrb.gmra.mxu3 %vm723_vm9, %v616_v46 }
 0x121   :  { %951 = vmatpush.bf16.msrb.mxu0 %v3147_v50  ;;  %964 = vmatpush.bf16.msrb.mxu1 %v3153_v53 }
 0x122   :  { %977 = vmatpush.bf16.msrb.mxu2 %v3155_v8  ;;  %990 = vmatpush.bf16.msrb.mxu3 %v3162_v34 }
 0x125   :  { %952 = vmatpush.bf16.msrb.mxu0 %v3173_v16  ;;  %965 = vmatpush.bf16.msrb.mxu1 %v3177_v59 }
 0x126   :  { %978 = vmatpush.bf16.msrb.mxu2 %v3179_v37  ;;  %991 = vmatpush.bf16.msrb.mxu3 %v3185_v20 }
 0x129   :  { %953 = vmatpush.bf16.msrb.mxu0 %v3187_v31  ;;  %966 = vmatpush.bf16.msrb.mxu1 %v3193_v14 }
 0x12a   :  { %979 = vmatpush.bf16.msrb.mxu2 %v3200_v38  ;;  %992 = vmatpush.bf16.msrb.mxu3 %v3202_v55 }
 0x12d   :  { %954 = vmatpush.bf16.msrb.mxu0 %v3208_v32  ;;  %967 = vmatpush.bf16.msrb.mxu1 %v3213_v45 }
 0x12e   :  { %980 = vmatpush.bf16.msrb.mxu2 %v3215_v48  ;;  %993 = vmatpush.bf16.msrb.mxu3 %v3218_v0 }
 0x18c   :  { %v521_v27 = vpop.f32.mrf.mxu0  ;;  %v534_v44 = vpop.f32.mrf.mxu1 }
 0x18d   :  { %v564_v25 = vadd.f32 %v521_v27, %v208_v2  ;;  %v565_v41 = vadd.f32 %v534_v44, %v237_v43 }
 0x18f   :  { %v2419_v24 = vmul.f32 -1.442695, %v564_v25  ;;  %v2420_v23 = vmul.f32 -1.442695, %v565_v41 }
 0x191   :  { %2638 = vpow2.f32 %v2419_v24 }
 0x192   :  { %2640 = vpow2.f32 %v2420_v23 }
 0x193   :  { %v547_v21 = vpop.f32.mrf.mxu2  ;;  %v560_v22 = vpop.f32.mrf.mxu3 }
 0x194   :  { %v523_v39 = vpop.f32.mrf.mxu0  ;;  %v536_v6 = vpop.f32.mrf.mxu1 }
 0x197   :  { %v2639_v57 = vpop.eup %2638 }
 0x198   :  { %v2641_v52 = vpop.eup %2640  ;;  %v574_v58 = vadd.f32 1.0, %v2639_v57 }
 0x199   :  { %v3280_v18 = vadd.f32 1.0, %v2641_v52 }
 0x19a   :  { %2642 = vrcp.f32 %v574_v58  ;;  %vm581_vm11 = vweird.f32 %v574_v58 }
 0x19b   :  { %2644 = vrcp.f32 %v3280_v18  ;;  %v549_v54 = vpop.f32.mrf.mxu2  ;;  %v562_v46 = vpop.f32.mrf.mxu3  ;;  %vm596_vm15 = vweird.f32 %v3280_v18 }
 0x19c   :  { %v736_v2 = vpop.f32.mrf.mxu0  ;;  %v749_v43 = vpop.f32.mrf.mxu1  ;;  %v587_v46 = vand.u32 2147483648, %v574_v58 }
 0x19d   :  { %v737_v27 = vadd.f32 %v736_v2, %v3283_v28  ;;  %v750_v44 = vadd.f32 %v749_v43, %v3286_v51  ;;  %v585_v2 = vand.u32 2147483647, %v574_v58 }
 0x19e   :  { %v588_v13 = vor.u32 1.1754944e-38, %v587_v46 }
 0x19f   :  { %v2489_v25 = vmul.f32 -1.442695, %v737_v27  ;;  %v2490_v41 = vmul.f32 -1.442695, %v750_v44  ;;  %v295_v27 = vadd.f32 %v3066_v63, %v3076_v5  ;;  %vm586_vm13 = vcmp.eq.f32.partialorder %v585_v2, 8.507059e+37 }
 0x1a0   :  { %v2643_v24 = vpop.eup %2642 }
 0x1a1   :  { %v2645_v23 = vpop.eup %2644  ;;  %v577_v39 = vmul.f32 %v2643_v24, %v574_v58  ;;  %2646 = vpow2.f32 %v2489_v25  ;;  %vm582_vm10 = vweird.f32 %v2643_v24  ;;  %v567_v11 = vadd.f32 %v560_v22, %v295_v27 }
 0x1a2   :  { %2648 = vpow2.f32 %v2490_v41  ;;  %v592_v54 = vmul.f32 %v2645_v23, %v3280_v18  ;;  %v266_v41 = vadd.f32 %v3062_v61, %v3074_v4  ;;  %vm583_vm12 = vmor %vm581_vm11, %vm582_vm10  ;;  %vm597_vm14 = vweird.f32 %v2645_v23 }
 0x1a3   :  { %v578_v6 = vsub.f32 1.0, %v577_v39  ;;  %v3291_v57 = vpop.f32.mrf.mxu2  ;;  %v775_v52 = vpop.f32.mrf.mxu3  ;;  %v602_v22 = vand.u32 2147483648, %v3280_v18  ;;  %vm598_vm1 = vmor %vm596_vm15, %vm597_vm14 }
 0x1a4   :  { %v738_v19 = vpop.f32.mrf.mxu0  ;;  %v751_v17 = vpop.f32.mrf.mxu1  ;;  %v593_v39 = vsub.f32 1.0, %v592_v54  ;;  %v566_v62 = vadd.f32 %v547_v21, %v266_v41 }
 0x1a5   :  { %v579_v15 = vmul.f32 %v2643_v24, %v578_v6 }
 0x1a6   :  { %v594_v58 = vmul.f32 %v2645_v23, %v593_v39 }
 0x1a7   :  { %v2647_v43 = vpop.eup %2646  ;;  %v580_v44 = vadd.f32 %v2643_v24, %v579_v15 }
 0x1a8   :  { %v2649_v25 = vpop.eup %2648  ;;  %v785_v12 = vadd.f32 1.0, %v2647_v43  ;;  %v595_v54 = vadd.f32 %v2645_v23, %v594_v58  ;;  %v3306_v43 = vperm.slane %v3278_v56, 3 }
 0x1a9   :  { %v584_v19 = vsel %vm583_vm12, %v2643_v24, %v580_v44  ;;  %v3298_v17 = vadd.f32 1.0, %v2649_v25 }
 0x1aa   :  { %v589_v6 = vsel %vm586_vm13, %v588_v13, %v584_v19  ;;  %2650 = vrcp.f32 %v785_v12  ;;  %v600_v13 = vand.u32 2147483647, %v3280_v18  ;;  %v599_v21 = vsel %vm598_vm1, %v2645_v23, %v595_v54 }
 0x1ab   :  { %v606_v9 = vmul.f32 %v589_v6, %v567_v11  ;;  %2652 = vrcp.f32 %v3298_v17  ;;  %v764_v63 = vpop.f32.mrf.mxu2  ;;  %v777_v15 = vpop.f32.mrf.mxu3  ;;  %v796_v44 = vand.u32 2147483647, %v785_v12  ;;  %v3310_v18 = vperm.slane %v3278_v56, 2 }
 0x1ac   :  { %vm601_vm3 = vcmp.eq.f32.partialorder %v600_v13, 8.507059e+37  ;;  %vm792_vm4 = vweird.f32 %v785_v12  ;;  %v776_v63 = vadd.f32 %v775_v52, %v3306_v43  ;;  %vm807_vm8 = vweird.f32 %v3298_v17 }
 0x1ad   :  { %v607_v5 = vadd.f32 %v606_v9, %v566_v62  ;;  %v798_v62 = vand.u32 2147483648, %v785_v12  ;;  %v603_v9 = vor.u32 1.1754944e-38, %v602_v22  ;;  %vm797_vm6 = vcmp.eq.f32.partialorder %v796_v44, 8.507059e+37  ;;  %v3313_v22 = vld [vmem:[#allocation3 + $0x8] sm:$0xff] }
 0x1af   :  { %2654 = vtanh.f32 %v607_v5  ;;  %v604_v41 = vsel %vm601_vm3, %v603_v9, %v599_v21  ;;  %v799_v6 = vor.u32 1.1754944e-38, %v798_v62  ;;  %v811_v62 = vand.u32 2147483647, %v3298_v17 }
 0x1b0   :  { %v2651_v61 = vpop.eup %2650 }
 0x1b1   :  { %v2653_v46 = vpop.eup %2652  ;;  %v788_v24 = vmul.f32 %v2651_v61, %v785_v12  ;;  %vm793_vm2 = vweird.f32 %v2651_v61  ;;  %vm812_vm11 = vcmp.eq.f32.partialorder %v811_v62, 8.507059e+37 }
 0x1b2   :  { %v803_v2 = vmul.f32 %v2653_v46, %v3298_v17  ;;  %vm794_vm5 = vmor %vm792_vm4, %vm793_vm2  ;;  %vm808_vm7 = vweird.f32 %v2653_v46 }
 0x1b3   :  { %v789_v11 = vsub.f32 1.0, %v788_v24  ;;  %v763_v24 = vadd.f32 %v3291_v57, %v3310_v18  ;;  %vm809_vm10 = vmor %vm807_vm8, %vm808_vm7 }
 0x1b4   :  { %v804_v19 = vsub.f32 1.0, %v803_v2 }
 0x1b5   :  { %v2655_v5 = vpop.eup %2654  ;;  %v790_v27 = vmul.f32 %v2651_v61, %v789_v11 }
 0x1b6   :  { %v609_v25 = vsub.f32 %v3233_v26, %v2655_v5  ;;  %v805_v11 = vmul.f32 %v2653_v46, %v804_v19 }
 0x1b7   :  { %v791_v39 = vadd.f32 %v2651_v61, %v790_v27 }
 0x1b8   :  { %v610_v23 = vmul.f32 %v609_v25, %v604_v41  ;;  %v806_v52 = vadd.f32 %v2653_v46, %v805_v11 }
 0x1b9   :  { %v795_v15 = vsel %vm794_vm5, %v2651_v61, %v791_v39  ;;  %v813_v61 = vand.u32 2147483648, %v3298_v17 }
 0x1ba   :  { %v611_v58 = vadd.f32 %v2655_v5, %v610_v23  ;;  %v800_v54 = vsel %vm797_vm6, %v799_v6, %v795_v15  ;;  %v810_v5 = vsel %vm809_vm10, %v2653_v46, %v806_v52 }
 0x1bb   :  { %v817_v13 = vmul.f32 %v800_v54, %v776_v63 }
 0x1bc   :  { %v612_v56 = vsub.f32 %v611_v58, %v3233_v26 }
 0x1bd   :  { %v818_v12 = vadd.f32 %v817_v13, %v763_v24 }
 0x1be   :  { %v613_v21 = vmul.f32 %v612_v56, %v3313_v22 }
 0x1bf   :  { %2656 = vtanh.f32 %v818_v12 }
 0x1c0   :  { %v3320_v2 = vadd.f32 %v613_v21, %v3233_v26  ;;  %v814_v26 = vor.u32 1.1754944e-38, %v813_v61 }
 0x1c2   :  { %v831_v57 = vpack.c.bf16 %v3320_v2, %v3320_v2  ;;  %v815_v44 = vsel %vm812_vm11, %v814_v26, %v810_v5 }
 0x1c4   :  { %2491 = vmatmul.msk.bf16.vlgmr.msra.gmra.mxu0 %vm183_vm0, %v831_v57  ;;  %2492 = vmatmul.msk.bf16.vlgmr.msra.gmra.mxu1 %vm183_vm0, %v831_v57 }
 0x1c5   :  { %v2657_v9 = vpop.eup %2656  ;;  %2493 = vmatmul.msk.bf16.vlgmr.msra.gmra.mxu2 %vm183_vm0, %v831_v57  ;;  %2494 = vmatmul.msk.bf16.vlgmr.msra.gmra.mxu3 %vm183_vm0, %v831_v57 }
 0x1c6   :  { %v820_v27 = vsub.f32 0.0, %v2657_v9  ;;  %1062 = vmatpush.bf16.msra.mxu0 %v2992_v29  ;;  %1075 = vmatpush.bf16.msra.mxu1 %v2994_v30 }
 0x1c7   :  { %1088 = vmatpush.bf16.msra.mxu2 %v2999_v36  ;;  %1101 = vmatpush.bf16.msra.mxu3 %v2997_v35 }
 0x1c8   :  { %v821_v17 = vmul.f32 %v820_v27, %v815_v44 }
 0x1ca   :  { %v822_v25 = vadd.f32 %v2657_v9, %v821_v17  ;;  %1063 = vmatpush.bf16.msra.mxu0 %v3008_v40  ;;  %1076 = vmatpush.bf16.msra.mxu1 %v3010_v42 }
 0x1cb   :  { %1089 = vmatpush.bf16.msra.mxu2 %v3027_v49  ;;  %1102 = vmatpush.bf16.msra.mxu3 %v3025_v47 }
 0x1cc   :  { %v3340_v46 = vmul.f32 %v822_v25, %v3230_v33 }
 0x1ce   :  { %939 = vrot.lane.b32.xlu0 %v3340_v46, %s2925_s6 }
 0x240   :  { %v940_v41 = vpop.permute.xlu0 %939 }
 0x241   :  { %v942_v39 = vsel %vm183_vm0, %v3320_v2, %v940_v41  ;;  %v844_v23 = vpop.f32.mrf.mxu0  ;;  %v857_v19 = vpop.f32.mrf.mxu1 }
 0x242   :  { %v943_v6 = vpack.c.bf16 %v942_v39, %v942_v39  ;;  %v887_v63 = vadd.f32 %v844_v23, %v3069_v1  ;;  %v888_v15 = vadd.f32 %v857_v19, %v3072_v3 }
 0x244   :  { %v2495_v58 = vmul.f32 -1.442695, %v887_v63  ;;  %v2496_v54 = vmul.f32 -1.442695, %v888_v15  ;;  %2497 = vmatmul.msk.bf16.vlgmr.msrb.gmra.mxu0 %vm723_vm9, %v943_v6  ;;  %2498 = vmatmul.msk.bf16.vlgmr.msrb.gmra.mxu1 %vm723_vm9, %v943_v6 }
 0x245   :  { %2499 = vmatmul.msk.bf16.vlgmr.msrb.gmra.mxu2 %vm723_vm9, %v943_v6  ;;  %2500 = vmatmul.msk.bf16.vlgmr.msrb.gmra.mxu3 %vm723_vm9, %v943_v6 }
 0x246   :  { %2658 = vpow2.f32 %v2495_v58  ;;  %1172 = vmatpush.bf16.msrb.mxu0 %v3147_v50  ;;  %1185 = vmatpush.bf16.msrb.mxu1 %v3153_v53 }
 0x247   :  { %2660 = vpow2.f32 %v2496_v54  ;;  %1198 = vmatpush.bf16.msrb.mxu2 %v3155_v8  ;;  %1211 = vmatpush.bf16.msrb.mxu3 %v3162_v34 }
 0x248   :  { %v870_v1 = vpop.f32.mrf.mxu2  ;;  %v883_v3 = vpop.f32.mrf.mxu3 }
 0x249   :  { %v846_v33 = vpop.f32.mrf.mxu0  ;;  %v859_v24 = vpop.f32.mrf.mxu1  ;;  %v890_v39 = vadd.f32 %v883_v3, %v3084_v10  ;;  %v889_v6 = vadd.f32 %v870_v1, %v3079_v7  ;;  %v3371_v7 = vld [vmem:[#allocation3 + $0x10] sm:$0xff] }
 0x24a   :  { %1173 = vmatpush.bf16.msrb.mxu0 %v3173_v16  ;;  %1186 = vmatpush.bf16.msrb.mxu1 %v3177_v59 }
 0x24b   :  { %1199 = vmatpush.bf16.msrb.mxu2 %v3179_v37  ;;  %1212 = vmatpush.bf16.msrb.mxu3 %v3185_v20 }
 0x24c   :  { %v2659_v13 = vpop.eup %2658 }
 0x24d   :  { %v2661_v56 = vpop.eup %2660  ;;  %v897_v11 = vadd.f32 1.0, %v2659_v13 }
 0x24e   :  { %v898_v12 = vadd.f32 1.0, %v2661_v56  ;;  %1174 = vmatpush.bf16.msrb.mxu0 %v3187_v31  ;;  %1187 = vmatpush.bf16.msrb.mxu1 %v3193_v14 }
 0x24f   :  { %2662 = vrcp.f32 %v897_v11  ;;  %1200 = vmatpush.bf16.msrb.mxu2 %v3200_v38  ;;  %1213 = vmatpush.bf16.msrb.mxu3 %v3202_v55  ;;  %v910_v26 = vand.u32 2147483648, %v897_v11  ;;  %v908_v44 = vand.u32 2147483647, %v897_v11  ;;  %vm904_vm13 = vweird.f32 %v897_v11 }
 0x250   :  { %2664 = vrcp.f32 %v898_v12  ;;  %v872_v21 = vpop.f32.mrf.mxu2  ;;  %v885_v52 = vpop.f32.mrf.mxu3  ;;  %v925_v33 = vand.u32 2147483648, %v898_v12  ;;  %vm919_vm2 = vweird.f32 %v898_v12  ;;  %v923_v24 = vand.u32 2147483647, %v898_v12 }
 0x251   :  { %v911_v41 = vor.u32 1.1754944e-38, %v910_v26  ;;  %vm909_vm15 = vcmp.eq.f32.partialorder %v908_v44, 8.507059e+37 }
 0x252   :  { %1175 = vmatpush.bf16.msrb.mxu0 %v3208_v32  ;;  %1188 = vmatpush.bf16.msrb.mxu1 %v3213_v45  ;;  %vm924_vm4 = vcmp.eq.f32.partialorder %v923_v24, 8.507059e+37 }
 0x253   :  { %1201 = vmatpush.bf16.msrb.mxu2 %v3215_v48  ;;  %1214 = vmatpush.bf16.msrb.mxu3 %v3218_v0 }
 0x255   :  { %v2663_v61 = vpop.eup %2662 }
 0x256   :  { %v2665_v57 = vpop.eup %2664  ;;  %v900_v62 = vmul.f32 %v2663_v61, %v897_v11  ;;  %vm905_vm12 = vweird.f32 %v2663_v61  ;;  %v926_v11 = vor.u32 1.1754944e-38, %v925_v33 }
 0x257   :  { %v915_v9 = vmul.f32 %v2665_v57, %v898_v12  ;;  %vm906_vm14 = vmor %vm904_vm13, %vm905_vm12  ;;  %vm920_vm1 = vweird.f32 %v2665_v57 }
 0x258   :  { %v901_v5 = vsub.f32 1.0, %v900_v62  ;;  %vm921_vm3 = vmor %vm919_vm2, %vm920_vm1 }
 0x259   :  { %v916_v25 = vsub.f32 1.0, %v915_v9 }
 0x25a   :  { %v902_v27 = vmul.f32 %v2663_v61, %v901_v5 }
 0x25b   :  { %v917_v15 = vmul.f32 %v2665_v57, %v916_v25 }
 0x25c   :  { %v903_v17 = vadd.f32 %v2663_v61, %v902_v27 }
 0x25d   :  { %v918_v54 = vadd.f32 %v2665_v57, %v917_v15 }
 0x25e   :  { %v907_v23 = vsel %vm906_vm14, %v2663_v61, %v903_v17 }
 0x25f   :  { %v912_v19 = vsel %vm909_vm15, %v911_v41, %v907_v23  ;;  %v922_v13 = vsel %vm921_vm3, %v2665_v57, %v918_v54 }
 0x260   :  { %v929_v63 = vmul.f32 %v912_v19, %v890_v39  ;;  %v927_v3 = vsel %vm924_vm4, %v926_v11, %v922_v13 }
 0x262   :  { %v930_v58 = vadd.f32 %v929_v63, %v889_v6 }
 0x264   :  { %2666 = vtanh.f32 %v930_v58 }
 0x26a   :  { %v2667_v56 = vpop.eup %2666 }
 0x26b   :  { %v932_v10 = vsub.f32 %v3320_v2, %v2667_v56 }
 0x26d   :  { %v933_v21 = vmul.f32 %v932_v10, %v927_v3 }
 0x26f   :  { %v934_v52 = vadd.f32 %v2667_v56, %v933_v21 }
 0x271   :  { %v935_v1 = vsub.f32 %v934_v52, %v3320_v2 }
 0x273   :  { %v936_v61 = vmul.f32 %v935_v1, %v3371_v7 }
 0x275   :  { %v3376_v62 = vadd.f32 %v936_v61, %v3320_v2 }
 0x277   :  { %v1052_v12 = vpack.c.bf16 %v3376_v62, %v3376_v62 }
 0x279   :  { %2503 = vmatmul.msk.bf16.vlgmr.msra.gmra.mxu0 %vm183_vm0, %v1052_v12  ;;  %2504 = vmatmul.msk.bf16.vlgmr.msra.gmra.mxu1 %vm183_vm0, %v1052_v12 }
 0x27a   :  { %2505 = vmatmul.msk.bf16.vlgmr.msra.gmra.mxu2 %vm183_vm0, %v1052_v12  ;;  %2506 = vmatmul.msk.bf16.vlgmr.msra.gmra.mxu3 %vm183_vm0, %v1052_v12 }
 0x27b   :  { %1283 = vmatpush.bf16.msra.mxu0 %v2992_v29  ;;  %1296 = vmatpush.bf16.msra.mxu1 %v2994_v30 }
 0x27c   :  { %1309 = vmatpush.bf16.msra.mxu2 %v2999_v36  ;;  %1322 = vmatpush.bf16.msra.mxu3 %v2997_v35 }
 0x27f   :  { %1284 = vmatpush.bf16.msra.mxu0 %v3008_v40  ;;  %1297 = vmatpush.bf16.msra.mxu1 %v3010_v42 }
 0x280   :  { %1310 = vmatpush.bf16.msra.mxu2 %v3027_v49  ;;  %1323 = vmatpush.bf16.msra.mxu3 %v3025_v47 }
 0x2c1   :  { %v956_v2 = vpop.f32.mrf.mxu0  ;;  %v969_v57 = vpop.f32.mrf.mxu1 }
 0x2c2   :  { %v957_v5 = vadd.f32 %v956_v2, %v3283_v28  ;;  %v970_v9 = vadd.f32 %v969_v57, %v3286_v51 }
 0x2c4   :  { %v2501_v26 = vmul.f32 -1.442695, %v957_v5  ;;  %v2502_v27 = vmul.f32 -1.442695, %v970_v9 }
 0x2c6   :  { %2668 = vpow2.f32 %v2501_v26 }
 0x2c7   :  { %2670 = vpow2.f32 %v2502_v27 }
 0x2c8   :  { %v982_v44 = vpop.f32.mrf.mxu2  ;;  %v995_v17 = vpop.f32.mrf.mxu3 }
 0x2c9   :  { %v958_v25 = vpop.f32.mrf.mxu0  ;;  %v971_v41 = vpop.f32.mrf.mxu1  ;;  %v996_v1 = vadd.f32 %v995_v17, %v3306_v43  ;;  %v983_v2 = vadd.f32 %v982_v44, %v3310_v18 }
 0x2cc   :  { %v2669_v39 = vpop.eup %2668 }
 0x2cd   :  { %v2671_v23 = vpop.eup %2670  ;;  %v1005_v19 = vadd.f32 1.0, %v2669_v39 }
 0x2ce   :  { %v1006_v6 = vadd.f32 1.0, %v2671_v23 }
 0x2cf   :  { %2672 = vrcp.f32 %v1005_v19  ;;  %v1018_v56 = vand.u32 2147483648, %v1005_v19  ;;  %v1016_v10 = vand.u32 2147483647, %v1005_v19  ;;  %vm1012_vm6 = vweird.f32 %v1005_v19 }
 0x2d0   :  { %2674 = vrcp.f32 %v1006_v6  ;;  %v984_v63 = vpop.f32.mrf.mxu2  ;;  %v997_v15 = vpop.f32.mrf.mxu3  ;;  %v1033_v27 = vand.u32 2147483648, %v1006_v6  ;;  %vm1027_vm11 = vweird.f32 %v1006_v6  ;;  %v1031_v25 = vand.u32 2147483647, %v1006_v6 }
 0x2d1   :  { %v1019_v52 = vor.u32 1.1754944e-38, %v1018_v56  ;;  %vm1017_vm8 = vcmp.eq.f32.partialorder %v1016_v10, 8.507059e+37  ;;  %v3803_v56 = vld [vmem:[#allocation19_spill] sm:$0xff] }
 0x2d2   :  { %v1034_v23 = vor.u32 1.1754944e-38, %v1033_v27  ;;  %vm1032_vm13 = vcmp.eq.f32.partialorder %v1031_v25, 8.507059e+37 }
 0x2d5   :  { %v2673_v58 = vpop.eup %2672 }
 0x2d6   :  { %v2675_v54 = vpop.eup %2674  ;;  %v1008_v33 = vmul.f32 %v2673_v58, %v1005_v19  ;;  %vm1013_vm5 = vweird.f32 %v2673_v58 }
 0x2d7   :  { %v1023_v13 = vmul.f32 %v2675_v54, %v1006_v6  ;;  %vm1014_vm7 = vmor %vm1012_vm6, %vm1013_vm5  ;;  %vm1028_vm10 = vweird.f32 %v2675_v54 }
 0x2d8   :  { %v1009_v24 = vsub.f32 1.0, %v1008_v33  ;;  %vm1029_vm12 = vmor %vm1027_vm11, %vm1028_vm10  ;;  %v3801_v33 = vld [vmem:[#allocation18_spill] sm:$0xff] }
 0x2d9   :  { %v1024_v21 = vsub.f32 1.0, %v1023_v13  ;;  %v3802_v13 = vld [vmem:[#allocation16_spill] sm:$0xff] }
 0x2da   :  { %v1010_v11 = vmul.f32 %v2673_v58, %v1009_v24  ;;  %v213_v24 = vadd.f32 %v3801_v33, %v3060_v60  ;;  %v242_v6 = vadd.f32 %v3803_v56, %v3802_v13 }
 0x2db   :  { %v1025_v5 = vmul.f32 %v2675_v54, %v1024_v21 }
 0x2dc   :  { %v1011_v3 = vadd.f32 %v2673_v58, %v1010_v11 }
 0x2dd   :  { %v1026_v26 = vadd.f32 %v2675_v54, %v1025_v5 }
 0x2de   :  { %v1015_v61 = vsel %vm1014_vm7, %v2673_v58, %v1011_v3 }
 0x2df   :  { %v1020_v12 = vsel %vm1017_vm8, %v1019_v52, %v1015_v61  ;;  %v1030_v41 = vsel %vm1029_vm12, %v2675_v54, %v1026_v26 }
 0x2e0   :  { %v1037_v57 = vmul.f32 %v1020_v12, %v996_v1  ;;  %v1035_v19 = vsel %vm1032_vm13, %v1034_v23, %v1030_v41  ;;  %v3805_v12 = vld [vmem:[#allocation17_spill] sm:$0xff] }
 0x2e2   :  { %v1038_v9 = vadd.f32 %v1037_v57, %v983_v2  ;;  %v3806_v2 = vld [vmem:[#allocation21_spill] sm:$0xff] }
 0x2e3   :  { %v300_v57 = vadd.f32 %v3806_v2, %v3805_v12 }
 0x2e4   :  { %2676 = vtanh.f32 %v1038_v9 }
 0x2ea   :  { %v2677_v39 = vpop.eup %2676 }
 0x2eb   :  { %v1040_v17 = vsub.f32 %v3340_v46, %v2677_v39 }
 0x2ed   :  { %v1041_v63 = vmul.f32 %v1040_v17, %v1035_v19 }
 0x2ef   :  { %v1042_v15 = vadd.f32 %v2677_v39, %v1041_v63 }
 0x2f1   :  { %v1043_v44 = vsub.f32 %v1042_v15, %v3340_v46 }
 0x2f3   :  { %v1044_v58 = vmul.f32 %v1043_v44, %v3313_v22  ;;  %v3804_v22 = vld [vmem:[#allocation20_spill] sm:$0xff] }
 0x2f4   :  { %v271_v61 = vadd.f32 %v3804_v22, %v3074_v4 }
 0x2f5   :  { %v3404_v54 = vadd.f32 %v1044_v58, %v3340_v46 }
 0x2f6   :  { %v1065_v11 = vpop.f32.mrf.mxu0  ;;  %v1078_v10 = vpop.f32.mrf.mxu1 }
 0x2f7   :  { %v1108_v3 = vadd.f32 %v1065_v11, %v213_v24  ;;  %v1109_v21 = vadd.f32 %v1078_v10, %v242_v6  ;;  %1160 = vrot.lane.b32.xlu0 %v3404_v54, %s2925_s6 }
 0x2f9   :  { %v2507_v52 = vmul.f32 -1.442695, %v1108_v3  ;;  %v2508_v1 = vmul.f32 -1.442695, %v1109_v21 }
 0x2fb   :  { %2678 = vpow2.f32 %v2507_v52 }
 0x2fc   :  { %2680 = vpow2.f32 %v2508_v1 }
 0x2fd   :  { %v1091_v5 = vpop.f32.mrf.mxu2  ;;  %v1104_v46 = vpop.f32.mrf.mxu3 }
 0x2fe   :  { %v1110_v9 = vadd.f32 %v1091_v5, %v271_v61  ;;  %v1111_v26 = vadd.f32 %v1104_v46, %v300_v57  ;;  %v1067_v27 = vpop.f32.mrf.mxu0  ;;  %v1080_v25 = vpop.f32.mrf.mxu1 }
 0x301   :  { %v2679_v41 = vpop.eup %2678 }
 0x302   :  { %v2681_v39 = vpop.eup %2680  ;;  %v1118_v23 = vadd.f32 1.0, %v2679_v41 }
 0x303   :  { %v1119_v17 = vadd.f32 1.0, %v2681_v39 }
 0x304   :  { %2682 = vrcp.f32 %v1118_v23  ;;  %v1131_v56 = vand.u32 2147483648, %v1118_v23  ;;  %v1129_v11 = vand.u32 2147483647, %v1118_v23  ;;  %vm1125_vm15 = vweird.f32 %v1118_v23 }
 0x305   :  { %2684 = vrcp.f32 %v1119_v17  ;;  %v1093_v19 = vpop.f32.mrf.mxu2  ;;  %v1106_v63 = vpop.f32.mrf.mxu3  ;;  %v1146_v5 = vand.u32 2147483648, %v1119_v17  ;;  %vm1140_vm4 = vweird.f32 %v1119_v17  ;;  %v1144_v46 = vand.u32 2147483647, %v1119_v17 }
 0x306   :  { %v1132_v21 = vor.u32 1.1754944e-38, %v1131_v56  ;;  %vm1130_vm2 = vcmp.eq.f32.partialorder %v1129_v11, 8.507059e+37 }
 0x307   :  { %v1147_v41 = vor.u32 1.1754944e-38, %v1146_v5  ;;  %vm1145_vm6 = vcmp.eq.f32.partialorder %v1144_v46, 8.507059e+37 }
 0x30a   :  { %v2683_v15 = vpop.eup %2682 }
 0x30b   :  { %v2685_v44 = vpop.eup %2684  ;;  %v1121_v58 = vmul.f32 %v2683_v15, %v1118_v23  ;;  %vm1126_vm14 = vweird.f32 %v2683_v15 }
 0x30c   :  { %v1136_v24 = vmul.f32 %v2685_v44, %v1119_v17  ;;  %vm1127_vm1 = vmor %vm1125_vm15, %vm1126_vm14  ;;  %vm1141_vm3 = vweird.f32 %v2685_v44 }
 0x30d   :  { %v1122_v33 = vsub.f32 1.0, %v1121_v58  ;;  %vm1142_vm5 = vmor %vm1140_vm4, %vm1141_vm3 }
 0x30e   :  { %v1137_v3 = vsub.f32 1.0, %v1136_v24 }
 0x30f   :  { %v1123_v6 = vmul.f32 %v2683_v15, %v1122_v33 }
 0x310   :  { %v1138_v61 = vmul.f32 %v2685_v44, %v1137_v3 }
 0x311   :  { %v1124_v10 = vadd.f32 %v2683_v15, %v1123_v6 }
 0x312   :  { %v1139_v57 = vadd.f32 %v2685_v44, %v1138_v61 }
 0x313   :  { %v1128_v52 = vsel %vm1127_vm1, %v2683_v15, %v1124_v10 }
 0x314   :  { %v1133_v1 = vsel %vm1130_vm2, %v1132_v21, %v1128_v52  ;;  %v1143_v27 = vsel %vm1142_vm5, %v2685_v44, %v1139_v57  ;;  %v3422_v44 = vld [vmem:[#allocation3 + $0x18] sm:$0xff] }
 0x315   :  { %v1150_v22 = vmul.f32 %v1133_v1, %v1111_v26  ;;  %v1148_v23 = vsel %vm1145_vm6, %v1147_v41, %v1143_v27 }
 0x317   :  { %v1151_v2 = vadd.f32 %v1150_v22, %v1110_v9 }
 0x319   :  { %2686 = vtanh.f32 %v1151_v2 }
 0x31f   :  { %v2687_v25 = vpop.eup %2686 }
 0x320   :  { %v1153_v39 = vsub.f32 %v3376_v62, %v2687_v25 }
 0x322   :  { %v1154_v19 = vmul.f32 %v1153_v39, %v1148_v23  ;;  %v3807_v39 = vld [vmem:[#allocation22_spill] sm:$0xff] }
 0x324   :  { %v1155_v63 = vadd.f32 %v2687_v25, %v1154_v19  ;;  %v3808_v19 = vld [vmem:[#allocation23_spill] sm:$0xff] }
 0x326   :  { %v1156_v17 = vsub.f32 %v1155_v63, %v3376_v62 }
 0x328   :  { %v1157_v58 = vmul.f32 %v1156_v17, %v3422_v44 }
 0x32a   :  { %v3432_v33 = vadd.f32 %v1157_v58, %v3376_v62 }
 0x32c   :  { %v1273_v24 = vpack.c.bf16 %v3432_v33, %v3432_v33 }
 0x369   :  { %v1161_v15 = vpop.permute.xlu0 %1160 }
 0x36a   :  { %v1163_v9 = vsel %vm183_vm0, %v3376_v62, %v1161_v15 }
 0x36b   :  { %v1164_v26 = vpack.c.bf16 %v1163_v9, %v1163_v9 }
 0x36d   :  { %2509 = vmatmul.msk.bf16.vlgmr.msrb.gmra.mxu0 %vm723_vm9, %v1164_v26  ;;  %2510 = vmatmul.msk.bf16.vlgmr.msrb.gmra.mxu1 %vm723_vm9, %v1164_v26 }
 0x36e   :  { %2511 = vmatmul.msk.bf16.vlgmr.msrb.gmra.mxu2 %vm723_vm9, %v1164_v26  ;;  %2512 = vmatmul.msk.bf16.vlgmr.msrb.gmra.mxu3 %vm723_vm9, %v1164_v26 }
 0x36f   :  { %1393 = vmatpush.bf16.msrb.mxu0 %v3147_v50  ;;  %1406 = vmatpush.bf16.msrb.mxu1 %v3153_v53 }
 0x370   :  { %1419 = vmatpush.bf16.msrb.mxu2 %v3155_v8  ;;  %1432 = vmatpush.bf16.msrb.mxu3 %v3162_v34 }
 0x373   :  { %1394 = vmatpush.bf16.msrb.mxu0 %v3173_v16  ;;  %1407 = vmatpush.bf16.msrb.mxu1 %v3177_v59 }
 0x374   :  { %1420 = vmatpush.bf16.msrb.mxu2 %v3179_v37  ;;  %1433 = vmatpush.bf16.msrb.mxu3 %v3185_v20 }
 0x377   :  { %1395 = vmatpush.bf16.msrb.mxu0 %v3187_v31  ;;  %1408 = vmatpush.bf16.msrb.mxu1 %v3193_v14 }
 0x378   :  { %1421 = vmatpush.bf16.msrb.mxu2 %v3200_v38  ;;  %1434 = vmatpush.bf16.msrb.mxu3 %v3202_v55 }
 0x37b   :  { %1396 = vmatpush.bf16.msrb.mxu0 %v3208_v32  ;;  %1409 = vmatpush.bf16.msrb.mxu1 %v3213_v45 }
 0x37c   :  { %1422 = vmatpush.bf16.msrb.mxu2 %v3215_v48  ;;  %1435 = vmatpush.bf16.msrb.mxu3 %v3218_v0 }
 0x37d   :  { %2515 = vmatmul.msk.bf16.vlgmr.msra.gmra.mxu0 %vm183_vm0, %v1273_v24  ;;  %2516 = vmatmul.msk.bf16.vlgmr.msra.gmra.mxu1 %vm183_vm0, %v1273_v24 }
 0x37e   :  { %2517 = vmatmul.msk.bf16.vlgmr.msra.gmra.mxu2 %vm183_vm0, %v1273_v24  ;;  %2518 = vmatmul.msk.bf16.vlgmr.msra.gmra.mxu3 %vm183_vm0, %v1273_v24 }
 0x37f   :  { %1504 = vmatpush.bf16.msra.mxu0 %v2992_v29  ;;  %1517 = vmatpush.bf16.msra.mxu1 %v2994_v30 }
 0x380   :  { %1530 = vmatpush.bf16.msra.mxu2 %v2999_v36  ;;  %1543 = vmatpush.bf16.msra.mxu3 %v2997_v35 }
 0x383   :  { %1505 = vmatpush.bf16.msra.mxu0 %v3008_v40  ;;  %1518 = vmatpush.bf16.msra.mxu1 %v3010_v42 }
 0x384   :  { %1531 = vmatpush.bf16.msra.mxu2 %v3027_v49  ;;  %1544 = vmatpush.bf16.msra.mxu3 %v3025_v47 }
 0x3ea   :  { %v1177_v62 = vpop.f32.mrf.mxu0  ;;  %v1190_v56 = vpop.f32.mrf.mxu1 }
 0x3eb   :  { %v1178_v6 = vadd.f32 %v1177_v62, %v3283_v28  ;;  %v1191_v11 = vadd.f32 %v1190_v56, %v3286_v51 }
 0x3ed   :  { %v2513_v10 = vmul.f32 -1.442695, %v1178_v6  ;;  %v2514_v3 = vmul.f32 -1.442695, %v1191_v11 }
 0x3ef   :  { %2688 = vpow2.f32 %v2513_v10  ;;  %v3809_v10 = vld [vmem:[#allocation24_spill] sm:$0xff] }
 0x3f0   :  { %2690 = vpow2.f32 %v2514_v3 }
 0x3f1   :  { %v1203_v21 = vpop.f32.mrf.mxu2  ;;  %v1216_v52 = vpop.f32.mrf.mxu3 }
 0x3f2   :  { %v1179_v1 = vpop.f32.mrf.mxu0  ;;  %v1192_v22 = vpop.f32.mrf.mxu1 }
 0x3f3   :  { %v3810_v1 = vld [vmem:[#allocation26_spill] sm:$0xff] }
 0x3f5   :  { %v2689_v61 = vpop.eup %2688 }
 0x3f6   :  { %v2691_v2 = vpop.eup %2690  ;;  %v1226_v57 = vadd.f32 1.0, %v2689_v61 }
 0x3f7   :  { %v3458_v5 = vadd.f32 1.0, %v2691_v2 }
 0x3f8   :  { %2692 = vrcp.f32 %v1226_v57  ;;  %v1239_v11 = vand.u32 2147483648, %v1226_v57  ;;  %vm1233_vm8 = vweird.f32 %v1226_v57 }
 0x3f9   :  { %2694 = vrcp.f32 %v3458_v5  ;;  %v1205_v46 = vpop.f32.mrf.mxu2  ;;  %v1218_v27 = vpop.f32.mrf.mxu3  ;;  %vm1248_vm13 = vweird.f32 %v3458_v5 }
 0x3fa   :  { %v1286_v25 = vpop.f32.mrf.mxu0  ;;  %v1299_v41 = vpop.f32.mrf.mxu1  ;;  %v1237_v27 = vand.u32 2147483647, %v1226_v57 }
 0x3fb   :  { %v1329_v23 = vadd.f32 %v1286_v25, %v3807_v39  ;;  %v1330_v63 = vadd.f32 %v1299_v41, %v3808_v19  ;;  %v1240_v19 = vor.u32 1.1754944e-38, %v1239_v11 }
 0x3fc   :  { %vm1238_vm11 = vcmp.eq.f32.partialorder %v1237_v27, 8.507059e+37 }
 0x3fd   :  { %v2519_v15 = vmul.f32 -1.442695, %v1329_v23  ;;  %v2520_v9 = vmul.f32 -1.442695, %v1330_v63 }
 0x3fe   :  { %v2693_v26 = vpop.eup %2692 }
 0x3ff   :  { %v2695_v17 = vpop.eup %2694  ;;  %v1229_v58 = vmul.f32 %v2693_v26, %v1226_v57  ;;  %2696 = vpow2.f32 %v2519_v15  ;;  %vm1234_vm7 = vweird.f32 %v2693_v26  ;;  %v1217_v15 = vadd.f32 %v1216_v52, %v3306_v43 }
 0x400   :  { %2698 = vpow2.f32 %v2520_v9  ;;  %v1244_v6 = vmul.f32 %v2695_v17, %v3458_v5  ;;  %vm1235_vm10 = vmor %vm1233_vm8, %vm1234_vm7  ;;  %vm1249_vm12 = vweird.f32 %v2695_v17  ;;  %v1254_v52 = vand.u32 2147483648, %v3458_v5 }
 0x401   :  { %v1230_v24 = vsub.f32 1.0, %v1229_v58  ;;  %v1312_v62 = vpop.f32.mrf.mxu2  ;;  %v1325_v56 = vpop.f32.mrf.mxu3  ;;  %vm1250_vm14 = vmor %vm1248_vm13, %vm1249_vm12 }
 0x402   :  { %v3465_v3 = vadd.f32 %v1312_v62, %v3809_v10  ;;  %v1332_v22 = vadd.f32 %v1325_v56, %v3810_v1  ;;  %v1288_v61 = vpop.f32.mrf.mxu0  ;;  %v1301_v2 = vpop.f32.mrf.mxu1  ;;  %v1245_v23 = vsub.f32 1.0, %v1244_v6  ;;  %v1204_v56 = vadd.f32 %v1203_v21, %v3310_v18 }
 0x403   :  { %v1231_v46 = vmul.f32 %v2693_v26, %v1230_v24 }
 0x404   :  { %v1246_v61 = vmul.f32 %v2695_v17, %v1245_v23  ;;  %v1255_v23 = vor.u32 1.1754944e-38, %v1254_v52 }
 0x405   :  { %v2697_v25 = vpop.eup %2696  ;;  %v1232_v41 = vadd.f32 %v2693_v26, %v1231_v46  ;;  %v1252_v46 = vand.u32 2147483647, %v3458_v5 }
 0x406   :  { %v2699_v39 = vpop.eup %2698  ;;  %v1339_v63 = vadd.f32 1.0, %v2697_v25  ;;  %v1247_v2 = vadd.f32 %v2695_v17, %v1246_v61 }
 0x407   :  { %v1236_v9 = vsel %vm1235_vm10, %v2693_v26, %v1232_v41  ;;  %v1340_v58 = vadd.f32 1.0, %v2699_v39  ;;  %vm1253_vm1 = vcmp.eq.f32.partialorder %v1252_v46, 8.507059e+37 }
 0x408   :  { %v1241_v62 = vsel %vm1238_vm11, %v1240_v19, %v1236_v9  ;;  %2700 = vrcp.f32 %v1339_v63  ;;  %v1251_v27 = vsel %vm1250_vm14, %v2695_v17, %v1247_v2  ;;  %v1352_v41 = vand.u32 2147483648, %v1339_v63 }
 0x409   :  { %v1258_v24 = vmul.f32 %v1241_v62, %v1217_v15  ;;  %2702 = vrcp.f32 %v1340_v58  ;;  %v1314_v10 = vpop.f32.mrf.mxu2  ;;  %v1327_v1 = vpop.f32.mrf.mxu3  ;;  %v1350_v15 = vand.u32 2147483647, %v1339_v63  ;;  %v1256_v62 = vsel %vm1253_vm1, %v1255_v23, %v1251_v27 }
 0x40a   :  { %vm1346_vm2 = vweird.f32 %v1339_v63  ;;  %v1353_v5 = vor.u32 1.1754944e-38, %v1352_v41  ;;  %v1367_v27 = vand.u32 2147483648, %v1340_v58  ;;  %vm1361_vm6 = vweird.f32 %v1340_v58 }
 0x40b   :  { %v1259_v57 = vadd.f32 %v1258_v24, %v1204_v56  ;;  %vm1351_vm4 = vcmp.eq.f32.partialorder %v1350_v15, 8.507059e+37 }
 0x40c   :  { %v1368_v41 = vor.u32 1.1754944e-38, %v1367_v27 }
 0x40d   :  { %2704 = vtanh.f32 %v1259_v57 }
 0x40e   :  { %v2701_v6 = vpop.eup %2700 }
 0x40f   :  { %v2703_v11 = vpop.eup %2702  ;;  %v1342_v26 = vmul.f32 %v2701_v6, %v1339_v63  ;;  %vm1347_vm15 = vweird.f32 %v2701_v6 }
 0x410   :  { %v1357_v25 = vmul.f32 %v2703_v11, %v1340_v58  ;;  %vm1348_vm3 = vmor %vm1346_vm2, %vm1347_vm15  ;;  %vm1362_vm5 = vweird.f32 %v2703_v11 }
 0x411   :  { %v1343_v21 = vsub.f32 1.0, %v1342_v26  ;;  %vm1363_vm7 = vmor %vm1361_vm6, %vm1362_vm5 }
 0x412   :  { %v1358_v10 = vsub.f32 1.0, %v1357_v25 }
 0x413   :  { %v2705_v39 = vpop.eup %2704  ;;  %v1344_v19 = vmul.f32 %v2701_v6, %v1343_v21 }
 0x414   :  { %v1261_v9 = vsub.f32 %v3404_v54, %v2705_v39  ;;  %v1359_v2 = vmul.f32 %v2703_v11, %v1358_v10 }
 0x415   :  { %v1345_v56 = vadd.f32 %v2701_v6, %v1344_v19 }
 0x416   :  { %v1262_v24 = vmul.f32 %v1261_v9, %v1256_v62  ;;  %v1360_v21 = vadd.f32 %v2703_v11, %v1359_v2 }
 0x417   :  { %v1349_v1 = vsel %vm1348_vm3, %v2701_v6, %v1345_v56  ;;  %v1365_v6 = vand.u32 2147483647, %v1340_v58 }
 0x418   :  { %v1263_v17 = vadd.f32 %v2705_v39, %v1262_v24  ;;  %v1354_v61 = vsel %vm1351_vm4, %v1353_v5, %v1349_v1 }
 0x419   :  { %v1371_v57 = vmul.f32 %v1354_v61, %v1332_v22  ;;  %v1364_v22 = vsel %vm1363_vm7, %v2703_v11, %v1360_v21  ;;  %vm1366_vm8 = vcmp.eq.f32.partialorder %v1365_v6, 8.507059e+37  ;;  %v3492_v11 = vld [vmem:[#allocation3 + $0x20] sm:$0xff]  ;;  %v3811_v6 = vld [vmem:[#allocation25_spill] sm:$0xff] }
 0x41a   :  { %v1264_v52 = vsub.f32 %v1263_v17, %v3404_v54 }
 0x41b   :  { %v1372_v26 = vadd.f32 %v1371_v57, %v3465_v3 }
 0x41c   :  { %v1265_v46 = vmul.f32 %v1264_v52, %v3371_v7  ;;  %v1369_v7 = vsel %vm1366_vm8, %v1368_v41, %v1364_v22  ;;  %v218_v22 = vadd.f32 %v3811_v6, %v3060_v60 }
 0x41d   :  { %2706 = vtanh.f32 %v1372_v26 }
 0x41e   :  { %v3478_v63 = vadd.f32 %v1265_v46, %v3404_v54 }
 0x420   :  { %1381 = vrot.lane.b32.xlu1 %v3478_v63, %s2925_s6 }
 0x423   :  { %v2707_v25 = vpop.eup %2706 }
 0x424   :  { %v1374_v3 = vsub.f32 %v3432_v33, %v2707_v25 }
 0x426   :  { %v1375_v39 = vmul.f32 %v1374_v3, %v1369_v7 }
 0x428   :  { %v1376_v23 = vadd.f32 %v2707_v25, %v1375_v39  ;;  %v3812_v25 = vld [vmem:[#allocation27_spill] sm:$0xff] }
 0x429   :  { %v247_v41 = vadd.f32 %v3812_v25, %v3802_v13 }
 0x42a   :  { %v1377_v58 = vsub.f32 %v1376_v23, %v3432_v33 }
 0x42c   :  { %v1378_v9 = vmul.f32 %v1377_v58, %v3492_v11 }
 0x42e   :  { %v3502_v62 = vadd.f32 %v1378_v9, %v3432_v33 }
 0x430   :  { %v1494_v56 = vpack.c.bf16 %v3502_v62, %v3502_v62 }
 0x492   :  { %v1382_v19 = vpop.permute.xlu1 %1381 }
 0x493   :  { %v1384_v54 = vsel %vm183_vm0, %v3432_v33, %v1382_v19 }
 0x494   :  { %v1385_v15 = vpack.c.bf16 %v1384_v54, %v1384_v54 }
 0x496   :  { %2521 = vmatmul.msk.bf16.vlgmr.msrb.gmra.mxu0 %vm723_vm9, %v1385_v15  ;;  %2522 = vmatmul.msk.bf16.vlgmr.msrb.gmra.mxu1 %vm723_vm9, %v1385_v15 }
 0x497   :  { %2523 = vmatmul.msk.bf16.vlgmr.msrb.gmra.mxu2 %vm723_vm9, %v1385_v15  ;;  %2524 = vmatmul.msk.bf16.vlgmr.msrb.gmra.mxu3 %vm723_vm9, %v1385_v15 }
 0x498   :  { %1614 = vmatpush.bf16.msrb.mxu0 %v3147_v50  ;;  %1627 = vmatpush.bf16.msrb.mxu1 %v3153_v53 }
 0x499   :  { %1640 = vmatpush.bf16.msrb.mxu2 %v3155_v8  ;;  %1653 = vmatpush.bf16.msrb.mxu3 %v3162_v34 }
 0x49c   :  { %1615 = vmatpush.bf16.msrb.mxu0 %v3173_v16  ;;  %1628 = vmatpush.bf16.msrb.mxu1 %v3177_v59 }
 0x49d   :  { %1641 = vmatpush.bf16.msrb.mxu2 %v3179_v37  ;;  %1654 = vmatpush.bf16.msrb.mxu3 %v3185_v20 }
 0x4a0   :  { %1616 = vmatpush.bf16.msrb.mxu0 %v3187_v31  ;;  %1629 = vmatpush.bf16.msrb.mxu1 %v3193_v14 }
 0x4a1   :  { %1642 = vmatpush.bf16.msrb.mxu2 %v3200_v38  ;;  %1655 = vmatpush.bf16.msrb.mxu3 %v3202_v55 }
 0x4a4   :  { %1617 = vmatpush.bf16.msrb.mxu0 %v3208_v32  ;;  %1630 = vmatpush.bf16.msrb.mxu1 %v3213_v45 }
 0x4a5   :  { %1643 = vmatpush.bf16.msrb.mxu2 %v3215_v48  ;;  %1656 = vmatpush.bf16.msrb.mxu3 %v3218_v0 }
 0x4a6   :  { %2527 = vmatmul.msk.bf16.vlgmr.msra.gmra.mxu0 %vm183_vm0, %v1494_v56  ;;  %2528 = vmatmul.msk.bf16.vlgmr.msra.gmra.mxu1 %vm183_vm0, %v1494_v56 }
 0x4a7   :  { %2529 = vmatmul.msk.bf16.vlgmr.msra.gmra.mxu2 %vm183_vm0, %v1494_v56  ;;  %2530 = vmatmul.msk.bf16.vlgmr.msra.gmra.mxu3 %vm183_vm0, %v1494_v56 }
 0x4a8   :  { %1725 = vmatpush.bf16.msra.mxu0 %v2992_v29  ;;  %1738 = vmatpush.bf16.msra.mxu1 %v2994_v30 }
 0x4a9   :  { %1751 = vmatpush.bf16.msra.mxu2 %v2999_v36  ;;  %1764 = vmatpush.bf16.msra.mxu3 %v2997_v35 }
 0x4ac   :  { %1726 = vmatpush.bf16.msra.mxu0 %v3008_v40  ;;  %1739 = vmatpush.bf16.msra.mxu1 %v3010_v42 }
 0x4ad   :  { %1752 = vmatpush.bf16.msra.mxu2 %v3027_v49  ;;  %1765 = vmatpush.bf16.msra.mxu3 %v3025_v47 }
 0x513   :  { %v1398_v33 = vpop.f32.mrf.mxu0  ;;  %v1411_v24 = vpop.f32.mrf.mxu1 }
 0x514   :  { %v1399_v10 = vadd.f32 %v1398_v33, %v3283_v28  ;;  %v1412_v5 = vadd.f32 %v1411_v24, %v3286_v51  ;;  %v3813_v24 = vld [vmem:[#allocation28_spill] sm:$0xff] }
 0x516   :  { %v2525_v1 = vmul.f32 -1.442695, %v1399_v10  ;;  %v2526_v17 = vmul.f32 -1.442695, %v1412_v5  ;;  %v276_v10 = vadd.f32 %v3813_v24, %v3074_v4  ;;  %v3814_v5 = vld [vmem:[#allocation29_spill] sm:$0xff] }
 0x518   :  { %2708 = vpow2.f32 %v2525_v1  ;;  %v305_v1 = vadd.f32 %v3814_v5, %v3805_v12 }
 0x519   :  { %2710 = vpow2.f32 %v2526_v17 }
 0x51a   :  { %v1424_v61 = vpop.f32.mrf.mxu2  ;;  %v1437_v57 = vpop.f32.mrf.mxu3 }
 0x51b   :  { %v1400_v2 = vpop.f32.mrf.mxu0  ;;  %v1413_v52 = vpop.f32.mrf.mxu1 }
 0x51e   :  { %v2709_v26 = vpop.eup %2708 }
 0x51f   :  { %v2711_v46 = vpop.eup %2710  ;;  %v1447_v21 = vadd.f32 1.0, %v2709_v26 }
 0x520   :  { %v3528_v27 = vadd.f32 1.0, %v2711_v46 }
 0x521   :  { %2712 = vrcp.f32 %v1447_v21  ;;  %v1460_v46 = vand.u32 2147483648, %v1447_v21  ;;  %vm1454_vm11 = vweird.f32 %v1447_v21 }
 0x522   :  { %2714 = vrcp.f32 %v3528_v27  ;;  %v1426_v3 = vpop.f32.mrf.mxu2  ;;  %v1439_v7 = vpop.f32.mrf.mxu3  ;;  %vm1469_vm15 = vweird.f32 %v3528_v27 }
 0x523   :  { %v1507_v39 = vpop.f32.mrf.mxu0  ;;  %v1520_v23 = vpop.f32.mrf.mxu1  ;;  %v1458_v7 = vand.u32 2147483647, %v1447_v21 }
 0x524   :  { %v1550_v19 = vadd.f32 %v1507_v39, %v218_v22  ;;  %v1551_v54 = vadd.f32 %v1520_v23, %v247_v41 }
 0x525   :  { %vm1459_vm13 = vcmp.eq.f32.partialorder %v1458_v7, 8.507059e+37 }
 0x526   :  { %v2531_v15 = vmul.f32 -1.442695, %v1550_v19  ;;  %v2532_v58 = vmul.f32 -1.442695, %v1551_v54 }
 0x527   :  { %v2713_v9 = vpop.eup %2712 }
 0x528   :  { %v2715_v56 = vpop.eup %2714  ;;  %v1450_v33 = vmul.f32 %v2713_v9, %v1447_v21  ;;  %2716 = vpow2.f32 %v2531_v15  ;;  %vm1455_vm10 = vweird.f32 %v2713_v9  ;;  %v1461_v15 = vor.u32 1.1754944e-38, %v1460_v46 }
 0x529   :  { %2718 = vpow2.f32 %v2532_v58  ;;  %v1465_v26 = vmul.f32 %v2715_v56, %v3528_v27  ;;  %vm1456_vm12 = vmor %vm1454_vm11, %vm1455_vm10  ;;  %vm1470_vm14 = vweird.f32 %v2715_v56 }
 0x52a   :  { %v1451_v17 = vsub.f32 1.0, %v1450_v33  ;;  %v1533_v2 = vpop.f32.mrf.mxu2  ;;  %v1546_v52 = vpop.f32.mrf.mxu3  ;;  %v1438_v33 = vadd.f32 %v1437_v57, %v3306_v43  ;;  %v1475_v57 = vand.u32 2147483648, %v3528_v27  ;;  %vm1471_vm1 = vmor %vm1469_vm15, %vm1470_vm14 }
 0x52b   :  { %v3540_v6 = vadd.f32 %v1533_v2, %v276_v10  ;;  %v1553_v22 = vadd.f32 %v1546_v52, %v305_v1  ;;  %v1509_v25 = vpop.f32.mrf.mxu0  ;;  %v1522_v41 = vpop.f32.mrf.mxu1  ;;  %v1466_v54 = vsub.f32 1.0, %v1465_v26  ;;  %v1425_v1 = vadd.f32 %v1424_v61, %v3310_v18 }
 0x52c   :  { %v1452_v3 = vmul.f32 %v2713_v9, %v1451_v17 }
 0x52d   :  { %v1467_v25 = vmul.f32 %v2715_v56, %v1466_v54  ;;  %v1476_v54 = vor.u32 1.1754944e-38, %v1475_v57 }
 0x52e   :  { %v2717_v39 = vpop.eup %2716  ;;  %v1453_v23 = vadd.f32 %v2713_v9, %v1452_v3  ;;  %v1473_v3 = vand.u32 2147483647, %v3528_v27 }
 0x52f   :  { %v2719_v19 = vpop.eup %2718  ;;  %v1560_v58 = vadd.f32 1.0, %v2717_v39  ;;  %v1468_v41 = vadd.f32 %v2715_v56, %v1467_v25 }
 0x530   :  { %v1457_v24 = vsel %vm1456_vm12, %v2713_v9, %v1453_v23  ;;  %v1561_v10 = vadd.f32 1.0, %v2719_v19  ;;  %vm1474_vm3 = vcmp.eq.f32.partialorder %v1473_v3, 8.507059e+37 }
 0x531   :  { %v1462_v5 = vsel %vm1459_vm13, %v1461_v15, %v1457_v24  ;;  %2720 = vrcp.f32 %v1560_v58  ;;  %v1472_v7 = vsel %vm1471_vm1, %v2715_v56, %v1468_v41  ;;  %v1573_v23 = vand.u32 2147483648, %v1560_v58 }
 0x532   :  { %v1479_v17 = vmul.f32 %v1462_v5, %v1438_v33  ;;  %2722 = vrcp.f32 %v1561_v10  ;;  %v1535_v2 = vpop.f32.mrf.mxu2  ;;  %v1548_v52 = vpop.f32.mrf.mxu3  ;;  %v1571_v33 = vand.u32 2147483647, %v1560_v58  ;;  %v1477_v5 = vsel %vm1474_vm3, %v1476_v54, %v1472_v7 }
 0x533   :  { %vm1567_vm4 = vweird.f32 %v1560_v58  ;;  %v1574_v27 = vor.u32 1.1754944e-38, %v1573_v23  ;;  %v1588_v7 = vand.u32 2147483648, %v1561_v10  ;;  %vm1582_vm8 = vweird.f32 %v1561_v10 }
 0x534   :  { %v1480_v21 = vadd.f32 %v1479_v17, %v1425_v1  ;;  %vm1572_vm6 = vcmp.eq.f32.partialorder %v1571_v33, 8.507059e+37 }
 0x535   :  { %v1589_v23 = vor.u32 1.1754944e-38, %v1588_v7 }
 0x536   :  { %2724 = vtanh.f32 %v1480_v21 }
 0x537   :  { %v2721_v26 = vpop.eup %2720 }
 0x538   :  { %v2723_v46 = vpop.eup %2722  ;;  %v1563_v9 = vmul.f32 %v2721_v26, %v1560_v58  ;;  %vm1568_vm2 = vweird.f32 %v2721_v26 }
 0x539   :  { %v1578_v39 = vmul.f32 %v2723_v46, %v1561_v10  ;;  %vm1569_vm5 = vmor %vm1567_vm4, %vm1568_vm2  ;;  %vm1583_vm7 = vweird.f32 %v2723_v46 }
 0x53a   :  { %v1564_v61 = vsub.f32 1.0, %v1563_v9  ;;  %vm1584_vm10 = vmor %vm1582_vm8, %vm1583_vm7 }
 0x53b   :  { %v1579_v2 = vsub.f32 1.0, %v1578_v39 }
 0x53c   :  { %v2725_v19 = vpop.eup %2724  ;;  %v1565_v15 = vmul.f32 %v2721_v26, %v1564_v61 }
 0x53d   :  { %v1482_v24 = vsub.f32 %v3478_v63, %v2725_v19  ;;  %v1580_v41 = vmul.f32 %v2723_v46, %v1579_v2 }
 0x53e   :  { %v1566_v1 = vadd.f32 %v2721_v26, %v1565_v15 }
 0x53f   :  { %v1483_v17 = vmul.f32 %v1482_v24, %v1477_v5  ;;  %v1581_v61 = vadd.f32 %v2723_v46, %v1580_v41 }
 0x540   :  { %v1570_v52 = vsel %vm1569_vm5, %v2721_v26, %v1566_v1  ;;  %v1586_v26 = vand.u32 2147483647, %v1561_v10 }
 0x541   :  { %v1484_v56 = vadd.f32 %v2725_v19, %v1483_v17  ;;  %v1575_v25 = vsel %vm1572_vm6, %v1574_v27, %v1570_v52 }
 0x542   :  { %v1592_v21 = vmul.f32 %v1575_v25, %v1553_v22  ;;  %v1585_v22 = vsel %vm1584_vm10, %v2723_v46, %v1581_v61  ;;  %vm1587_vm11 = vcmp.eq.f32.partialorder %v1586_v26, 8.507059e+37  ;;  %v3566_v46 = vld [vmem:[#allocation3 + $0x28] sm:$0xff]  ;;  %v3816_v61 = vld [vmem:[#allocation31_spill] sm:$0xff] }
 0x543   :  { %v1485_v57 = vsub.f32 %v1484_v56, %v3478_v63 }
 0x544   :  { %v1593_v9 = vadd.f32 %v1592_v21, %v3540_v6 }
 0x545   :  { %v1486_v3 = vmul.f32 %v1485_v57, %v3422_v44  ;;  %v1590_v44 = vsel %vm1587_vm11, %v1589_v23, %v1585_v22 }
 0x546   :  { %2726 = vtanh.f32 %v1593_v9  ;;  %v3815_v9 = vld [vmem:[#allocation30_spill] sm:$0xff] }
 0x547   :  { %v3552_v58 = vadd.f32 %v1486_v3, %v3478_v63 }
 0x549   :  { %1602 = vrot.lane.b32.xlu1 %v3552_v58, %s2925_s6 }
 0x54c   :  { %v2727_v39 = vpop.eup %2726 }
 0x54d   :  { %v1595_v6 = vsub.f32 %v3502_v62, %v2727_v39 }
 0x54f   :  { %v1596_v19 = vmul.f32 %v1595_v6, %v1590_v44 }
 0x551   :  { %v1597_v54 = vadd.f32 %v2727_v39, %v1596_v19 }
 0x553   :  { %v1598_v10 = vsub.f32 %v1597_v54, %v3502_v62 }
 0x555   :  { %v1599_v24 = vmul.f32 %v1598_v10, %v3566_v46 }
 0x557   :  { %v3576_v5 = vadd.f32 %v1599_v24, %v3502_v62  ;;  %v3818_v24 = vld [vmem:[#allocation34_spill] sm:$0xff] }
 0x559   :  { %v1715_v1 = vpack.c.bf16 %v3576_v5, %v3576_v5 }
 0x5bb   :  { %v1603_v15 = vpop.permute.xlu1 %1602 }
 0x5bc   :  { %v1605_v63 = vsel %vm183_vm0, %v3502_v62, %v1603_v15 }
 0x5bd   :  { %v1606_v33 = vpack.c.bf16 %v1605_v63, %v1605_v63 }
 0x5bf   :  { %2533 = vmatmul.msk.bf16.vlgmr.msrb.gmra.mxu0 %vm723_vm9, %v1606_v33  ;;  %2534 = vmatmul.msk.bf16.vlgmr.msrb.gmra.mxu1 %vm723_vm9, %v1606_v33 }
 0x5c0   :  { %2535 = vmatmul.msk.bf16.vlgmr.msrb.gmra.mxu2 %vm723_vm9, %v1606_v33  ;;  %2536 = vmatmul.msk.bf16.vlgmr.msrb.gmra.mxu3 %vm723_vm9, %v1606_v33  ;;  %v3817_v33 = vld [vmem:[#allocation32_spill] sm:$0xff] }
 0x5c1   :  { %1835 = vmatpush.bf16.msrb.mxu0 %v3147_v50  ;;  %1848 = vmatpush.bf16.msrb.mxu1 %v3153_v53 }
 0x5c2   :  { %1861 = vmatpush.bf16.msrb.mxu2 %v3155_v8  ;;  %1874 = vmatpush.bf16.msrb.mxu3 %v3162_v34 }
 0x5c5   :  { %1836 = vmatpush.bf16.msrb.mxu0 %v3173_v16  ;;  %1849 = vmatpush.bf16.msrb.mxu1 %v3177_v59 }
 0x5c6   :  { %1862 = vmatpush.bf16.msrb.mxu2 %v3179_v37  ;;  %1875 = vmatpush.bf16.msrb.mxu3 %v3185_v20 }
 0x5c9   :  { %1837 = vmatpush.bf16.msrb.mxu0 %v3187_v31  ;;  %1850 = vmatpush.bf16.msrb.mxu1 %v3193_v14 }
 0x5ca   :  { %1863 = vmatpush.bf16.msrb.mxu2 %v3200_v38  ;;  %1876 = vmatpush.bf16.msrb.mxu3 %v3202_v55 }
 0x5cd   :  { %1838 = vmatpush.bf16.msrb.mxu0 %v3208_v32  ;;  %1851 = vmatpush.bf16.msrb.mxu1 %v3213_v45 }
 0x5ce   :  { %1864 = vmatpush.bf16.msrb.mxu2 %v3215_v48  ;;  %1877 = vmatpush.bf16.msrb.mxu3 %v3218_v0 }
 0x5cf   :  { %2539 = vmatmul.msk.bf16.vlgmr.msra.gmra.mxu0 %vm183_vm0, %v1715_v1  ;;  %2540 = vmatmul.msk.bf16.vlgmr.msra.gmra.mxu1 %vm183_vm0, %v1715_v1 }
 0x5d0   :  { %2541 = vmatmul.msk.bf16.vlgmr.msra.gmra.mxu2 %vm183_vm0, %v1715_v1  ;;  %2542 = vmatmul.msk.bf16.vlgmr.msra.gmra.mxu3 %vm183_vm0, %v1715_v1 }
 0x5d1   :  { %1946 = vmatpush.bf16.msra.mxu0 %v2992_v29  ;;  %1959 = vmatpush.bf16.msra.mxu1 %v2994_v30 }
 0x5d2   :  { %1972 = vmatpush.bf16.msra.mxu2 %v2999_v36  ;;  %1985 = vmatpush.bf16.msra.mxu3 %v2997_v35 }
 0x5d5   :  { %1947 = vmatpush.bf16.msra.mxu0 %v3008_v40  ;;  %1960 = vmatpush.bf16.msra.mxu1 %v3010_v42 }
 0x5d6   :  { %1973 = vmatpush.bf16.msra.mxu2 %v3027_v49  ;;  %1986 = vmatpush.bf16.msra.mxu3 %v3025_v47 }
 0x63c   :  { %v1619_v62 = vpop.f32.mrf.mxu0  ;;  %v1632_v17 = vpop.f32.mrf.mxu1 }
 0x63d   :  { %v1620_v2 = vadd.f32 %v1619_v62, %v3283_v28  ;;  %v1633_v29 = vadd.f32 %v1632_v17, %v3286_v51 }
 0x63f   :  { %v2537_v27 = vmul.f32 -1.442695, %v1620_v2  ;;  %v2538_v30 = vmul.f32 -1.442695, %v1633_v29 }
 0x641   :  { %2728 = vpow2.f32 %v2537_v27 }
 0x642   :  { %2730 = vpow2.f32 %v2538_v30 }
 0x643   :  { %v1645_v36 = vpop.f32.mrf.mxu2  ;;  %v1658_v35 = vpop.f32.mrf.mxu3 }
 0x644   :  { %v1621_v52 = vpop.f32.mrf.mxu0  ;;  %v1634_v40 = vpop.f32.mrf.mxu1 }
 0x647   :  { %v2729_v56 = vpop.eup %2728 }
 0x648   :  { %v2731_v42 = vpop.eup %2730  ;;  %v1668_v25 = vadd.f32 1.0, %v2729_v56 }
 0x649   :  { %v3602_v49 = vadd.f32 1.0, %v2731_v42 }
 0x64a   :  { %2732 = vrcp.f32 %v1668_v25  ;;  %v1681_v63 = vand.u32 2147483648, %v1668_v25  ;;  %v1679_v29 = vand.u32 2147483647, %v1668_v25  ;;  %vm1675_vm13 = vweird.f32 %v1668_v25 }
 0x64b   :  { %2734 = vrcp.f32 %v3602_v49  ;;  %v1647_v47 = vpop.f32.mrf.mxu2  ;;  %v1660_v21 = vpop.f32.mrf.mxu3  ;;  %vm1690_vm2 = vweird.f32 %v3602_v49 }
 0x64c   :  { %v1728_v41 = vpop.f32.mrf.mxu0  ;;  %v1741_v57 = vpop.f32.mrf.mxu1  ;;  %v1682_v56 = vor.u32 1.1754944e-38, %v1681_v63  ;;  %v1659_v47 = vadd.f32 %v1658_v35, %v3306_v43  ;;  %vm1680_vm15 = vcmp.eq.f32.partialorder %v1679_v29, 8.507059e+37  ;;  %v1696_v35 = vand.u32 2147483648, %v3602_v49 }
 0x64d   :  { %v1771_v3 = vadd.f32 %v1728_v41, %v3815_v9  ;;  %v1772_v7 = vadd.f32 %v1741_v57, %v3816_v61  ;;  %v1646_v9 = vadd.f32 %v1645_v36, %v3310_v18 }
 0x64f   :  { %v2543_v26 = vmul.f32 -1.442695, %v1771_v3  ;;  %v2544_v22 = vmul.f32 -1.442695, %v1772_v7 }
 0x650   :  { %v2733_v39 = vpop.eup %2732 }
 0x651   :  { %v2735_v23 = vpop.eup %2734  ;;  %v1671_v6 = vmul.f32 %v2733_v39, %v1668_v25  ;;  %2736 = vpow2.f32 %v2543_v26  ;;  %vm1676_vm12 = vweird.f32 %v2733_v39 }
 0x652   :  { %2738 = vpow2.f32 %v2544_v22  ;;  %v1686_v15 = vmul.f32 %v2735_v23, %v3602_v49  ;;  %vm1677_vm14 = vmor %vm1675_vm13, %vm1676_vm12  ;;  %vm1691_vm1 = vweird.f32 %v2735_v23 }
 0x653   :  { %v1672_v44 = vsub.f32 1.0, %v1671_v6  ;;  %v1754_v19 = vpop.f32.mrf.mxu2  ;;  %v1767_v54 = vpop.f32.mrf.mxu3  ;;  %vm1692_vm3 = vmor %vm1690_vm2, %vm1691_vm1 }
 0x654   :  { %v3609_v10 = vadd.f32 %v1754_v19, %v3817_v33  ;;  %v1774_v1 = vadd.f32 %v1767_v54, %v3818_v24  ;;  %v1730_v62 = vpop.f32.mrf.mxu0  ;;  %v1743_v17 = vpop.f32.mrf.mxu1  ;;  %v1687_v40 = vsub.f32 1.0, %v1686_v15  ;;  %v1694_v19 = vand.u32 2147483647, %v3602_v49 }
 0x655   :  { %v1673_v2 = vmul.f32 %v2733_v39, %v1672_v44  ;;  %v1697_v24 = vor.u32 1.1754944e-38, %v1696_v35 }
 0x656   :  { %v1688_v26 = vmul.f32 %v2735_v23, %v1687_v40  ;;  %vm1695_vm5 = vcmp.eq.f32.partialorder %v1694_v19, 8.507059e+37 }
 0x657   :  { %v2737_v27 = vpop.eup %2736  ;;  %v1674_v30 = vadd.f32 %v2733_v39, %v1673_v2 }
 0x658   :  { %v2739_v52 = vpop.eup %2738  ;;  %v1781_v42 = vadd.f32 1.0, %v2737_v27  ;;  %v1689_v6 = vadd.f32 %v2735_v23, %v1688_v26 }
 0x659   :  { %v1678_v21 = vsel %vm1677_vm14, %v2733_v39, %v1674_v30  ;;  %v1782_v41 = vadd.f32 1.0, %v2739_v52 }
 0x65a   :  { %v1683_v57 = vsel %vm1680_vm15, %v1682_v56, %v1678_v21  ;;  %2740 = vrcp.f32 %v1781_v42  ;;  %v1693_v54 = vsel %vm1692_vm3, %v2735_v23, %v1689_v6  ;;  %v1794_v63 = vand.u32 2147483648, %v1781_v42 }
 0x65b   :  { %v1700_v3 = vmul.f32 %v1683_v57, %v1659_v47  ;;  %2742 = vrcp.f32 %v1782_v41  ;;  %v1756_v61 = vpop.f32.mrf.mxu2  ;;  %v1769_v7 = vpop.f32.mrf.mxu3  ;;  %v1792_v17 = vand.u32 2147483647, %v1781_v42  ;;  %v1698_v29 = vsel %vm1695_vm5, %v1697_v24, %v1693_v54 }
 0x65c   :  { %vm1788_vm6 = vweird.f32 %v1781_v42  ;;  %v1795_v49 = vor.u32 1.1754944e-38, %v1794_v63  ;;  %v1809_v7 = vand.u32 2147483648, %v1782_v41  ;;  %vm1803_vm11 = vweird.f32 %v1782_v41 }
 0x65d   :  { %v1701_v25 = vadd.f32 %v1700_v3, %v1646_v9  ;;  %vm1793_vm8 = vcmp.eq.f32.partialorder %v1792_v17, 8.507059e+37  ;;  %v1807_v26 = vand.u32 2147483647, %v1782_v41 }
 0x65f   :  { %2744 = vtanh.f32 %v1701_v25  ;;  %vm1808_vm13 = vcmp.eq.f32.partialorder %v1807_v26, 8.507059e+37 }
 0x660   :  { %v2741_v22 = vpop.eup %2740 }
 0x661   :  { %v2743_v44 = vpop.eup %2742  ;;  %v1784_v39 = vmul.f32 %v2741_v22, %v1781_v42  ;;  %vm1789_vm4 = vweird.f32 %v2741_v22 }
 0x662   :  { %v1799_v15 = vmul.f32 %v2743_v44, %v1782_v41  ;;  %vm1790_vm7 = vmor %vm1788_vm6, %vm1789_vm4  ;;  %vm1804_vm10 = vweird.f32 %v2743_v44 }
 0x663   :  { %v1785_v36 = vsub.f32 1.0, %v1784_v39  ;;  %vm1805_vm12 = vmor %vm1803_vm11, %vm1804_vm10 }
 0x664   :  { %v1800_v52 = vsub.f32 1.0, %v1799_v15 }
 0x665   :  { %v2745_v33 = vpop.eup %2744  ;;  %v1786_v62 = vmul.f32 %v2741_v22, %v1785_v36 }
 0x666   :  { %v1703_v2 = vsub.f32 %v3552_v58, %v2745_v33  ;;  %v1801_v21 = vmul.f32 %v2743_v44, %v1800_v52 }
 0x667   :  { %v1787_v27 = vadd.f32 %v2741_v22, %v1786_v62 }
 0x668   :  { %v1704_v30 = vmul.f32 %v1703_v2, %v1698_v29  ;;  %v1802_v61 = vadd.f32 %v2743_v44, %v1801_v21 }
 0x669   :  { %v1791_v40 = vsel %vm1790_vm7, %v2741_v22, %v1787_v27  ;;  %v1810_v22 = vor.u32 1.1754944e-38, %v1809_v7 }
 0x66a   :  { %v1705_v23 = vadd.f32 %v2745_v33, %v1704_v30  ;;  %v1796_v56 = vsel %vm1793_vm8, %v1795_v49, %v1791_v40 }
 0x66b   :  { %v1813_v47 = vmul.f32 %v1796_v56, %v1774_v1  ;;  %v1806_v1 = vsel %vm1805_vm12, %v2743_v44, %v1802_v61  ;;  %v3636_v44 = vld [vmem:[#allocation3 + $0x30] sm:$0xff] }
 0x66c   :  { %v1706_v57 = vsub.f32 %v1705_v23, %v3552_v58  ;;  %v3821_v23 = vld [vmem:[#allocation36_spill] sm:$0xff]  ;;  %v3822_v56 = vld [vmem:[#allocation37_spill] sm:$0xff] }
 0x66d   :  { %v1814_v9 = vadd.f32 %v1813_v47, %v3609_v10 }
 0x66e   :  { %v1707_v3 = vmul.f32 %v1706_v57, %v3492_v11  ;;  %v1811_v11 = vsel %vm1808_vm13, %v1810_v22, %v1806_v1 }
 0x66f   :  { %2746 = vtanh.f32 %v1814_v9 }
 0x670   :  { %v3622_v42 = vadd.f32 %v1707_v3, %v3552_v58 }
 0x672   :  { %1823 = vrot.lane.b32.xlu2 %v3622_v42, %s2925_s6 }
 0x675   :  { %v2747_v25 = vpop.eup %2746 }
 0x676   :  { %v1816_v10 = vsub.f32 %v3576_v5, %v2747_v25 }
 0x678   :  { %v1817_v6 = vmul.f32 %v1816_v10, %v1811_v11 }
 0x67a   :  { %v1818_v35 = vadd.f32 %v2747_v25, %v1817_v6 }
 0x67c   :  { %v1819_v41 = vsub.f32 %v1818_v35, %v3576_v5 }
 0x67e   :  { %v1820_v36 = vmul.f32 %v1819_v41, %v3636_v44 }
 0x680   :  { %v3646_v54 = vadd.f32 %v1820_v36, %v3576_v5 }
 0x682   :  { %v1936_v15 = vpack.c.bf16 %v3646_v54, %v3646_v54 }
 0x6cc   :  { %v1824_v39 = vpop.permute.xlu2 %1823 }
 0x6cd   :  { %v1826_v58 = vsel %vm183_vm0, %v3576_v5, %v1824_v39  ;;  %v3820_v5 = vld [vmem:[#allocation35_spill] sm:$0xff] }
 0x6ce   :  { %v1827_v19 = vpack.c.bf16 %v1826_v58, %v1826_v58  ;;  %v252_v63 = vadd.f32 %v3820_v5, %v3802_v13  ;;  %v310_v13 = vadd.f32 %v3822_v56, %v3805_v12 }
 0x6d0   :  { %2545 = vmatmul.msk.bf16.vlgmr.msrb.gmra.mxu0 %vm723_vm9, %v1827_v19  ;;  %2546 = vmatmul.msk.bf16.vlgmr.msrb.gmra.mxu1 %vm723_vm9, %v1827_v19 }
 0x6d1   :  { %2547 = vmatmul.msk.bf16.vlgmr.msrb.gmra.mxu2 %vm723_vm9, %v1827_v19  ;;  %2548 = vmatmul.msk.bf16.vlgmr.msrb.gmra.mxu3 %vm723_vm9, %v1827_v19 }
 0x6d2   :  { %2056 = vmatpush.bf16.msrb.mxu0 %v3147_v50  ;;  %2069 = vmatpush.bf16.msrb.mxu1 %v3153_v53 }
 0x6d3   :  { %2082 = vmatpush.bf16.msrb.mxu2 %v3155_v8  ;;  %2095 = vmatpush.bf16.msrb.mxu3 %v3162_v34 }
 0x6d6   :  { %2057 = vmatpush.bf16.msrb.mxu0 %v3173_v16  ;;  %2070 = vmatpush.bf16.msrb.mxu1 %v3177_v59 }
 0x6d7   :  { %2083 = vmatpush.bf16.msrb.mxu2 %v3179_v37  ;;  %2096 = vmatpush.bf16.msrb.mxu3 %v3185_v20 }
 0x6da   :  { %2058 = vmatpush.bf16.msrb.mxu0 %v3187_v31  ;;  %2071 = vmatpush.bf16.msrb.mxu1 %v3193_v14 }
 0x6db   :  { %2084 = vmatpush.bf16.msrb.mxu2 %v3200_v38  ;;  %2097 = vmatpush.bf16.msrb.mxu3 %v3202_v55 }
 0x6de   :  { %2059 = vmatpush.bf16.msrb.mxu0 %v3208_v32  ;;  %2072 = vmatpush.bf16.msrb.mxu1 %v3213_v45 }
 0x6df   :  { %2085 = vmatpush.bf16.msrb.mxu2 %v3215_v48  ;;  %2098 = vmatpush.bf16.msrb.mxu3 %v3218_v0 }
 0x6e0   :  { %2551 = vmatmul.msk.bf16.vlgmr.msra.gmra.mxu0 %vm183_vm0, %v1936_v15  ;;  %2552 = vmatmul.msk.bf16.vlgmr.msra.gmra.mxu1 %vm183_vm0, %v1936_v15 }
 0x6e1   :  { %2553 = vmatmul.msk.bf16.vlgmr.msra.gmra.mxu2 %vm183_vm0, %v1936_v15  ;;  %2554 = vmatmul.msk.bf16.vlgmr.msra.gmra.mxu3 %vm183_vm0, %v1936_v15 }
 0x6e2   :  { %2164 = vmatpush.bf16.msra.mxu0 %v3147_v50  ;;  %2177 = vmatpush.bf16.msra.mxu1 %v3153_v53 }
 0x6e3   :  { %2190 = vmatpush.bf16.msra.mxu2 %v3155_v8  ;;  %2203 = vmatpush.bf16.msra.mxu3 %v3162_v34 }
 0x6e6   :  { %2165 = vmatpush.bf16.msra.mxu0 %v3173_v16  ;;  %2178 = vmatpush.bf16.msra.mxu1 %v3177_v59 }
 0x6e7   :  { %2191 = vmatpush.bf16.msra.mxu2 %v3179_v37  ;;  %2204 = vmatpush.bf16.msra.mxu3 %v3185_v20 }
 0x6ea   :  { %2166 = vmatpush.bf16.msra.mxu0 %v3187_v31  ;;  %2179 = vmatpush.bf16.msra.mxu1 %v3193_v14 }
 0x6eb   :  { %2192 = vmatpush.bf16.msra.mxu2 %v3200_v38  ;;  %2205 = vmatpush.bf16.msra.mxu3 %v3202_v55 }
 0x6ee   :  { %2167 = vmatpush.bf16.msra.mxu0 %v3208_v32  ;;  %2180 = vmatpush.bf16.msra.mxu1 %v3213_v45 }
 0x6ef   :  { %2193 = vmatpush.bf16.msra.mxu2 %v3215_v48  ;;  %2206 = vmatpush.bf16.msra.mxu3 %v3218_v0  ;;  %v3819_v48 = vld [vmem:[#allocation33_spill] sm:$0xff] }
 0x6f0   :  { %v223_v0 = vadd.f32 %v3819_v48, %v3060_v60  ;;  %v281_v60 = vadd.f32 %v3821_v23, %v3074_v4 }
 0x74d   :  { %v1840_v50 = vpop.f32.mrf.mxu0  ;;  %v1853_v37 = vpop.f32.mrf.mxu1 }
 0x74e   :  { %v1841_v53 = vadd.f32 %v1840_v50, %v3283_v28  ;;  %v1854_v31 = vadd.f32 %v1853_v37, %v3286_v51 }
 0x750   :  { %v2549_v8 = vmul.f32 -1.442695, %v1841_v53  ;;  %v2550_v34 = vmul.f32 -1.442695, %v1854_v31 }
 0x752   :  { %2748 = vpow2.f32 %v2549_v8 }
 0x753   :  { %2750 = vpow2.f32 %v2550_v34 }
 0x754   :  { %v1866_v16 = vpop.f32.mrf.mxu2  ;;  %v1879_v59 = vpop.f32.mrf.mxu3 }
 0x755   :  { %v1842_v20 = vpop.f32.mrf.mxu0  ;;  %v1855_v14 = vpop.f32.mrf.mxu1  ;;  %v1880_v39 = vadd.f32 %v1879_v59, %v3306_v43  ;;  %v1867_v36 = vadd.f32 %v1866_v16, %v3310_v18 }
 0x758   :  { %v2749_v38 = vpop.eup %2748 }
 0x759   :  { %v2751_v55 = vpop.eup %2750  ;;  %v1889_v32 = vadd.f32 1.0, %v2749_v38 }
 0x75a   :  { %v3680_v45 = vadd.f32 1.0, %v2751_v55 }
 0x75b   :  { %2752 = vrcp.f32 %v1889_v32  ;;  %v1902_v3 = vand.u32 2147483648, %v1889_v32  ;;  %v1900_v22 = vand.u32 2147483647, %v1889_v32  ;;  %vm1896_vm15 = vweird.f32 %v1889_v32 }
 0x75c   :  { %2754 = vrcp.f32 %v3680_v45  ;;  %v1868_v33 = vpop.f32.mrf.mxu2  ;;  %v1881_v24 = vpop.f32.mrf.mxu3  ;;  %v1917_v59 = vand.u32 2147483648, %v3680_v45  ;;  %vm1911_vm4 = vweird.f32 %v3680_v45  ;;  %v1915_v38 = vand.u32 2147483647, %v3680_v45 }
 0x75d   :  { %v1949_v62 = vpop.f32.mrf.mxu0  ;;  %v1962_v17 = vpop.f32.mrf.mxu1  ;;  %v1903_v6 = vor.u32 1.1754944e-38, %v1902_v3  ;;  %vm1901_vm2 = vcmp.eq.f32.partialorder %v1900_v22, 8.507059e+37 }
 0x75e   :  { %v1992_v2 = vadd.f32 %v1949_v62, %v223_v0  ;;  %v1993_v29 = vadd.f32 %v1962_v17, %v252_v63  ;;  %v1918_v5 = vor.u32 1.1754944e-38, %v1917_v59  ;;  %vm1916_vm7 = vcmp.eq.f32.partialorder %v1915_v38, 8.507059e+37 }
 0x760   :  { %v2555_v27 = vmul.f32 -1.442695, %v1992_v2  ;;  %v2556_v30 = vmul.f32 -1.442695, %v1993_v29 }
 0x761   :  { %v2753_v52 = vpop.eup %2752 }
 0x762   :  { %v2755_v49 = vpop.eup %2754  ;;  %v1892_v40 = vmul.f32 %v2753_v52, %v1889_v32  ;;  %2756 = vpow2.f32 %v2555_v27  ;;  %vm1897_vm14 = vweird.f32 %v2753_v52 }
 0x763   :  { %2758 = vpow2.f32 %v2556_v30  ;;  %v1907_v9 = vmul.f32 %v2755_v49, %v3680_v45  ;;  %vm1898_vm1 = vmor %vm1896_vm15, %vm1897_vm14  ;;  %vm1912_vm3 = vweird.f32 %v2755_v49 }
 0x764   :  { %v1893_v47 = vsub.f32 1.0, %v1892_v40  ;;  %v1975_v21 = vpop.f32.mrf.mxu2  ;;  %v1988_v57 = vpop.f32.mrf.mxu3  ;;  %vm1913_vm5 = vmor %vm1911_vm4, %vm1912_vm3 }
 0x765   :  { %v3692_v61 = vadd.f32 %v1975_v21, %v281_v60  ;;  %v1995_v7 = vadd.f32 %v1988_v57, %v310_v13  ;;  %v1951_v26 = vpop.f32.mrf.mxu0  ;;  %v1964_v1 = vpop.f32.mrf.mxu1  ;;  %v1908_v12 = vsub.f32 1.0, %v1907_v9 }
 0x766   :  { %v1894_v25 = vmul.f32 %v2753_v52, %v1893_v47 }
 0x767   :  { %v1909_v53 = vmul.f32 %v2755_v49, %v1908_v12 }
 0x768   :  { %v2757_v10 = vpop.eup %2756  ;;  %v1895_v4 = vadd.f32 %v2753_v52, %v1894_v25 }
 0x769   :  { %v2759_v11 = vpop.eup %2758  ;;  %v2002_v35 = vadd.f32 1.0, %v2757_v10  ;;  %v1910_v34 = vadd.f32 %v2755_v49, %v1909_v53 }
 0x76a   :  { %v1899_v58 = vsel %vm1898_vm1, %v2753_v52, %v1895_v4  ;;  %v2003_v19 = vadd.f32 1.0, %v2759_v11 }
 0x76b   :  { %v1904_v41 = vsel %vm1901_vm2, %v1903_v6, %v1899_v58  ;;  %2760 = vrcp.f32 %v2002_v35  ;;  %v1914_v55 = vsel %vm1913_vm5, %v2755_v49, %v1910_v34  ;;  %v2015_v48 = vand.u32 2147483648, %v2002_v35 }
 0x76c   :  { %v1921_v15 = vmul.f32 %v1904_v41, %v1880_v39  ;;  %2762 = vrcp.f32 %v2003_v19  ;;  %v1977_v50 = vpop.f32.mrf.mxu2  ;;  %v1990_v37 = vpop.f32.mrf.mxu3  ;;  %v2013_v33 = vand.u32 2147483647, %v2002_v35  ;;  %v1919_v62 = vsel %vm1916_vm7, %v1918_v5, %v1914_v55 }
 0x76d   :  { %vm2009_vm8 = vweird.f32 %v2002_v35  ;;  %v2016_v45 = vor.u32 1.1754944e-38, %v2015_v48  ;;  %v2030_v21 = vand.u32 2147483648, %v2003_v19  ;;  %vm2024_vm13 = vweird.f32 %v2003_v19 }
 0x76e   :  { %v1922_v31 = vadd.f32 %v1921_v15, %v1867_v36  ;;  %vm2014_vm11 = vcmp.eq.f32.partialorder %v2013_v33, 8.507059e+37  ;;  %v2028_v57 = vand.u32 2147483647, %v2003_v19 }
 0x770   :  { %2764 = vtanh.f32 %v1922_v31  ;;  %vm2029_vm15 = vcmp.eq.f32.partialorder %v2028_v57, 8.507059e+37 }
 0x771   :  { %v2761_v8 = vpop.eup %2760 }
 0x772   :  { %v2763_v20 = vpop.eup %2762  ;;  %v2005_v14 = vmul.f32 %v2761_v8, %v2002_v35  ;;  %vm2010_vm6 = vweird.f32 %v2761_v8 }
 0x773   :  { %v2020_v32 = vmul.f32 %v2763_v20, %v2003_v19  ;;  %vm2011_vm10 = vmor %vm2009_vm8, %vm2010_vm6  ;;  %vm2025_vm12 = vweird.f32 %v2763_v20 }
 0x774   :  { %v2006_v16 = vsub.f32 1.0, %v2005_v14  ;;  %vm2026_vm14 = vmor %vm2024_vm13, %vm2025_vm12 }
 0x775   :  { %v2021_v29 = vsub.f32 1.0, %v2020_v32 }
 0x776   :  { %v2765_v0 = vpop.eup %2764  ;;  %v2007_v63 = vmul.f32 %v2761_v8, %v2006_v16 }
 0x777   :  { %v1924_v24 = vsub.f32 %v3622_v42, %v2765_v0  ;;  %v2022_v40 = vmul.f32 %v2763_v20, %v2021_v29 }
 0x778   :  { %v2008_v17 = vadd.f32 %v2761_v8, %v2007_v63 }
 0x779   :  { %v1925_v2 = vmul.f32 %v1924_v24, %v1919_v62  ;;  %v2023_v13 = vadd.f32 %v2763_v20, %v2022_v40 }
 0x77a   :  { %v2012_v27 = vsel %vm2011_vm10, %v2761_v8, %v2008_v17 }
 0x77b   :  { %v1926_v30 = vadd.f32 %v2765_v0, %v1925_v2  ;;  %v2017_v52 = vsel %vm2014_vm11, %v2016_v45, %v2012_v27  ;;  %v2027_v9 = vsel %vm2026_vm14, %v2763_v20, %v2023_v13 }
 0x77c   :  { %v2034_v49 = vmul.f32 %v2017_v52, %v1995_v7  ;;  %v2031_v7 = vor.u32 1.1754944e-38, %v2030_v21 }
 0x77d   :  { %v1927_v23 = vsub.f32 %v1926_v30, %v3622_v42 }
 0x77e   :  { %v2035_v60 = vadd.f32 %v2034_v49, %v3692_v61 }
 0x77f   :  { %v1928_v56 = vmul.f32 %v1927_v23, %v3566_v46  ;;  %v2032_v46 = vsel %vm2029_vm15, %v2031_v7, %v2027_v9 }
 0x780   :  { %2766 = vtanh.f32 %v2035_v60 }
 0x781   :  { %v3704_v47 = vadd.f32 %v1928_v56, %v3622_v42 }
 0x783   :  { %2044 = vrot.lane.b32.xlu2 %v3704_v47, %s2925_s6 }
 0x786   :  { %v2767_v3 = vpop.eup %2766 }
 0x787   :  { %v2037_v61 = vsub.f32 %v3646_v54, %v2767_v3 }
 0x789   :  { %v2038_v26 = vmul.f32 %v2037_v61, %v2032_v46 }
 0x78b   :  { %v3709_v1 = vadd.f32 %v2767_v3, %v2038_v26  ;;  %v3731_v3 = vld [vmem:[#allocation3 + $0x38] sm:$0xff] }
 0x78d   :  { %v2040_v9 = vsub.f32 %v3709_v1, %v3646_v54 }
 0x78f   :  { %v2041_v7 = vmul.f32 %v2040_v9, %v3731_v3 }
 0x791   :  { %v2042_v61 = vadd.f32 %v2041_v7, %v3646_v54 }
 0x7dd   :  { %v2045_v25 = vpop.permute.xlu2 %2044 }
 0x7de   :  { %v2047_v42 = vsel %vm183_vm0, %v3646_v54, %v2045_v25 }
 0x7df   :  { %v2048_v22 = vpack.c.bf16 %v2047_v42, %v2047_v42 }
 0x7e1   :  { %2557 = vmatmul.msk.bf16.vlgmr.msrb.gmra.mxu0 %vm723_vm9, %v2048_v22  ;;  %2558 = vmatmul.msk.bf16.vlgmr.msrb.gmra.mxu1 %vm723_vm9, %v2048_v22 }
 0x7e2   :  { %2559 = vmatmul.msk.bf16.vlgmr.msrb.gmra.mxu2 %vm723_vm9, %v2048_v22  ;;  %2560 = vmatmul.msk.bf16.vlgmr.msrb.gmra.mxu3 %vm723_vm9, %v2048_v22 }
 0x85e   :  { %v2061_v10 = vpop.f32.mrf.mxu0  ;;  %v2074_v4 = vpop.f32.mrf.mxu1 }
 0x85f   :  { %v2062_v11 = vadd.f32 %v2061_v10, %v3283_v28  ;;  %v2075_v12 = vadd.f32 %v2074_v4, %v3286_v51 }
 0x861   :  { %v2561_v6 = vmul.f32 -1.442695, %v2062_v11  ;;  %v2562_v35 = vmul.f32 -1.442695, %v2075_v12 }
 0x863   :  { %2768 = vpow2.f32 %v2561_v6 }
 0x864   :  { %2770 = vpow2.f32 %v2562_v35 }
 0x865   :  { %v2087_v39 = vpop.f32.mrf.mxu2  ;;  %v2100_v58 = vpop.f32.mrf.mxu3 }
 0x866   :  { %v2063_v19 = vpop.f32.mrf.mxu0  ;;  %v2076_v41 = vpop.f32.mrf.mxu1  ;;  %v2101_v5 = vadd.f32 %v2100_v58, %v3306_v43  ;;  %v2088_v24 = vadd.f32 %v2087_v39, %v3310_v18 }
 0x869   :  { %v2769_v36 = vpop.eup %2768 }
 0x86a   :  { %v2771_v15 = vpop.eup %2770  ;;  %v2110_v50 = vadd.f32 1.0, %v2769_v36 }
 0x86b   :  { %v2111_v37 = vadd.f32 1.0, %v2771_v15 }
 0x86c   :  { %2772 = vrcp.f32 %v2110_v50  ;;  %v2123_v38 = vand.u32 2147483648, %v2110_v50  ;;  %v2121_v55 = vand.u32 2147483647, %v2110_v50  ;;  %vm2117_vm2 = vweird.f32 %v2110_v50 }
 0x86d   :  { %2774 = vrcp.f32 %v2111_v37  ;;  %v2089_v53 = vpop.f32.mrf.mxu2  ;;  %v2102_v31 = vpop.f32.mrf.mxu3  ;;  %v2138_v45 = vand.u32 2147483648, %v2111_v37  ;;  %vm2132_vm6 = vweird.f32 %v2111_v37  ;;  %v2136_v27 = vand.u32 2147483647, %v2111_v37 }
 0x86e   :  { %v2124_v0 = vor.u32 1.1754944e-38, %v2123_v38  ;;  %vm2122_vm4 = vcmp.eq.f32.partialorder %v2121_v55, 8.507059e+37 }
 0x86f   :  { %v2139_v49 = vor.u32 1.1754944e-38, %v2138_v45  ;;  %vm2137_vm8 = vcmp.eq.f32.partialorder %v2136_v27, 8.507059e+37 }
 0x872   :  { %v2773_v8 = vpop.eup %2772 }
 0x873   :  { %v2775_v34 = vpop.eup %2774  ;;  %v2113_v20 = vmul.f32 %v2773_v8, %v2110_v50  ;;  %vm2118_vm1 = vweird.f32 %v2773_v8 }
 0x874   :  { %v2128_v14 = vmul.f32 %v2775_v34, %v2111_v37  ;;  %vm2119_vm3 = vmor %vm2117_vm2, %vm2118_vm1  ;;  %vm2133_vm5 = vweird.f32 %v2775_v34  ;;  %vm2296_vm2 = vcmask 130048  }
 0x875   :  { %v2114_v59 = vsub.f32 1.0, %v2113_v20  ;;  %vm2134_vm7 = vmor %vm2132_vm6, %vm2133_vm5 }
 0x876   :  { %v2129_v48 = vsub.f32 1.0, %v2128_v14 }
 0x877   :  { %v2115_v16 = vmul.f32 %v2773_v8, %v2114_v59 }
 0x878   :  { %v2130_v17 = vmul.f32 %v2775_v34, %v2129_v48 }
 0x879   :  { %v2116_v32 = vadd.f32 %v2773_v8, %v2115_v16 }
 0x87a   :  { %v2131_v29 = vadd.f32 %v2775_v34, %v2130_v17 }
 0x87b   :  { %v2120_v63 = vsel %vm2119_vm3, %v2773_v8, %v2116_v32 }
 0x87c   :  { %v2125_v33 = vsel %vm2122_vm4, %v2124_v0, %v2120_v63  ;;  %v2135_v30 = vsel %vm2134_vm7, %v2775_v34, %v2131_v29 }
 0x87d   :  { %v2142_v62 = vmul.f32 %v2125_v33, %v2101_v5  ;;  %v2140_v23 = vsel %vm2137_vm8, %v2139_v49, %v2135_v30 }
 0x87f   :  { %v2143_v2 = vadd.f32 %v2142_v62, %v2088_v24 }
 0x881   :  { %2776 = vtanh.f32 %v2143_v2 }
 0x887   :  { %v2777_v52 = vpop.eup %2776 }
 0x888   :  { %v2145_v40 = vsub.f32 %v3704_v47, %v2777_v52 }
 0x88a   :  { %v2146_v60 = vmul.f32 %v2145_v40, %v2140_v23  ;;  %v2627_v40 = vld [vmem:[%s3769_s8] ss:$0 sm:$0xff] }
 0x88c   :  { %v2147_v56 = vadd.f32 %v2777_v52, %v2146_v60 }
 0x88e   :  { %v2148_v13 = vsub.f32 %v2147_v56, %v3704_v47 }
 0x890   :  { %v2149_v21 = vmul.f32 %v2148_v13, %v3636_v44 }
 0x892   :  { %v3725_v57 = vadd.f32 %v2149_v21, %v3704_v47 }
 0x894   :  { %2152 = vrot.lane.b32.xlu0 %v3725_v57, %s2925_s6 }
 0x906   :  { %v2153_v46 = vpop.permute.xlu0 %2152 }
 0x907   :  { %v2155_v26 = vsel %vm183_vm0, %v2042_v61, %v2153_v46 }
 0x908   :  { %v2156_v25 = vpack.c.bf16 %v2155_v26, %v2155_v26 }
 0x90a   :  { %2563 = vmatmul.msk.bf16.vlgmr.msra.gmra.mxu0 %vm723_vm9, %v2156_v25  ;;  %2564 = vmatmul.msk.bf16.vlgmr.msra.gmra.mxu1 %vm723_vm9, %v2156_v25 }
 0x90b   :  { %2565 = vmatmul.msk.bf16.vlgmr.msra.gmra.mxu2 %vm723_vm9, %v2156_v25  ;;  %2566 = vmatmul.msk.bf16.vlgmr.msra.gmra.mxu3 %vm723_vm9, %v2156_v25 }
 0x987   :  { %v2169_v44 = vpop.f32.mrf.mxu0  ;;  %v2182_v47 = vpop.f32.mrf.mxu1 }
 0x988   :  { %v2170_v1 = vadd.f32 %v2169_v44, %v3283_v28  ;;  %v2183_v42 = vadd.f32 %v2182_v47, %v3286_v51  ;;  %v2615_v28 = vld [vmem:[%s3768_s7 + $0x8] sm:$0xff]  ;;  %v2614_v51 = vld [vmem:[%s3768_s7] sm:$0xff] }
 0x989   :  { %2289 = vmatpush.bf16.msrb.mxu0 %v2615_v28 }
 0x98a   :  { %v2567_v22 = vmul.f32 -1.442695, %v2170_v1  ;;  %v2568_v54 = vmul.f32 -1.442695, %v2183_v42 }
 0x98c   :  { %2778 = vpow2.f32 %v2567_v22 }
 0x98d   :  { %2780 = vpow2.f32 %v2568_v54  ;;  %2290 = vmatpush.bf16.msrb.mxu0 %v2614_v51 }
 0x98e   :  { %v2195_v10 = vpop.f32.mrf.mxu2  ;;  %v2208_v4 = vpop.f32.mrf.mxu3 }
 0x98f   :  { %v2171_v11 = vpop.f32.mrf.mxu0  ;;  %v2184_v12 = vpop.f32.mrf.mxu1  ;;  %v2209_v38 = vadd.f32 %v2208_v4, %v3306_v43  ;;  %v2196_v32 = vadd.f32 %v2195_v10, %v3310_v18 }
 0x992   :  { %v2779_v6 = vpop.eup %2778 }
 0x993   :  { %v2781_v35 = vpop.eup %2780  ;;  %v2218_v39 = vadd.f32 1.0, %v2779_v6 }
 0x994   :  { %v2219_v58 = vadd.f32 1.0, %v2781_v35 }
 0x995   :  { %2782 = vrcp.f32 %v2218_v39  ;;  %v2231_v31 = vand.u32 2147483648, %v2218_v39  ;;  %v2229_v34 = vand.u32 2147483647, %v2218_v39  ;;  %vm2225_vm10 = vweird.f32 %v2218_v39 }
 0x996   :  { %2784 = vrcp.f32 %v2219_v58  ;;  %v2197_v19 = vpop.f32.mrf.mxu2  ;;  %v2210_v41 = vpop.f32.mrf.mxu3  ;;  %v2246_v33 = vand.u32 2147483648, %v2219_v58  ;;  %vm2240_vm14 = vweird.f32 %v2219_v58  ;;  %v2244_v24 = vand.u32 2147483647, %v2219_v58 }
 0x997   :  { %v2232_v14 = vor.u32 1.1754944e-38, %v2231_v31  ;;  %vm2230_vm12 = vcmp.eq.f32.partialorder %v2229_v34, 8.507059e+37 }
 0x998   :  { %v2247_v2 = vor.u32 1.1754944e-38, %v2246_v33  ;;  %vm2245_vm1 = vcmp.eq.f32.partialorder %v2244_v24, 8.507059e+37 }
 0x99b   :  { %v2783_v36 = vpop.eup %2782 }
 0x99c   :  { %v2785_v15 = vpop.eup %2784  ;;  %v2221_v50 = vmul.f32 %v2783_v36, %v2218_v39  ;;  %vm2226_vm9 = vweird.f32 %v2783_v36 }
 0x99d   :  { %v2236_v53 = vmul.f32 %v2785_v15, %v2219_v58  ;;  %vm2227_vm11 = vmor %vm2225_vm10, %vm2226_vm9  ;;  %vm2241_vm13 = vweird.f32 %v2785_v15 }
 0x99e   :  { %v2222_v37 = vsub.f32 1.0, %v2221_v50  ;;  %vm2242_vm15 = vmor %vm2240_vm14, %vm2241_vm13 }
 0x99f   :  { %v2237_v59 = vsub.f32 1.0, %v2236_v53 }
 0x9a0   :  { %v2223_v8 = vmul.f32 %v2783_v36, %v2222_v37 }
 0x9a1   :  { %v2238_v0 = vmul.f32 %v2785_v15, %v2237_v59 }
 0x9a2   :  { %v2224_v20 = vadd.f32 %v2783_v36, %v2223_v8 }
 0x9a3   :  { %v2239_v63 = vadd.f32 %v2785_v15, %v2238_v0 }
 0x9a4   :  { %v2228_v16 = vsel %vm2227_vm11, %v2783_v36, %v2224_v20 }
 0x9a5   :  { %v2233_v55 = vsel %vm2230_vm12, %v2232_v14, %v2228_v16  ;;  %v2243_v62 = vsel %vm2242_vm15, %v2785_v15, %v2239_v63 }
 0x9a6   :  { %v2250_v48 = vmul.f32 %v2233_v55, %v2209_v38  ;;  %v2248_v29 = vsel %vm2245_vm1, %v2247_v2, %v2243_v62 }
 0x9a8   :  { %v2251_v5 = vadd.f32 %v2250_v48, %v2196_v32 }
 0x9aa   :  { %2786 = vtanh.f32 %v2251_v5 }
 0x9b0   :  { %v2787_v17 = vpop.eup %2786 }
 0x9b1   :  { %v2253_v43 = vsub.f32 %v3725_v57, %v2787_v17 }
 0x9b3   :  { %v2254_v45 = vmul.f32 %v2253_v43, %v2248_v29 }
 0x9b5   :  { %v2255_v27 = vadd.f32 %v2787_v17, %v2254_v45 }
 0x9b7   :  { %v2256_v18 = vsub.f32 %v2255_v27, %v3725_v57 }
 0x9b9   :  { %v2257_v30 = vmul.f32 %v2256_v18, %v3731_v3 }
 0x9bb   :  { %v2258_v52 = vadd.f32 %v2257_v30, %v3725_v57 }
 0x9bd   :  { %v2259_v49 = vpack.c.bf16 %v2258_v52, %v2258_v52 }
 0x9bf   :  { %2577 = vmatmul.msk.bf16.vlgmr.msrb.gmra.mxu0 %vm183_vm0, %v2259_v49 }
 0xa3c   :  { %v2292_v23 = vpop.f32.mrf.mxu0 }
 0xa3d   :  { %v2293_v60 = vadd.f32 %v2627_v40, %v2292_v23 }
 0xa3f   :  { %2297 = vst.msk [vmem:[#allocation11] sm:$0xff] %vm2296_vm2, %v2293_v60 }
 0xa40   :  { %2308 = dma.vmem_to_hbm [thread:$0]  %s2304_s23, 128, %s2306_s26, [#allocation5]  }
 0xa44   :  { %v2294_v56 = vpop.f32.mrf.mxu0 }
 0xa45   :  { %2914 = dma.done.wait [#allocation5], 128  }
 0xa46   :  { %2915 = vsyncadd [#allocation5], 4294967168 }
 0xa47   :  { %2313 = vsyncpa [#allocation4], 1 }
 0xa48   :  { %2314 = vsyncpa [#allocation7], 1 }
 0xa49   :  { %2315 = vsyncpa [#allocation10], 1 }
 0xa4a   :  { %2316 = vsyncpa [#allocation5], 1 }

</bundles_post_ra>
